<compile_context>
chip_gen: v7x
topology: tpu7x:2x2x1
jax: 0.10.0
libtpu: 0.0.40
codegen_flags: <defaults>
</compile_context>

<pallas_src>
import functools
import math

import jax
import jax.numpy as jnp
from jax.experimental import pallas as pl
from jax.experimental.pallas import tpu as pltpu

_F32 = jnp.float32
_BF16 = jnp.bfloat16


# ---------------------------------------------------------------------------
# Small helpers (host side)
# ---------------------------------------------------------------------------
def _pick_band_rows(h, w):
    """Smallest row-band tr dividing H with lane-dense (tr*W >= 128) tiles.

    Smaller tr -> more grid steps (pipelining / megacore), at the cost of a
    (tr+2)/tr halo overhead, so tr >= 2 is required."""
    for tr in range(2, h + 1):
        if h % tr == 0 and tr * w >= 128:
            return tr
    return h


def _pick_group_block(g):
    """Largest patch-group block that still leaves >= 4 grid steps."""
    for gb in (8, 4, 2, 1):
        if g % gb == 0 and g // gb >= 4:
            return gb
    return 1


def _vmem_limit_bytes(blocks):
    """Right-sized scoped-VMEM limit: 8x the per-step block footprint (double
    buffering + compiler scratch slack), clamped to [8 MiB, 64 MiB]."""
    total = sum(math.prod(s) * jnp.dtype(d).itemsize for s, d in blocks)
    return int(min(64 * 2 ** 20, max(8 * 2 ** 20, 8 * total)))


def _bands_cm(x_cm, tr):
    """(C, B, H, W) -> (B*H//tr, C, (tr+2)*W + 2) bf16 row-bands.

    Each band holds tr output rows plus a 1-row halo on each side (zero rows at
    the image border) and a 1-element guard at both flat ends so every 3x3 tap
    is a plain static slice inside the kernel."""
    c, b, h, w = x_cm.shape
    nb = h // tr
    xp = jnp.pad(x_cm, ((0, 0), (0, 0), (1, 1), (0, 0)))
    bands = jnp.stack(
        [xp[:, :, r * tr: r * tr + tr + 2, :] for r in range(nb)], axis=2)
    bands = bands.transpose(1, 2, 0, 3, 4).reshape(b * nb, c, (tr + 2) * w)
    bands = jnp.pad(bands, ((0, 0), (0, 0), (1, 1)))
    return bands.astype(_BF16)


def _col_masks(tr, w):
    """(2, tr*W) multiplicative masks zeroing the out-of-row columns of the
    dj=+1 (row 0) / dj=-1 (row 1) taps."""
    col = jnp.arange(tr * w) % w
    return jnp.stack([col != (w - 1), col != 0]).astype(_BF16)


def _fold3x3(w_hwio, scale=None):
    """(3, 3, ci, co) [optionally * BN scale] -> (9, co, ci) bf16 (tap-major)."""
    kh, kw, ci, co = w_hwio.shape
    w = w_hwio if scale is None else w_hwio * scale[None, None, None, :]
    return w.reshape(kh * kw, ci, co).transpose(0, 2, 1).astype(_BF16)


# ---------------------------------------------------------------------------
# In-kernel 3x3 tap accumulation (taps built from the band via static slices)
# ---------------------------------------------------------------------------
def _accum_3x3(xb, w_ref, mp, mm, w, l, acc):
    """acc += sum_taps W[tap] @ tap(xb).  xb is (Ci, (tr+2)*W + 2)."""
    for di in range(3):
        for dj in (-1, 0, 1):
            start = 1 + di * w + dj
            t = xb[:, start:start + l]
            if dj == 1:
                t = t * mp
            elif dj == -1:
                t = t * mm
            acc = acc + jnp.dot(w_ref[di * 3 + dj + 1], t,
                                preferred_element_type=jnp.float32)
    return acc


# ---------------------------------------------------------------------------
# Kernel 1: local representation (3x3 conv+BN+SiLU -> 1x1 conv+BN+SiLU, fused)
# ---------------------------------------------------------------------------
def _local_rep_kernel(x_ref, mask_ref, w1_ref, s1_ref, w2_ref, s2_ref, o_ref,
                      *, tr, w):
    l = tr * w
    xb = x_ref[0]                               # (Cin, (tr+2)*W + 2) bf16
    masks = mask_ref[...]
    mp, mm = masks[0:1], masks[1:2]
    co1 = w1_ref.shape[1]
    acc = jnp.zeros((co1, l), jnp.float32)
    acc = _accum_3x3(xb, w1_ref, mp, mm, w, l, acc)
    y = acc + s1_ref[...]                       # BN shift (scale folded into W)
    y = (y * jax.nn.sigmoid(y)).astype(_BF16)   # SiLU
    z = jnp.dot(w2_ref[...], y, preferred_element_type=jnp.float32)
    z = z + s2_ref[...]
    z = z * jax.nn.sigmoid(z)
    o_ref[...] = z.astype(o_ref.dtype)


def _local_representation(x_bands, masks, w1f, s1, w2f, s2, d, m, tr, w):
    s_steps, cin, lb = x_bands.shape
    l = tr * w
    kern = functools.partial(_local_rep_kernel, tr=tr, w=w)
    vmem = _vmem_limit_bytes([
        ((cin, lb), _BF16), ((2, l), _BF16), ((9, cin, cin), _BF16),
        ((cin, 1), _F32), ((d, cin), _BF16), ((d, 1), _F32), ((d, l), _BF16)])
    return pl.pallas_call(
        kern,
        out_shape=jax.ShapeDtypeStruct((d, m), _BF16),
        grid_spec=pltpu.PrefetchScalarGridSpec(
            num_scalar_prefetch=0,
            grid=(s_steps,),
            in_specs=[
                pl.BlockSpec((1, cin, lb), lambda i: (i, 0, 0)),
                pl.BlockSpec((2, l), lambda i: (0, 0)),
                pl.BlockSpec((9, cin, cin), lambda i: (0, 0, 0)),
                pl.BlockSpec((cin, 1), lambda i: (0, 0)),
                pl.BlockSpec((d, cin), lambda i: (0, 0)),
                pl.BlockSpec((d, 1), lambda i: (0, 0)),
            ],
            out_specs=pl.BlockSpec((d, l), lambda i: (0, i)),
        ),
        compiler_params=pltpu.CompilerParams(
            dimension_semantics=("parallel",), vmem_limit_bytes=vmem),
    )(x_bands, masks, w1f, s1, w2f, s2)


# ---------------------------------------------------------------------------
# Kernel 2: transformer stack (fori over layers) + fused fusion_block1 (1x1)
# ---------------------------------------------------------------------------
def _transformer_kernel(x_ref, ln1g_ref, ln1b_ref, wq_ref, wk_ref, wv_ref,
                        wo_ref, ln2g_ref, ln2b_ref, w1_ref, b1_ref, w2_ref,
                        b2_ref, wf1_ref, bf1_ref, o_ref, *, n_layers):
    gb, n, d = x_ref.shape
    x = x_ref[...].astype(jnp.float32).reshape(gb * n, d)

    def layer_norm(v, g, b):
        mu = jnp.mean(v, axis=-1, keepdims=True)
        var = jnp.mean((v - mu) ** 2, axis=-1, keepdims=True)
        return (v - mu) * jax.lax.rsqrt(var + 1e-5) * g + b

    def body(layer, xc):
        xn = layer_norm(xc, ln1g_ref[layer], ln1b_ref[layer]).astype(_BF16)
        q = jnp.dot(xn, wq_ref[layer], preferred_element_type=jnp.float32)
        k = jnp.dot(xn, wk_ref[layer], preferred_element_type=jnp.float32)
        v = jnp.dot(xn, wv_ref[layer], preferred_element_type=jnp.float32)
        dh = q.shape[-1]
        q3 = q.reshape(gb, n, dh).astype(_BF16)
        k3 = k.reshape(gb, n, dh).astype(_BF16)
        v3 = v.reshape(gb, n, dh).astype(_BF16)
        # attn scale already folded into wq on the host
        dots = jnp.einsum('gnk,gmk->gnm', q3, k3,
                          preferred_element_type=jnp.float32)
        mx = jnp.max(dots, axis=-1, keepdims=True)
        e = jnp.exp(dots - mx)
        attn = e * pl.reciprocal(jnp.sum(e, axis=-1, keepdims=True),
                                 approx=True)
        ctx = jnp.einsum('gnm,gmk->gnk', attn.astype(_BF16), v3,
                         preferred_element_type=jnp.float32)
        xc = xc + jnp.dot(ctx.reshape(gb * n, dh).astype(_BF16), wo_ref[layer],
                          preferred_element_type=jnp.float32)
        xn2 = layer_norm(xc, ln2g_ref[layer], ln2b_ref[layer]).astype(_BF16)
        h = jnp.dot(xn2, w1_ref[layer],
                    preferred_element_type=jnp.float32) + b1_ref[layer]
        h = (h * jax.nn.sigmoid(h)).astype(_BF16)
        xc = xc + jnp.dot(h, w2_ref[layer],
                          preferred_element_type=jnp.float32) + b2_ref[layer]
        return xc

    x = jax.lax.fori_loop(0, n_layers, body, x)

    # fusion_block1 (1x1 conv, D -> Cin) fused as epilogue.
    fuse = jnp.dot(x.astype(_BF16), wf1_ref[...],
                   preferred_element_type=jnp.float32) + bf1_ref[...]
    o_ref[...] = fuse.reshape(gb, n, -1).astype(o_ref.dtype)


def _transformer_fuse(g, tw, wf1, bf1):
    gg, n, d = g.shape
    nl = tw["wq"].shape[0]
    dh = tw["wq"].shape[-1]
    mlp = tw["w1"].shape[-1]
    cin = wf1.shape[-1]
    gb = _pick_group_block(gg)

    def full(shape):
        rank = len(shape)
        return pl.BlockSpec(shape, lambda i: (0,) * rank)

    kern = functools.partial(_transformer_kernel, n_layers=nl)
    vmem = _vmem_limit_bytes([
        ((gb, n, d), _BF16), ((gb, n, cin), _BF16),
        ((nl, d, dh), _BF16), ((nl, d, dh), _BF16), ((nl, d, dh), _BF16),
        ((nl, dh, d), _BF16), ((nl, d, mlp), _BF16), ((nl, mlp, d), _BF16),
        ((nl, 1, mlp), _F32), ((nl, 1, d), _F32), ((d, cin), _BF16)])
    return pl.pallas_call(
        kern,
        out_shape=jax.ShapeDtypeStruct((gg, n, cin), _BF16),
        grid_spec=pltpu.PrefetchScalarGridSpec(
            num_scalar_prefetch=0,
            grid=(gg // gb,),
            in_specs=[
                pl.BlockSpec((gb, n, d), lambda i: (i, 0, 0)),
                full((nl, 1, d)), full((nl, 1, d)),
                full((nl, d, dh)), full((nl, d, dh)), full((nl, d, dh)),
                full((nl, dh, d)),
                full((nl, 1, d)), full((nl, 1, d)),
                full((nl, d, mlp)), full((nl, 1, mlp)),
                full((nl, mlp, d)), full((nl, 1, d)),
                full((d, cin)), full((1, cin)),
            ],
            out_specs=pl.BlockSpec((gb, n, cin), lambda i: (i, 0, 0)),
        ),
        compiler_params=pltpu.CompilerParams(
            dimension_semantics=("parallel",), vmem_limit_bytes=vmem),
    )(g, tw["ln1_g"], tw["ln1_b"], tw["wq"], tw["wk"], tw["wv"], tw["wo"],
      tw["ln2_g"], tw["ln2_b"], tw["w1"], tw["b1"], tw["w2"], tw["b2"],
      wf1, bf1)


# ---------------------------------------------------------------------------
# Kernel 3: fusion_block2 (3x3 conv on concat([x, fuse]) without the concat)
# ---------------------------------------------------------------------------
def _fusion_conv_kernel(x_ref, f_ref, mask_ref, wx_ref, wf_ref, b_ref, o_ref,
                        *, tr, w):
    l = tr * w
    masks = mask_ref[...]
    mp, mm = masks[0:1], masks[1:2]
    cout = wx_ref.shape[1]
    acc = jnp.zeros((cout, l), jnp.float32)
    acc = _accum_3x3(x_ref[0], wx_ref, mp, mm, w, l, acc)
    acc = _accum_3x3(f_ref[0], wf_ref, mp, mm, w, l, acc)
    o_ref[...] = (acc + b_ref[...]).astype(o_ref.dtype)


def _fusion_conv(x_bands, f_bands, masks, wx, wf, bias, cout, m, tr, w):
    s_steps, cin, lb = x_bands.shape
    l = tr * w
    kern = functools.partial(_fusion_conv_kernel, tr=tr, w=w)
    vmem = _vmem_limit_bytes([
        ((cin, lb), _BF16), ((cin, lb), _BF16), ((2, l), _BF16),
        ((9, cout, cin), _BF16), ((9, cout, cin), _BF16), ((cout, 1), _F32),
        ((cout, l), _F32)])
    return pl.pallas_call(
        kern,
        out_shape=jax.ShapeDtypeStruct((cout, m), _F32),
        grid_spec=pltpu.PrefetchScalarGridSpec(
            num_scalar_prefetch=0,
            grid=(s_steps,),
            in_specs=[
                pl.BlockSpec((1, cin, lb), lambda i: (i, 0, 0)),
                pl.BlockSpec((1, cin, lb), lambda i: (i, 0, 0)),
                pl.BlockSpec((2, l), lambda i: (0, 0)),
                pl.BlockSpec((9, cout, cin), lambda i: (0, 0, 0)),
                pl.BlockSpec((9, cout, cin), lambda i: (0, 0, 0)),
                pl.BlockSpec((cout, 1), lambda i: (0, 0)),
            ],
            out_specs=pl.BlockSpec((cout, l), lambda i: (0, i)),
        ),
        compiler_params=pltpu.CompilerParams(
            dimension_semantics=("parallel",), vmem_limit_bytes=vmem),
    )(x_bands, f_bands, masks, wx, wf, bias)


# ---------------------------------------------------------------------------
# Full MobileVitBlock forward
# ---------------------------------------------------------------------------
def mobilevit_block(x_nchw, params):
    b, cin, h, w = x_nchw.shape
    d = params["conv2_w"].shape[-1]
    cout = params["f2_w"].shape[-1]
    h2, w2 = h // 2, w // 2
    n = h2 * w2
    g_total = b * 4
    m = b * h * w
    tr = _pick_band_rows(h, w)

    x_cm = jnp.transpose(x_nchw, (1, 0, 2, 3))          # (Cin, B, H, W)
    x_bands = _bands_cm(x_cm, tr)                       # shared by kernels 1 & 3
    masks = _col_masks(tr, w)

    # --- local representation (conv1 3x3 + conv2 1x1, BN scales folded) ---
    w1f = _fold3x3(params["conv1_w"], params["bn1_scale"])
    s1 = params["bn1_shift"].reshape(cin, 1).astype(_F32)
    w2f = (params["conv2_w"][0, 0] * params["bn2_scale"][None, :]).T.astype(_BF16)
    s2 = params["bn2_shift"].reshape(d, 1).astype(_F32)
    local = _local_representation(x_bands, masks, w1f, s1, w2f, s2,
                                  d, m, tr, w)           # (D, M) bf16

    # rearrange 'd (b h ph w pw)' -> '(b ph pw) (h w) d'   (XLA permute)
    g = local.reshape(d, b, h2, 2, w2, 2).transpose(1, 3, 5, 2, 4, 0)
    g = g.reshape(g_total, n, d)

    # --- transformer (bf16 weights, attn scale folded into wq) + fused f1 ---
    t = params["t"]
    attn_scale = float(d) ** -0.5
    tw = {
        "ln1_g": t["ln1_g"].astype(_F32), "ln1_b": t["ln1_b"].astype(_F32),
        "wq": (t["wq"] * attn_scale).astype(_BF16),
        "wk": t["wk"].astype(_BF16), "wv": t["wv"].astype(_BF16),
        "wo": t["wo"].astype(_BF16),
        "ln2_g": t["ln2_g"].astype(_F32), "ln2_b": t["ln2_b"].astype(_F32),
        "w1": t["w1"].astype(_BF16), "b1": t["b1"].astype(_F32),
        "w2": t["w2"].astype(_BF16), "b2": t["b2"].astype(_F32),
    }
    wf1 = params["f1_w"][0, 0].astype(_BF16)             # (D, Cin)
    bf1 = params["f1_b"].reshape(1, cin).astype(_F32)
    fuse_g = _transformer_fuse(g, tw, wf1, bf1)          # (G, N, Cin) bf16

    # inverse rearrange on the small Cin-channel fuse map
    fuse_cm = fuse_g.reshape(b, 2, 2, h2, w2, cin).transpose(5, 0, 3, 1, 4, 2)
    fuse_cm = fuse_cm.reshape(cin, b, h, w)
    f_bands = _bands_cm(fuse_cm, tr)

    # --- fusion_block2: split-weight 3x3 conv on (x, fuse) ---
    wx = _fold3x3(params["f2_w"][:, :, :cin, :])
    wf = _fold3x3(params["f2_w"][:, :, cin:, :])
    b2 = params["f2_b"].reshape(cout, 1).astype(_F32)
    out_cm = _fusion_conv(x_bands, f_bands, masks, wx, wf, b2,
                          cout, m, tr, w)                # (Cout, M) f32

    return out_cm.reshape(cout, b, h, w).transpose(1, 0, 2, 3)   # NCHW


# ---------------------------------------------------------------------------
# Deterministic parameter init (shapes follow the PyTorch module __init__)
# ---------------------------------------------------------------------------
def init_params(key, in_channels, out_channels, d_model, layers, mlp_dim):
    dim_head, num_heads = 32, 1          # Transformer(d_model, layers, 1, 32, mlp)
    wd = dim_head * num_heads
    keys = iter(jax.random.split(key, 64))

    def nrm(shape, s=0.1):
        return jax.random.normal(next(keys), shape, _F32) * s

    eps = 1e-5

    def bn_fold(c):
        gamma = 1.0 + nrm((c,), 0.05)
        beta = nrm((c,), 0.05)
        mean = nrm((c,), 0.05)
        var = jnp.abs(1.0 + nrm((c,), 0.05))
        scale = gamma / jnp.sqrt(var + eps)
        shift = beta - mean * scale
        return scale, shift

    p = {}
    p["conv1_w"] = nrm((3, 3, in_channels, in_channels))
    p["bn1_scale"], p["bn1_shift"] = bn_fold(in_channels)
    p["conv2_w"] = nrm((1, 1, in_channels, d_model))
    p["bn2_scale"], p["bn2_shift"] = bn_fold(d_model)

    nl = layers
    p["t"] = {
        "ln1_g": 1.0 + nrm((nl, 1, d_model), 0.05),
        "ln1_b": nrm((nl, 1, d_model), 0.05),
        "wq": nrm((nl, d_model, wd)),
        "wk": nrm((nl, d_model, wd)),
        "wv": nrm((nl, d_model, wd)),
        "wo": nrm((nl, wd, d_model)),
        "ln2_g": 1.0 + nrm((nl, 1, d_model), 0.05),
        "ln2_b": nrm((nl, 1, d_model), 0.05),
        "w1": nrm((nl, d_model, mlp_dim)),
        "b1": nrm((nl, 1, mlp_dim), 0.05),
        "w2": nrm((nl, mlp_dim, d_model)),
        "b2": nrm((nl, 1, d_model), 0.05),
    }
    p["f1_w"] = nrm((1, 1, d_model, in_channels))
    p["f1_b"] = nrm((in_channels,), 0.05)
    p["f2_w"] = nrm((3, 3, 2 * in_channels, out_channels))
    p["f2_b"] = nrm((out_channels,), 0.05)
    return p


# ---------------------------------------------------------------------------
# Pure-JAX f32 reference (mirrors the PyTorch module forward semantics)
# ---------------------------------------------------------------------------
def reference(x, params):
    b, cin, h, w = x.shape
    d = params["conv2_w"].shape[-1]

    def conv(inp, w_hwio, bias=None, scale=None, shift=None, act=False):
        y = jax.lax.conv_general_dilated(
            inp, w_hwio, window_strides=(1, 1), padding="SAME",
            dimension_numbers=("NCHW", "HWIO", "NCHW"))
        co = w_hwio.shape[-1]
        if bias is not None:
            y = y + bias.reshape(1, co, 1, 1)
        if scale is not None:
            y = y * scale.reshape(1, co, 1, 1) + shift.reshape(1, co, 1, 1)
        if act:
            y = y * jax.nn.sigmoid(y)
        return y

    local = conv(x, params["conv1_w"], scale=params["bn1_scale"],
                 shift=params["bn1_shift"], act=True)
    local = conv(local, params["conv2_w"], scale=params["bn2_scale"],
                 shift=params["bn2_shift"], act=True)

    h2, w2 = h // 2, w // 2
    g = local.reshape(b, d, h2, 2, w2, 2).transpose(0, 3, 5, 2, 4, 1)
    g = g.reshape(b * 4, h2 * w2, d)

    def ln(v, gm, bt):
        mu = v.mean(-1, keepdims=True)
        var = ((v - mu) ** 2).mean(-1, keepdims=True)
        return (v - mu) * jax.lax.rsqrt(var + 1e-5) * gm + bt

    t = params["t"]
    scale = float(d) ** -0.5
    for layer in range(t["wq"].shape[0]):
        xn = ln(g, t["ln1_g"][layer], t["ln1_b"][layer])
        q = xn @ t["wq"][layer]
        k = xn @ t["wk"][layer]
        v = xn @ t["wv"][layer]
        dots = jnp.einsum("gnk,gmk->gnm", q, k) * scale
        attn = jax.nn.softmax(dots, axis=-1)
        ctx = jnp.einsum("gnm,gmk->gnk", attn, v)
        g = g + ctx @ t["wo"][layer]
        xn2 = ln(g, t["ln2_g"][layer], t["ln2_b"][layer])
        hid = xn2 @ t["w1"][layer] + t["b1"][layer]
        hid = hid * jax.nn.sigmoid(hid)
        g = g + hid @ t["w2"][layer] + t["b2"][layer]

    g_img = g.reshape(b, 2, 2, h2, w2, d).transpose(0, 5, 3, 1, 4, 2)
    g_img = g_img.reshape(b, d, h, w)
    fuse = conv(g_img, params["f1_w"], bias=params["f1_b"])
    cat = jnp.concatenate([x, fuse], axis=1)
    return conv(cat, params["f2_w"], bias=params["f2_b"])


if __name__ == "__main__":
    key = jax.random.PRNGKey(0)
    in_channels, out_channels, d_model, n_layers, mlp_dim = 4, 8, 32, 2, 64
    B, H, W = 2, 16, 16

    pkey, xkey = jax.random.split(key)
    params = init_params(pkey, in_channels, out_channels, d_model, n_layers,
                         mlp_dim)
    x = jax.random.normal(xkey, (B, in_channels, H, W), _F32)

    fn = jax.jit(mobilevit_block)
    out = jax.block_until_ready(fn(x, params))
    assert out.shape == (B, out_channels, H, W), out.shape
    assert bool(jnp.all(jnp.isfinite(out)))

    ref = jax.block_until_ready(reference(x, params))
    max_err = float(jnp.max(jnp.abs(out - ref)))
    # bf16 MXU operands + approx softmax reciprocal vs a pure-f32 reference.
    assert bool(jnp.allclose(out, ref, rtol=5e-2, atol=5e-2)), max_err

    print("KERNEL_OK")
</pallas_src>

<mosaic_0001>
module attributes {stable_mosaic.version = 11 : i64} {
  func.func @_local_rep_kernel(%arg0: i32, %arg1: memref<1x4x162xbf16, #tpu.memory_space<vmem>>, %arg2: memref<2x128xbf16, #tpu.memory_space<vmem>>, %arg3: memref<9x4x4xbf16, #tpu.memory_space<vmem>>, %arg4: memref<4x1xf32, #tpu.memory_space<vmem>>, %arg5: memref<32x4xbf16, #tpu.memory_space<vmem>>, %arg6: memref<32x1xf32, #tpu.memory_space<vmem>>, %arg7: memref<32x128xbf16, #tpu.memory_space<vmem>>) attributes {dimension_semantics = [#tpu.dimension_semantics<parallel>], iteration_bounds = array<i64: 4>, scalar_prefetch = 0 : i64, scratch_operands = 0 : i64, tpu.core_type = #tpu.core_type<tc>, window_params = [{transform_indices = @transform_0, window_bounds = array<i64: 1, 4, 162>}, {pipeline_mode = #tpu.pipeline_mode<synchronous>, transform_indices = @transform_1, window_bounds = array<i64: 2, 128>}, {pipeline_mode = #tpu.pipeline_mode<synchronous>, transform_indices = @transform_2, window_bounds = array<i64: 9, 4, 4>}, {pipeline_mode = #tpu.pipeline_mode<synchronous>, transform_indices = @transform_3, window_bounds = array<i64: 4, 1>}, {pipeline_mode = #tpu.pipeline_mode<synchronous>, transform_indices = @transform_4, window_bounds = array<i64: 32, 4>}, {pipeline_mode = #tpu.pipeline_mode<synchronous>, transform_indices = @transform_5, window_bounds = array<i64: 32, 1>}, {transform_indices = @transform_6, window_bounds = array<i64: 32, 128>}]} {
    %c0 = arith.constant 0 : index
    %c0_0 = arith.constant 0 : index
    %c0_1 = arith.constant 0 : index
    %0 = vector.load %arg1[%c0, %c0_0, %c0_1] : memref<1x4x162xbf16, #tpu.memory_space<vmem>>, vector<1x4x162xbf16>
    %1 = vector.shape_cast %0 : vector<1x4x162xbf16> to vector<4x162xbf16>
    %c0_2 = arith.constant 0 : index
    %c0_3 = arith.constant 0 : index
    %2 = vector.load %arg2[%c0_2, %c0_3] : memref<2x128xbf16, #tpu.memory_space<vmem>>, vector<2x128xbf16>
    %3 = vector.extract_strided_slice %2 {offsets = [0, 0], sizes = [1, 128], strides = [1, 1]} : vector<2x128xbf16> to vector<1x128xbf16>
    %4 = vector.extract_strided_slice %2 {offsets = [1, 0], sizes = [1, 128], strides = [1, 1]} : vector<2x128xbf16> to vector<1x128xbf16>
    %cst = arith.constant 0.000000e+00 : f32
    %5 = vector.broadcast %cst : f32 to vector<4x128xf32>
    %6 = vector.extract_strided_slice %1 {offsets = [0, 0], sizes = [4, 128], strides = [1, 1]} : vector<4x162xbf16> to vector<4x128xbf16>
    %7 = vector.broadcast %4 : vector<1x128xbf16> to vector<4x128xbf16>
    %8 = arith.mulf %6, %7 : vector<4x128xbf16>
    %c0_4 = arith.constant 0 : index
    %c0_5 = arith.constant 0 : index
    %c0_6 = arith.constant 0 : index
    %9 = vector.load %arg3[%c0_4, %c0_5, %c0_6] : memref<9x4x4xbf16, #tpu.memory_space<vmem>>, vector<1x4x4xbf16>
    %10 = vector.shape_cast %9 : vector<1x4x4xbf16> to vector<4x4xbf16>
    %cst_7 = arith.constant dense<0.000000e+00> : vector<4x128xf32>
    %11 = tpu.matmul %10, %8, %cst_7 {dimension_numbers = #tpu.dot_dimension_numbers<[1], [0], [0], [1], [0, 0, 1, 1], [], []>} : vector<4x4xbf16>, vector<4x128xbf16>, vector<4x128xf32> -> vector<4x128xf32>
    %12 = arith.addf %5, %11 : vector<4x128xf32>
    %13 = vector.extract_strided_slice %1 {offsets = [0, 1], sizes = [4, 128], strides = [1, 1]} : vector<4x162xbf16> to vector<4x128xbf16>
    %c1 = arith.constant 1 : index
    %c0_8 = arith.constant 0 : index
    %c0_9 = arith.constant 0 : index
    %14 = vector.load %arg3[%c1, %c0_8, %c0_9] : memref<9x4x4xbf16, #tpu.memory_space<vmem>>, vector<1x4x4xbf16>
    %15 = vector.shape_cast %14 : vector<1x4x4xbf16> to vector<4x4xbf16>
    %cst_10 = arith.constant dense<0.000000e+00> : vector<4x128xf32>
    %16 = tpu.matmul %15, %13, %cst_10 {dimension_numbers = #tpu.dot_dimension_numbers<[1], [0], [0], [1], [0, 0, 1, 1], [], []>} : vector<4x4xbf16>, vector<4x128xbf16>, vector<4x128xf32> -> vector<4x128xf32>
    %17 = arith.addf %12, %16 : vector<4x128xf32>
    %18 = vector.extract_strided_slice %1 {offsets = [0, 2], sizes = [4, 128], strides = [1, 1]} : vector<4x162xbf16> to vector<4x128xbf16>
    %19 = vector.broadcast %3 : vector<1x128xbf16> to vector<4x128xbf16>
    %20 = arith.mulf %18, %19 : vector<4x128xbf16>
    %c2 = arith.constant 2 : index
    %c0_11 = arith.constant 0 : index
    %c0_12 = arith.constant 0 : index
    %21 = vector.load %arg3[%c2, %c0_11, %c0_12] : memref<9x4x4xbf16, #tpu.memory_space<vmem>>, vector<1x4x4xbf16>
    %22 = vector.shape_cast %21 : vector<1x4x4xbf16> to vector<4x4xbf16>
    %cst_13 = arith.constant dense<0.000000e+00> : vector<4x128xf32>
    %23 = tpu.matmul %22, %20, %cst_13 {dimension_numbers = #tpu.dot_dimension_numbers<[1], [0], [0], [1], [0, 0, 1, 1], [], []>} : vector<4x4xbf16>, vector<4x128xbf16>, vector<4x128xf32> -> vector<4x128xf32>
    %24 = arith.addf %17, %23 : vector<4x128xf32>
    %25 = vector.extract_strided_slice %1 {offsets = [0, 16], sizes = [4, 128], strides = [1, 1]} : vector<4x162xbf16> to vector<4x128xbf16>
    %26 = vector.broadcast %4 : vector<1x128xbf16> to vector<4x128xbf16>
    %27 = arith.mulf %25, %26 : vector<4x128xbf16>
    %c3 = arith.constant 3 : index
    %c0_14 = arith.constant 0 : index
    %c0_15 = arith.constant 0 : index
    %28 = vector.load %arg3[%c3, %c0_14, %c0_15] : memref<9x4x4xbf16, #tpu.memory_space<vmem>>, vector<1x4x4xbf16>
    %29 = vector.shape_cast %28 : vector<1x4x4xbf16> to vector<4x4xbf16>
    %cst_16 = arith.constant dense<0.000000e+00> : vector<4x128xf32>
    %30 = tpu.matmul %29, %27, %cst_16 {dimension_numbers = #tpu.dot_dimension_numbers<[1], [0], [0], [1], [0, 0, 1, 1], [], []>} : vector<4x4xbf16>, vector<4x128xbf16>, vector<4x128xf32> -> vector<4x128xf32>
    %31 = arith.addf %24, %30 : vector<4x128xf32>
    %32 = vector.extract_strided_slice %1 {offsets = [0, 17], sizes = [4, 128], strides = [1, 1]} : vector<4x162xbf16> to vector<4x128xbf16>
    %c4 = arith.constant 4 : index
    %c0_17 = arith.constant 0 : index
    %c0_18 = arith.constant 0 : index
    %33 = vector.load %arg3[%c4, %c0_17, %c0_18] : memref<9x4x4xbf16, #tpu.memory_space<vmem>>, vector<1x4x4xbf16>
    %34 = vector.shape_cast %33 : vector<1x4x4xbf16> to vector<4x4xbf16>
    %cst_19 = arith.constant dense<0.000000e+00> : vector<4x128xf32>
    %35 = tpu.matmul %34, %32, %cst_19 {dimension_numbers = #tpu.dot_dimension_numbers<[1], [0], [0], [1], [0, 0, 1, 1], [], []>} : vector<4x4xbf16>, vector<4x128xbf16>, vector<4x128xf32> -> vector<4x128xf32>
    %36 = arith.addf %31, %35 : vector<4x128xf32>
    %37 = vector.extract_strided_slice %1 {offsets = [0, 18], sizes = [4, 128], strides = [1, 1]} : vector<4x162xbf16> to vector<4x128xbf16>
    %38 = vector.broadcast %3 : vector<1x128xbf16> to vector<4x128xbf16>
    %39 = arith.mulf %37, %38 : vector<4x128xbf16>
    %c5 = arith.constant 5 : index
    %c0_20 = arith.constant 0 : index
    %c0_21 = arith.constant 0 : index
    %40 = vector.load %arg3[%c5, %c0_20, %c0_21] : memref<9x4x4xbf16, #tpu.memory_space<vmem>>, vector<1x4x4xbf16>
    %41 = vector.shape_cast %40 : vector<1x4x4xbf16> to vector<4x4xbf16>
    %cst_22 = arith.constant dense<0.000000e+00> : vector<4x128xf32>
    %42 = tpu.matmul %41, %39, %cst_22 {dimension_numbers = #tpu.dot_dimension_numbers<[1], [0], [0], [1], [0, 0, 1, 1], [], []>} : vector<4x4xbf16>, vector<4x128xbf16>, vector<4x128xf32> -> vector<4x128xf32>
    %43 = arith.addf %36, %42 : vector<4x128xf32>
    %44 = vector.extract_strided_slice %1 {offsets = [0, 32], sizes = [4, 128], strides = [1, 1]} : vector<4x162xbf16> to vector<4x128xbf16>
    %45 = vector.broadcast %4 : vector<1x128xbf16> to vector<4x128xbf16>
    %46 = arith.mulf %44, %45 : vector<4x128xbf16>
    %c6 = arith.constant 6 : index
    %c0_23 = arith.constant 0 : index
    %c0_24 = arith.constant 0 : index
    %47 = vector.load %arg3[%c6, %c0_23, %c0_24] : memref<9x4x4xbf16, #tpu.memory_space<vmem>>, vector<1x4x4xbf16>
    %48 = vector.shape_cast %47 : vector<1x4x4xbf16> to vector<4x4xbf16>
    %cst_25 = arith.constant dense<0.000000e+00> : vector<4x128xf32>
    %49 = tpu.matmul %48, %46, %cst_25 {dimension_numbers = #tpu.dot_dimension_numbers<[1], [0], [0], [1], [0, 0, 1, 1], [], []>} : vector<4x4xbf16>, vector<4x128xbf16>, vector<4x128xf32> -> vector<4x128xf32>
    %50 = arith.addf %43, %49 : vector<4x128xf32>
    %51 = vector.extract_strided_slice %1 {offsets = [0, 33], sizes = [4, 128], strides = [1, 1]} : vector<4x162xbf16> to vector<4x128xbf16>
    %c7 = arith.constant 7 : index
    %c0_26 = arith.constant 0 : index
    %c0_27 = arith.constant 0 : index
    %52 = vector.load %arg3[%c7, %c0_26, %c0_27] : memref<9x4x4xbf16, #tpu.memory_space<vmem>>, vector<1x4x4xbf16>
    %53 = vector.shape_cast %52 : vector<1x4x4xbf16> to vector<4x4xbf16>
    %cst_28 = arith.constant dense<0.000000e+00> : vector<4x128xf32>
    %54 = tpu.matmul %53, %51, %cst_28 {dimension_numbers = #tpu.dot_dimension_numbers<[1], [0], [0], [1], [0, 0, 1, 1], [], []>} : vector<4x4xbf16>, vector<4x128xbf16>, vector<4x128xf32> -> vector<4x128xf32>
    %55 = arith.addf %50, %54 : vector<4x128xf32>
    %56 = vector.extract_strided_slice %1 {offsets = [0, 34], sizes = [4, 128], strides = [1, 1]} : vector<4x162xbf16> to vector<4x128xbf16>
    %57 = vector.broadcast %3 : vector<1x128xbf16> to vector<4x128xbf16>
    %58 = arith.mulf %56, %57 : vector<4x128xbf16>
    %c8 = arith.constant 8 : index
    %c0_29 = arith.constant 0 : index
    %c0_30 = arith.constant 0 : index
    %59 = vector.load %arg3[%c8, %c0_29, %c0_30] : memref<9x4x4xbf16, #tpu.memory_space<vmem>>, vector<1x4x4xbf16>
    %60 = vector.shape_cast %59 : vector<1x4x4xbf16> to vector<4x4xbf16>
    %cst_31 = arith.constant dense<0.000000e+00> : vector<4x128xf32>
    %61 = tpu.matmul %60, %58, %cst_31 {dimension_numbers = #tpu.dot_dimension_numbers<[1], [0], [0], [1], [0, 0, 1, 1], [], []>} : vector<4x4xbf16>, vector<4x128xbf16>, vector<4x128xf32> -> vector<4x128xf32>
    %62 = arith.addf %55, %61 : vector<4x128xf32>
    %c0_32 = arith.constant 0 : index
    %c0_33 = arith.constant 0 : index
    %63 = vector.load %arg4[%c0_32, %c0_33] : memref<4x1xf32, #tpu.memory_space<vmem>>, vector<4x1xf32>
    %64 = vector.broadcast %63 : vector<4x1xf32> to vector<4x128xf32>
    %65 = arith.addf %62, %64 : vector<4x128xf32>
    %66 = arith.negf %65 : vector<4x128xf32>
    %67 = math.exp %66 : vector<4x128xf32>
    %cst_34 = arith.constant 1.000000e+00 : f32
    %68 = vector.broadcast %cst_34 : f32 to vector<4x128xf32>
    %69 = arith.addf %68, %67 : vector<4x128xf32>
    %70 = arith.divf %68, %69 : vector<4x128xf32>
    %71 = arith.mulf %65, %70 : vector<4x128xf32>
    %72 = arith.truncf %71 : vector<4x128xf32> to vector<4x128xbf16>
    %c0_35 = arith.constant 0 : index
    %c0_36 = arith.constant 0 : index
    %73 = vector.load %arg5[%c0_35, %c0_36] : memref<32x4xbf16, #tpu.memory_space<vmem>>, vector<32x4xbf16>
    %cst_37 = arith.constant dense<0.000000e+00> : vector<32x128xf32>
    %74 = tpu.matmul %73, %72, %cst_37 {dimension_numbers = #tpu.dot_dimension_numbers<[1], [0], [0], [1], [0, 0, 1, 1], [], []>} : vector<32x4xbf16>, vector<4x128xbf16>, vector<32x128xf32> -> vector<32x128xf32>
    %c0_38 = arith.constant 0 : index
    %c0_39 = arith.constant 0 : index
    %75 = vector.load %arg6[%c0_38, %c0_39] : memref<32x1xf32, #tpu.memory_space<vmem>>, vector<32x1xf32>
    %76 = vector.broadcast %75 : vector<32x1xf32> to vector<32x128xf32>
    %77 = arith.addf %74, %76 : vector<32x128xf32>
    %78 = arith.negf %77 : vector<32x128xf32>
    %79 = math.exp %78 : vector<32x128xf32>
    %cst_40 = arith.constant 1.000000e+00 : f32
    %80 = vector.broadcast %cst_40 : f32 to vector<32x128xf32>
    %81 = arith.addf %80, %79 : vector<32x128xf32>
    %82 = arith.divf %80, %81 : vector<32x128xf32>
    %83 = arith.mulf %77, %82 : vector<32x128xf32>
    %84 = arith.truncf %83 : vector<32x128xf32> to vector<32x128xbf16>
    %c0_41 = arith.constant 0 : index
    %c0_42 = arith.constant 0 : index
    %85 = vector.load %arg7[%c0_41, %c0_42] : memref<32x128xbf16, #tpu.memory_space<vmem>>, vector<32x128xbf16>
    tpu.vector_store %arg7[%c0_41, %c0_42], %84 {strides = array<i32>} : memref<32x128xbf16, #tpu.memory_space<vmem>>, vector<32x128xbf16>,
    return
  }
  func.func @transform_0(%arg0: i32) -> (i32, i32, i32) {
    %c0_i32 = arith.constant 0 : i32
    %c0_i32_0 = arith.constant 0 : i32
    %c0_i32_1 = arith.constant 0 : i32
    return %arg0, %c0_i32, %c0_i32_0 : i32, i32, i32
  }
  func.func @transform_1(%arg0: i32) -> (i32, i32) {
    %c0_i32 = arith.constant 0 : i32
    %c0_i32_0 = arith.constant 0 : i32
    %c0_i32_1 = arith.constant 0 : i32
    return %c0_i32, %c0_i32_0 : i32, i32
  }
  func.func @transform_2(%arg0: i32) -> (i32, i32, i32) {
    %c0_i32 = arith.constant 0 : i32
    %c0_i32_0 = arith.constant 0 : i32
    %c0_i32_1 = arith.constant 0 : i32
    %c0_i32_2 = arith.constant 0 : i32
    return %c0_i32, %c0_i32_0, %c0_i32_1 : i32, i32, i32
  }
  func.func @transform_3(%arg0: i32) -> (i32, i32) {
    %c0_i32 = arith.constant 0 : i32
    %c0_i32_0 = arith.constant 0 : i32
    %c0_i32_1 = arith.constant 0 : i32
    return %c0_i32, %c0_i32_0 : i32, i32
  }
  func.func @transform_4(%arg0: i32) -> (i32, i32) {
    %c0_i32 = arith.constant 0 : i32
    %c0_i32_0 = arith.constant 0 : i32
    %c0_i32_1 = arith.constant 0 : i32
    return %c0_i32, %c0_i32_0 : i32, i32
  }
  func.func @transform_5(%arg0: i32) -> (i32, i32) {
    %c0_i32 = arith.constant 0 : i32
    %c0_i32_0 = arith.constant 0 : i32
    %c0_i32_1 = arith.constant 0 : i32
    return %c0_i32, %c0_i32_0 : i32, i32
  }
  func.func @transform_6(%arg0: i32) -> (i32, i32) {
    %c0_i32 = arith.constant 0 : i32
    %c0_i32_0 = arith.constant 0 : i32
    return %c0_i32, %arg0 : i32, i32
  }
}

module attributes {stable_mosaic.version = 11 : i64} {
  func.func @_transformer_kernel(%arg0: i32, %arg1: memref<2x64x32xbf16, #tpu.memory_space<vmem>>, %arg2: memref<2x1x32xf32, #tpu.memory_space<vmem>>, %arg3: memref<2x1x32xf32, #tpu.memory_space<vmem>>, %arg4: memref<2x32x32xbf16, #tpu.memory_space<vmem>>, %arg5: memref<2x32x32xbf16, #tpu.memory_space<vmem>>, %arg6: memref<2x32x32xbf16, #tpu.memory_space<vmem>>, %arg7: memref<2x32x32xbf16, #tpu.memory_space<vmem>>, %arg8: memref<2x1x32xf32, #tpu.memory_space<vmem>>, %arg9: memref<2x1x32xf32, #tpu.memory_space<vmem>>, %arg10: memref<2x32x64xbf16, #tpu.memory_space<vmem>>, %arg11: memref<2x1x64xf32, #tpu.memory_space<vmem>>, %arg12: memref<2x64x32xbf16, #tpu.memory_space<vmem>>, %arg13: memref<2x1x32xf32, #tpu.memory_space<vmem>>, %arg14: memref<32x4xbf16, #tpu.memory_space<vmem>>, %arg15: memref<1x4xf32, #tpu.memory_space<vmem>>, %arg16: memref<2x64x4xbf16, #tpu.memory_space<vmem>>) attributes {dimension_semantics = [#tpu.dimension_semantics<parallel>], iteration_bounds = array<i64: 4>, scalar_prefetch = 0 : i64, scratch_operands = 0 : i64, tpu.core_type = #tpu.core_type<tc>, window_params = [{transform_indices = @transform_0, window_bounds = array<i64: 2, 64, 32>}, {pipeline_mode = #tpu.pipeline_mode<synchronous>, transform_indices = @transform_1, window_bounds = array<i64: 2, 1, 32>}, {pipeline_mode = #tpu.pipeline_mode<synchronous>, transform_indices = @transform_2, window_bounds = array<i64: 2, 1, 32>}, {pipeline_mode = #tpu.pipeline_mode<synchronous>, transform_indices = @transform_3, window_bounds = array<i64: 2, 32, 32>}, {pipeline_mode = #tpu.pipeline_mode<synchronous>, transform_indices = @transform_4, window_bounds = array<i64: 2, 32, 32>}, {pipeline_mode = #tpu.pipeline_mode<synchronous>, transform_indices = @transform_5, window_bounds = array<i64: 2, 32, 32>}, {pipeline_mode = #tpu.pipeline_mode<synchronous>, transform_indices = @transform_6, window_bounds = array<i64: 2, 32, 32>}, {pipeline_mode = #tpu.pipeline_mode<synchronous>, transform_indices = @transform_7, window_bounds = array<i64: 2, 1, 32>}, {pipeline_mode = #tpu.pipeline_mode<synchronous>, transform_indices = @transform_8, window_bounds = array<i64: 2, 1, 32>}, {pipeline_mode = #tpu.pipeline_mode<synchronous>, transform_indices = @transform_9, window_bounds = array<i64: 2, 32, 64>}, {pipeline_mode = #tpu.pipeline_mode<synchronous>, transform_indices = @transform_10, window_bounds = array<i64: 2, 1, 64>}, {pipeline_mode = #tpu.pipeline_mode<synchronous>, transform_indices = @transform_11, window_bounds = array<i64: 2, 64, 32>}, {pipeline_mode = #tpu.pipeline_mode<synchronous>, transform_indices = @transform_12, window_bounds = array<i64: 2, 1, 32>}, {pipeline_mode = #tpu.pipeline_mode<synchronous>, transform_indices = @transform_13, window_bounds = array<i64: 32, 4>}, {pipeline_mode = #tpu.pipeline_mode<synchronous>, transform_indices = @transform_14, window_bounds = array<i64: 1, 4>}, {transform_indices = @transform_15, window_bounds = array<i64: 2, 64, 4>}]} {
    %c0 = arith.constant 0 : index
    %c0_0 = arith.constant 0 : index
    %c0_1 = arith.constant 0 : index
    %0 = vector.load %arg1[%c0, %c0_0, %c0_1] : memref<2x64x32xbf16, #tpu.memory_space<vmem>>, vector<2x64x32xbf16>
    %1 = arith.extf %0 : vector<2x64x32xbf16> to vector<2x64x32xf32>
    %2 = vector.shape_cast %1 : vector<2x64x32xf32> to vector<128x32xf32>
    %c0_i32 = arith.constant 0 : i32
    %c2_i32 = arith.constant 2 : i32
    %3 = arith.addi %c0_i32, %c2_i32 : i32
    %c1_i32 = arith.constant 1 : i32
    %4 = scf.for %arg17 = %c0_i32 to %3 step %c1_i32 iter_args(%arg18 = %2) -> (vector<128x32xf32>)  : i32 {
      %14 = arith.index_cast %arg17 : i32 to index
      %c0_10 = arith.constant 0 : index
      %c0_11 = arith.constant 0 : index
      %15 = vector.load %arg2[%14, %c0_10, %c0_11] : memref<2x1x32xf32, #tpu.memory_space<vmem>>, vector<1x1x32xf32>
      %16 = vector.shape_cast %15 : vector<1x1x32xf32> to vector<1x32xf32>
      %17 = arith.index_cast %arg17 : i32 to index
      %c0_12 = arith.constant 0 : index
      %c0_13 = arith.constant 0 : index
      %18 = vector.load %arg3[%17, %c0_12, %c0_13] : memref<2x1x32xf32, #tpu.memory_space<vmem>>, vector<1x1x32xf32>
      %19 = vector.shape_cast %18 : vector<1x1x32xf32> to vector<1x32xf32>
      %cst_14 = arith.constant dense<0.000000e+00> : vector<128xf32>
      %20 = vector.multi_reduction <add>, %arg18, %cst_14 [1] : vector<128x32xf32> to vector<128xf32>
      %21 = vector.shape_cast %20 : vector<128xf32> to vector<128x1xf32>
      %cst_15 = arith.constant 3.200000e+01 : f32
      %22 = vector.broadcast %cst_15 : f32 to vector<128x1xf32>
      %23 = arith.divf %21, %22 : vector<128x1xf32>
      %24 = vector.broadcast %23 : vector<128x1xf32> to vector<128x32xf32>
      %25 = arith.subf %arg18, %24 : vector<128x32xf32>
      %26 = arith.mulf %25, %25 : vector<128x32xf32>
      %cst_16 = arith.constant dense<0.000000e+00> : vector<128xf32>
      %27 = vector.multi_reduction <add>, %26, %cst_16 [1] : vector<128x32xf32> to vector<128xf32>
      %28 = vector.shape_cast %27 : vector<128xf32> to vector<128x1xf32>
      %cst_17 = arith.constant 3.200000e+01 : f32
      %29 = vector.broadcast %cst_17 : f32 to vector<128x1xf32>
      %30 = arith.divf %28, %29 : vector<128x1xf32>
      %31 = vector.broadcast %23 : vector<128x1xf32> to vector<128x32xf32>
      %32 = arith.subf %arg18, %31 : vector<128x32xf32>
      %cst_18 = arith.constant 9.99999974E-6 : f32
      %33 = vector.broadcast %cst_18 : f32 to vector<128x1xf32>
      %34 = arith.addf %30, %33 : vector<128x1xf32>
      %35 = math.rsqrt %34 : vector<128x1xf32>
      %36 = vector.broadcast %35 : vector<128x1xf32> to vector<128x32xf32>
      %37 = arith.mulf %32, %36 : vector<128x32xf32>
      %38 = vector.broadcast %16 : vector<1x32xf32> to vector<128x32xf32>
      %39 = arith.mulf %37, %38 : vector<128x32xf32>
      %40 = vector.broadcast %19 : vector<1x32xf32> to vector<128x32xf32>
      %41 = arith.addf %39, %40 : vector<128x32xf32>
      %42 = arith.truncf %41 : vector<128x32xf32> to vector<128x32xbf16>
      %43 = arith.index_cast %arg17 : i32 to index
      %c0_19 = arith.constant 0 : index
      %c0_20 = arith.constant 0 : index
      %44 = vector.load %arg4[%43, %c0_19, %c0_20] : memref<2x32x32xbf16, #tpu.memory_space<vmem>>, vector<1x32x32xbf16>
      %45 = vector.shape_cast %44 : vector<1x32x32xbf16> to vector<32x32xbf16>
      %cst_21 = arith.constant dense<0.000000e+00> : vector<128x32xf32>
      %46 = tpu.matmul %42, %45, %cst_21 {dimension_numbers = #tpu.dot_dimension_numbers<[1], [0], [0], [1], [0, 0, 1, 1], [], []>} : vector<128x32xbf16>, vector<32x32xbf16>, vector<128x32xf32> -> vector<128x32xf32>
      %47 = arith.index_cast %arg17 : i32 to index
      %c0_22 = arith.constant 0 : index
      %c0_23 = arith.constant 0 : index
      %48 = vector.load %arg5[%47, %c0_22, %c0_23] : memref<2x32x32xbf16, #tpu.memory_space<vmem>>, vector<1x32x32xbf16>
      %49 = vector.shape_cast %48 : vector<1x32x32xbf16> to vector<32x32xbf16>
      %cst_24 = arith.constant dense<0.000000e+00> : vector<128x32xf32>
      %50 = tpu.matmul %42, %49, %cst_24 {dimension_numbers = #tpu.dot_dimension_numbers<[1], [0], [0], [1], [0, 0, 1, 1], [], []>} : vector<128x32xbf16>, vector<32x32xbf16>, vector<128x32xf32> -> vector<128x32xf32>
      %51 = arith.index_cast %arg17 : i32 to index
      %c0_25 = arith.constant 0 : index
      %c0_26 = arith.constant 0 : index
      %52 = vector.load %arg6[%51, %c0_25, %c0_26] : memref<2x32x32xbf16, #tpu.memory_space<vmem>>, vector<1x32x32xbf16>
      %53 = vector.shape_cast %52 : vector<1x32x32xbf16> to vector<32x32xbf16>
      %cst_27 = arith.constant dense<0.000000e+00> : vector<128x32xf32>
      %54 = tpu.matmul %42, %53, %cst_27 {dimension_numbers = #tpu.dot_dimension_numbers<[1], [0], [0], [1], [0, 0, 1, 1], [], []>} : vector<128x32xbf16>, vector<32x32xbf16>, vector<128x32xf32> -> vector<128x32xf32>
      %55 = vector.shape_cast %46 : vector<128x32xf32> to vector<2x64x32xf32>
      %56 = arith.truncf %55 : vector<2x64x32xf32> to vector<2x64x32xbf16>
      %57 = vector.shape_cast %50 : vector<128x32xf32> to vector<2x64x32xf32>
      %58 = arith.truncf %57 : vector<2x64x32xf32> to vector<2x64x32xbf16>
      %59 = vector.shape_cast %54 : vector<128x32xf32> to vector<2x64x32xf32>
      %60 = arith.truncf %59 : vector<2x64x32xf32> to vector<2x64x32xbf16>
      "tpu.trace_start"() <{level = 10 : i32, message = "gnk,gmk->gnm"}> : () -> ()
      %cst_28 = arith.constant dense<0.000000e+00> : vector<2x64x64xf32>
      %61 = tpu.matmul %56, %58, %cst_28 {dimension_numbers = #tpu.dot_dimension_numbers<[2], [2], [1], [1], [0, 0, 0, 1, 1, 1], [0], [0]>} : vector<2x64x32xbf16>, vector<2x64x32xbf16>, vector<2x64x64xf32> -> vector<2x64x64xf32>
      "tpu.trace_stop"() : () -> ()
      %cst_29 = arith.constant dense<0xFF800000> : vector<2x64xf32>
      %62 = vector.multi_reduction <maximumf>, %61, %cst_29 [2] : vector<2x64x64xf32> to vector<2x64xf32>
      %63 = vector.shape_cast %62 : vector<2x64xf32> to vector<2x64x1xf32>
      %64 = vector.broadcast %63 : vector<2x64x1xf32> to vector<2x64x64xf32>
      %65 = arith.subf %61, %64 : vector<2x64x64xf32>
      %66 = math.exp %65 : vector<2x64x64xf32>
      %cst_30 = arith.constant dense<0.000000e+00> : vector<2x64xf32>
      %67 = vector.multi_reduction <add>, %66, %cst_30 [2] : vector<2x64x64xf32> to vector<2x64xf32>
      %68 = vector.shape_cast %67 : vector<2x64xf32> to vector<2x64x1xf32>
      %69 = tpu.reciprocal %68 {approx = true} : vector<2x64x1xf32> -> vector<2x64x1xf32>
      %70 = vector.broadcast %69 : vector<2x64x1xf32> to vector<2x64x64xf32>
      %71 = arith.mulf %66, %70 : vector<2x64x64xf32>
      %72 = arith.truncf %71 : vector<2x64x64xf32> to vector<2x64x64xbf16>
      "tpu.trace_start"() <{level = 10 : i32, message = "gnm,gmk->gnk"}> : () -> ()
      %cst_31 = arith.constant dense<0.000000e+00> : vector<2x64x32xf32>
      %73 = tpu.matmul %72, %60, %cst_31 {dimension_numbers = #tpu.dot_dimension_numbers<[2], [1], [1], [2], [0, 0, 0, 1, 1, 2], [0], [0]>} : vector<2x64x64xbf16>, vector<2x64x32xbf16>, vector<2x64x32xf32> -> vector<2x64x32xf32>
      "tpu.trace_stop"() : () -> ()
      %74 = vector.shape_cast %73 : vector<2x64x32xf32> to vector<128x32xf32>
      %75 = arith.truncf %74 : vector<128x32xf32> to vector<128x32xbf16>
      %76 = arith.index_cast %arg17 : i32 to index
      %c0_32 = arith.constant 0 : index
      %c0_33 = arith.constant 0 : index
      %77 = vector.load %arg7[%76, %c0_32, %c0_33] : memref<2x32x32xbf16, #tpu.memory_space<vmem>>, vector<1x32x32xbf16>
      %78 = vector.shape_cast %77 : vector<1x32x32xbf16> to vector<32x32xbf16>
      %cst_34 = arith.constant dense<0.000000e+00> : vector<128x32xf32>
      %79 = tpu.matmul %75, %78, %cst_34 {dimension_numbers = #tpu.dot_dimension_numbers<[1], [0], [0], [1], [0, 0, 1, 1], [], []>} : vector<128x32xbf16>, vector<32x32xbf16>, vector<128x32xf32> -> vector<128x32xf32>
      %80 = arith.addf %arg18, %79 : vector<128x32xf32>
      %81 = arith.index_cast %arg17 : i32 to index
      %c0_35 = arith.constant 0 : index
      %c0_36 = arith.constant 0 : index
      %82 = vector.load %arg8[%81, %c0_35, %c0_36] : memref<2x1x32xf32, #tpu.memory_space<vmem>>, vector<1x1x32xf32>
      %83 = vector.shape_cast %82 : vector<1x1x32xf32> to vector<1x32xf32>
      %84 = arith.index_cast %arg17 : i32 to index
      %c0_37 = arith.constant 0 : index
      %c0_38 = arith.constant 0 : index
      %85 = vector.load %arg9[%84, %c0_37, %c0_38] : memref<2x1x32xf32, #tpu.memory_space<vmem>>, vector<1x1x32xf32>
      %86 = vector.shape_cast %85 : vector<1x1x32xf32> to vector<1x32xf32>
      %cst_39 = arith.constant dense<0.000000e+00> : vector<128xf32>
      %87 = vector.multi_reduction <add>, %80, %cst_39 [1] : vector<128x32xf32> to vector<128xf32>
      %88 = vector.shape_cast %87 : vector<128xf32> to vector<128x1xf32>
      %cst_40 = arith.constant 3.200000e+01 : f32
      %89 = vector.broadcast %cst_40 : f32 to vector<128x1xf32>
      %90 = arith.divf %88, %89 : vector<128x1xf32>
      %91 = vector.broadcast %90 : vector<128x1xf32> to vector<128x32xf32>
      %92 = arith.subf %80, %91 : vector<128x32xf32>
      %93 = arith.mulf %92, %92 : vector<128x32xf32>
      %cst_41 = arith.constant dense<0.000000e+00> : vector<128xf32>
      %94 = vector.multi_reduction <add>, %93, %cst_41 [1] : vector<128x32xf32> to vector<128xf32>
      %95 = vector.shape_cast %94 : vector<128xf32> to vector<128x1xf32>
      %cst_42 = arith.constant 3.200000e+01 : f32
      %96 = vector.broadcast %cst_42 : f32 to vector<128x1xf32>
      %97 = arith.divf %95, %96 : vector<128x1xf32>
      %98 = vector.broadcast %90 : vector<128x1xf32> to vector<128x32xf32>
      %99 = arith.subf %80, %98 : vector<128x32xf32>
      %cst_43 = arith.constant 9.99999974E-6 : f32
      %100 = vector.broadcast %cst_43 : f32 to vector<128x1xf32>
      %101 = arith.addf %97, %100 : vector<128x1xf32>
      %102 = math.rsqrt %101 : vector<128x1xf32>
      %103 = vector.broadcast %102 : vector<128x1xf32> to vector<128x32xf32>
      %104 = arith.mulf %99, %103 : vector<128x32xf32>
      %105 = vector.broadcast %83 : vector<1x32xf32> to vector<128x32xf32>
      %106 = arith.mulf %104, %105 : vector<128x32xf32>
      %107 = vector.broadcast %86 : vector<1x32xf32> to vector<128x32xf32>
      %108 = arith.addf %106, %107 : vector<128x32xf32>
      %109 = arith.truncf %108 : vector<128x32xf32> to vector<128x32xbf16>
      %110 = arith.index_cast %arg17 : i32 to index
      %c0_44 = arith.constant 0 : index
      %c0_45 = arith.constant 0 : index
      %111 = vector.load %arg10[%110, %c0_44, %c0_45] : memref<2x32x64xbf16, #tpu.memory_space<vmem>>, vector<1x32x64xbf16>
      %112 = vector.shape_cast %111 : vector<1x32x64xbf16> to vector<32x64xbf16>
      %cst_46 = arith.constant dense<0.000000e+00> : vector<128x64xf32>
      %113 = tpu.matmul %109, %112, %cst_46 {dimension_numbers = #tpu.dot_dimension_numbers<[1], [0], [0], [1], [0, 0, 1, 1], [], []>} : vector<128x32xbf16>, vector<32x64xbf16>, vector<128x64xf32> -> vector<128x64xf32>
      %114 = arith.index_cast %arg17 : i32 to index
      %c0_47 = arith.constant 0 : index
      %c0_48 = arith.constant 0 : index
      %115 = vector.load %arg11[%114, %c0_47, %c0_48] : memref<2x1x64xf32, #tpu.memory_space<vmem>>, vector<1x1x64xf32>
      %116 = vector.shape_cast %115 : vector<1x1x64xf32> to vector<1x64xf32>
      %117 = vector.broadcast %116 : vector<1x64xf32> to vector<128x64xf32>
      %118 = arith.addf %113, %117 : vector<128x64xf32>
      %119 = arith.negf %118 : vector<128x64xf32>
      %120 = math.exp %119 : vector<128x64xf32>
      %cst_49 = arith.constant 1.000000e+00 : f32
      %121 = vector.broadcast %cst_49 : f32 to vector<128x64xf32>
      %122 = arith.addf %121, %120 : vector<128x64xf32>
      %123 = arith.divf %121, %122 : vector<128x64xf32>
      %124 = arith.mulf %118, %123 : vector<128x64xf32>
      %125 = arith.truncf %124 : vector<128x64xf32> to vector<128x64xbf16>
      %126 = arith.index_cast %arg17 : i32 to index
      %c0_50 = arith.constant 0 : index
      %c0_51 = arith.constant 0 : index
      %127 = vector.load %arg12[%126, %c0_50, %c0_51] : memref<2x64x32xbf16, #tpu.memory_space<vmem>>, vector<1x64x32xbf16>
      %128 = vector.shape_cast %127 : vector<1x64x32xbf16> to vector<64x32xbf16>
      %cst_52 = arith.constant dense<0.000000e+00> : vector<128x32xf32>
      %129 = tpu.matmul %125, %128, %cst_52 {dimension_numbers = #tpu.dot_dimension_numbers<[1], [0], [0], [1], [0, 0, 1, 1], [], []>} : vector<128x64xbf16>, vector<64x32xbf16>, vector<128x32xf32> -> vector<128x32xf32>
      %130 = arith.addf %80, %129 : vector<128x32xf32>
      %131 = arith.index_cast %arg17 : i32 to index
      %c0_53 = arith.constant 0 : index
      %c0_54 = arith.constant 0 : index
      %132 = vector.load %arg13[%131, %c0_53, %c0_54] : memref<2x1x32xf32, #tpu.memory_space<vmem>>, vector<1x1x32xf32>
      %133 = vector.shape_cast %132 : vector<1x1x32xf32> to vector<1x32xf32>
      %134 = vector.broadcast %133 : vector<1x32xf32> to vector<128x32xf32>
      %135 = arith.addf %130, %134 : vector<128x32xf32>
      scf.yield %135 : vector<128x32xf32>
    }
    %c2_i32_2 = arith.constant 2 : i32
    %5 = arith.truncf %4 : vector<128x32xf32> to vector<128x32xbf16>
    %c0_3 = arith.constant 0 : index
    %c0_4 = arith.constant 0 : index
    %6 = vector.load %arg14[%c0_3, %c0_4] : memref<32x4xbf16, #tpu.memory_space<vmem>>, vector<32x4xbf16>
    %cst = arith.constant dense<0.000000e+00> : vector<128x4xf32>
    %7 = tpu.matmul %5, %6, %cst {dimension_numbers = #tpu.dot_dimension_numbers<[1], [0], [0], [1], [0, 0, 1, 1], [], []>} : vector<128x32xbf16>, vector<32x4xbf16>, vector<128x4xf32> -> vector<128x4xf32>
    %c0_5 = arith.constant 0 : index
    %c0_6 = arith.constant 0 : index
    %8 = vector.load %arg15[%c0_5, %c0_6] : memref<1x4xf32, #tpu.memory_space<vmem>>, vector<1x4xf32>
    %9 = vector.broadcast %8 : vector<1x4xf32> to vector<128x4xf32>
    %10 = arith.addf %7, %9 : vector<128x4xf32>
    %11 = vector.shape_cast %10 : vector<128x4xf32> to vector<2x64x4xf32>
    %12 = arith.truncf %11 : vector<2x64x4xf32> to vector<2x64x4xbf16>
    %c0_7 = arith.constant 0 : index
    %c0_8 = arith.constant 0 : index
    %c0_9 = arith.constant 0 : index
    %13 = vector.load %arg16[%c0_7, %c0_8, %c0_9] : memref<2x64x4xbf16, #tpu.memory_space<vmem>>, vector<2x64x4xbf16>
    tpu.vector_store %arg16[%c0_7, %c0_8, %c0_9], %12 {strides = array<i32>} : memref<2x64x4xbf16, #tpu.memory_space<vmem>>, vector<2x64x4xbf16>,
    return
  }
  func.func @transform_0(%arg0: i32) -> (i32, i32, i32) {
    %c0_i32 = arith.constant 0 : i32
    %c0_i32_0 = arith.constant 0 : i32
    %c0_i32_1 = arith.constant 0 : i32
    return %arg0, %c0_i32, %c0_i32_0 : i32, i32, i32
  }
  func.func @transform_1(%arg0: i32) -> (i32, i32, i32) {
    %c0_i32 = arith.constant 0 : i32
    %c0_i32_0 = arith.constant 0 : i32
    %c0_i32_1 = arith.constant 0 : i32
    %c0_i32_2 = arith.constant 0 : i32
    return %c0_i32, %c0_i32_0, %c0_i32_1 : i32, i32, i32
  }
  func.func @transform_2(%arg0: i32) -> (i32, i32, i32) {
    %c0_i32 = arith.constant 0 : i32
    %c0_i32_0 = arith.constant 0 : i32
    %c0_i32_1 = arith.constant 0 : i32
    %c0_i32_2 = arith.constant 0 : i32
    return %c0_i32, %c0_i32_0, %c0_i32_1 : i32, i32, i32
  }
  func.func @transform_3(%arg0: i32) -> (i32, i32, i32) {
    %c0_i32 = arith.constant 0 : i32
    %c0_i32_0 = arith.constant 0 : i32
    %c0_i32_1 = arith.constant 0 : i32
    %c0_i32_2 = arith.constant 0 : i32
    return %c0_i32, %c0_i32_0, %c0_i32_1 : i32, i32, i32
  }
  func.func @transform_4(%arg0: i32) -> (i32, i32, i32) {
    %c0_i32 = arith.constant 0 : i32
    %c0_i32_0 = arith.constant 0 : i32
    %c0_i32_1 = arith.constant 0 : i32
    %c0_i32_2 = arith.constant 0 : i32
    return %c0_i32, %c0_i32_0, %c0_i32_1 : i32, i32, i32
  }
  func.func @transform_5(%arg0: i32) -> (i32, i32, i32) {
    %c0_i32 = arith.constant 0 : i32
    %c0_i32_0 = arith.constant 0 : i32
    %c0_i32_1 = arith.constant 0 : i32
    %c0_i32_2 = arith.constant 0 : i32
    return %c0_i32, %c0_i32_0, %c0_i32_1 : i32, i32, i32
  }
  func.func @transform_6(%arg0: i32) -> (i32, i32, i32) {
    %c0_i32 = arith.constant 0 : i32
    %c0_i32_0 = arith.constant 0 : i32
    %c0_i32_1 = arith.constant 0 : i32
    %c0_i32_2 = arith.constant 0 : i32
    return %c0_i32, %c0_i32_0, %c0_i32_1 : i32, i32, i32
  }
  func.func @transform_7(%arg0: i32) -> (i32, i32, i32) {
    %c0_i32 = arith.constant 0 : i32
    %c0_i32_0 = arith.constant 0 : i32
    %c0_i32_1 = arith.constant 0 : i32
    %c0_i32_2 = arith.constant 0 : i32
    return %c0_i32, %c0_i32_0, %c0_i32_1 : i32, i32, i32
  }
  func.func @transform_8(%arg0: i32) -> (i32, i32, i32) {
    %c0_i32 = arith.constant 0 : i32
    %c0_i32_0 = arith.constant 0 : i32
    %c0_i32_1 = arith.constant 0 : i32
    %c0_i32_2 = arith.constant 0 : i32
    return %c0_i32, %c0_i32_0, %c0_i32_1 : i32, i32, i32
  }
  func.func @transform_9(%arg0: i32) -> (i32, i32, i32) {
    %c0_i32 = arith.constant 0 : i32
    %c0_i32_0 = arith.constant 0 : i32
    %c0_i32_1 = arith.constant 0 : i32
    %c0_i32_2 = arith.constant 0 : i32
    return %c0_i32, %c0_i32_0, %c0_i32_1 : i32, i32, i32
  }
  func.func @transform_10(%arg0: i32) -> (i32, i32, i32) {
    %c0_i32 = arith.constant 0 : i32
    %c0_i32_0 = arith.constant 0 : i32
    %c0_i32_1 = arith.constant 0 : i32
    %c0_i32_2 = arith.constant 0 : i32
    return %c0_i32, %c0_i32_0, %c0_i32_1 : i32, i32, i32
  }
  func.func @transform_11(%arg0: i32) -> (i32, i32, i32) {
    %c0_i32 = arith.constant 0 : i32
    %c0_i32_0 = arith.constant 0 : i32
    %c0_i32_1 = arith.constant 0 : i32
    %c0_i32_2 = arith.constant 0 : i32
    return %c0_i32, %c0_i32_0, %c0_i32_1 : i32, i32, i32
  }
  func.func @transform_12(%arg0: i32) -> (i32, i32, i32) {
    %c0_i32 = arith.constant 0 : i32
    %c0_i32_0 = arith.constant 0 : i32
    %c0_i32_1 = arith.constant 0 : i32
    %c0_i32_2 = arith.constant 0 : i32
    return %c0_i32, %c0_i32_0, %c0_i32_1 : i32, i32, i32
  }
  func.func @transform_13(%arg0: i32) -> (i32, i32) {
    %c0_i32 = arith.constant 0 : i32
    %c0_i32_0 = arith.constant 0 : i32
    %c0_i32_1 = arith.constant 0 : i32
    return %c0_i32, %c0_i32_0 : i32, i32
  }
  func.func @transform_14(%arg0: i32) -> (i32, i32) {
    %c0_i32 = arith.constant 0 : i32
    %c0_i32_0 = arith.constant 0 : i32
    %c0_i32_1 = arith.constant 0 : i32
    return %c0_i32, %c0_i32_0 : i32, i32
  }
  func.func @transform_15(%arg0: i32) -> (i32, i32, i32) {
    %c0_i32 = arith.constant 0 : i32
    %c0_i32_0 = arith.constant 0 : i32
    %c0_i32_1 = arith.constant 0 : i32
    return %arg0, %c0_i32, %c0_i32_0 : i32, i32, i32
  }
}

module attributes {stable_mosaic.version = 11 : i64} {
  func.func @_fusion_conv_kernel(%arg0: i32, %arg1: memref<1x4x162xbf16, #tpu.memory_space<vmem>>, %arg2: memref<1x4x162xbf16, #tpu.memory_space<vmem>>, %arg3: memref<2x128xbf16, #tpu.memory_space<vmem>>, %arg4: memref<9x8x4xbf16, #tpu.memory_space<vmem>>, %arg5: memref<9x8x4xbf16, #tpu.memory_space<vmem>>, %arg6: memref<8x1xf32, #tpu.memory_space<vmem>>, %arg7: memref<8x128xf32, #tpu.memory_space<vmem>>) attributes {dimension_semantics = [#tpu.dimension_semantics<parallel>], iteration_bounds = array<i64: 4>, scalar_prefetch = 0 : i64, scratch_operands = 0 : i64, tpu.core_type = #tpu.core_type<tc>, window_params = [{transform_indices = @transform_0, window_bounds = array<i64: 1, 4, 162>}, {transform_indices = @transform_1, window_bounds = array<i64: 1, 4, 162>}, {pipeline_mode = #tpu.pipeline_mode<synchronous>, transform_indices = @transform_2, window_bounds = array<i64: 2, 128>}, {pipeline_mode = #tpu.pipeline_mode<synchronous>, transform_indices = @transform_3, window_bounds = array<i64: 9, 8, 4>}, {pipeline_mode = #tpu.pipeline_mode<synchronous>, transform_indices = @transform_4, window_bounds = array<i64: 9, 8, 4>}, {pipeline_mode = #tpu.pipeline_mode<synchronous>, transform_indices = @transform_5, window_bounds = array<i64: 8, 1>}, {transform_indices = @transform_6, window_bounds = array<i64: 8, 128>}]} {
    %c0 = arith.constant 0 : index
    %c0_0 = arith.constant 0 : index
    %0 = vector.load %arg3[%c0, %c0_0] : memref<2x128xbf16, #tpu.memory_space<vmem>>, vector<2x128xbf16>
    %1 = vector.extract_strided_slice %0 {offsets = [0, 0], sizes = [1, 128], strides = [1, 1]} : vector<2x128xbf16> to vector<1x128xbf16>
    %2 = vector.extract_strided_slice %0 {offsets = [1, 0], sizes = [1, 128], strides = [1, 1]} : vector<2x128xbf16> to vector<1x128xbf16>
    %cst = arith.constant 0.000000e+00 : f32
    %3 = vector.broadcast %cst : f32 to vector<8x128xf32>
    %c0_1 = arith.constant 0 : index
    %c0_2 = arith.constant 0 : index
    %c0_3 = arith.constant 0 : index
    %4 = vector.load %arg1[%c0_1, %c0_2, %c0_3] : memref<1x4x162xbf16, #tpu.memory_space<vmem>>, vector<1x4x162xbf16>
    %5 = vector.shape_cast %4 : vector<1x4x162xbf16> to vector<4x162xbf16>
    %6 = vector.extract_strided_slice %5 {offsets = [0, 0], sizes = [4, 128], strides = [1, 1]} : vector<4x162xbf16> to vector<4x128xbf16>
    %7 = vector.broadcast %2 : vector<1x128xbf16> to vector<4x128xbf16>
    %8 = arith.mulf %6, %7 : vector<4x128xbf16>
    %c0_4 = arith.constant 0 : index
    %c0_5 = arith.constant 0 : index
    %c0_6 = arith.constant 0 : index
    %9 = vector.load %arg4[%c0_4, %c0_5, %c0_6] : memref<9x8x4xbf16, #tpu.memory_space<vmem>>, vector<1x8x4xbf16>
    %10 = vector.shape_cast %9 : vector<1x8x4xbf16> to vector<8x4xbf16>
    %cst_7 = arith.constant dense<0.000000e+00> : vector<8x128xf32>
    %11 = tpu.matmul %10, %8, %cst_7 {dimension_numbers = #tpu.dot_dimension_numbers<[1], [0], [0], [1], [0, 0, 1, 1], [], []>} : vector<8x4xbf16>, vector<4x128xbf16>, vector<8x128xf32> -> vector<8x128xf32>
    %12 = arith.addf %3, %11 : vector<8x128xf32>
    %13 = vector.extract_strided_slice %5 {offsets = [0, 1], sizes = [4, 128], strides = [1, 1]} : vector<4x162xbf16> to vector<4x128xbf16>
    %c1 = arith.constant 1 : index
    %c0_8 = arith.constant 0 : index
    %c0_9 = arith.constant 0 : index
    %14 = vector.load %arg4[%c1, %c0_8, %c0_9] : memref<9x8x4xbf16, #tpu.memory_space<vmem>>, vector<1x8x4xbf16>
    %15 = vector.shape_cast %14 : vector<1x8x4xbf16> to vector<8x4xbf16>
    %cst_10 = arith.constant dense<0.000000e+00> : vector<8x128xf32>
    %16 = tpu.matmul %15, %13, %cst_10 {dimension_numbers = #tpu.dot_dimension_numbers<[1], [0], [0], [1], [0, 0, 1, 1], [], []>} : vector<8x4xbf16>, vector<4x128xbf16>, vector<8x128xf32> -> vector<8x128xf32>
    %17 = arith.addf %12, %16 : vector<8x128xf32>
    %18 = vector.extract_strided_slice %5 {offsets = [0, 2], sizes = [4, 128], strides = [1, 1]} : vector<4x162xbf16> to vector<4x128xbf16>
    %19 = vector.broadcast %1 : vector<1x128xbf16> to vector<4x128xbf16>
    %20 = arith.mulf %18, %19 : vector<4x128xbf16>
    %c2 = arith.constant 2 : index
    %c0_11 = arith.constant 0 : index
    %c0_12 = arith.constant 0 : index
    %21 = vector.load %arg4[%c2, %c0_11, %c0_12] : memref<9x8x4xbf16, #tpu.memory_space<vmem>>, vector<1x8x4xbf16>
    %22 = vector.shape_cast %21 : vector<1x8x4xbf16> to vector<8x4xbf16>
    %cst_13 = arith.constant dense<0.000000e+00> : vector<8x128xf32>
    %23 = tpu.matmul %22, %20, %cst_13 {dimension_numbers = #tpu.dot_dimension_numbers<[1], [0], [0], [1], [0, 0, 1, 1], [], []>} : vector<8x4xbf16>, vector<4x128xbf16>, vector<8x128xf32> -> vector<8x128xf32>
    %24 = arith.addf %17, %23 : vector<8x128xf32>
    %25 = vector.extract_strided_slice %5 {offsets = [0, 16], sizes = [4, 128], strides = [1, 1]} : vector<4x162xbf16> to vector<4x128xbf16>
    %26 = vector.broadcast %2 : vector<1x128xbf16> to vector<4x128xbf16>
    %27 = arith.mulf %25, %26 : vector<4x128xbf16>
    %c3 = arith.constant 3 : index
    %c0_14 = arith.constant 0 : index
    %c0_15 = arith.constant 0 : index
    %28 = vector.load %arg4[%c3, %c0_14, %c0_15] : memref<9x8x4xbf16, #tpu.memory_space<vmem>>, vector<1x8x4xbf16>
    %29 = vector.shape_cast %28 : vector<1x8x4xbf16> to vector<8x4xbf16>
    %cst_16 = arith.constant dense<0.000000e+00> : vector<8x128xf32>
    %30 = tpu.matmul %29, %27, %cst_16 {dimension_numbers = #tpu.dot_dimension_numbers<[1], [0], [0], [1], [0, 0, 1, 1], [], []>} : vector<8x4xbf16>, vector<4x128xbf16>, vector<8x128xf32> -> vector<8x128xf32>
    %31 = arith.addf %24, %30 : vector<8x128xf32>
    %32 = vector.extract_strided_slice %5 {offsets = [0, 17], sizes = [4, 128], strides = [1, 1]} : vector<4x162xbf16> to vector<4x128xbf16>
    %c4 = arith.constant 4 : index
    %c0_17 = arith.constant 0 : index
    %c0_18 = arith.constant 0 : index
    %33 = vector.load %arg4[%c4, %c0_17, %c0_18] : memref<9x8x4xbf16, #tpu.memory_space<vmem>>, vector<1x8x4xbf16>
    %34 = vector.shape_cast %33 : vector<1x8x4xbf16> to vector<8x4xbf16>
    %cst_19 = arith.constant dense<0.000000e+00> : vector<8x128xf32>
    %35 = tpu.matmul %34, %32, %cst_19 {dimension_numbers = #tpu.dot_dimension_numbers<[1], [0], [0], [1], [0, 0, 1, 1], [], []>} : vector<8x4xbf16>, vector<4x128xbf16>, vector<8x128xf32> -> vector<8x128xf32>
    %36 = arith.addf %31, %35 : vector<8x128xf32>
    %37 = vector.extract_strided_slice %5 {offsets = [0, 18], sizes = [4, 128], strides = [1, 1]} : vector<4x162xbf16> to vector<4x128xbf16>
    %38 = vector.broadcast %1 : vector<1x128xbf16> to vector<4x128xbf16>
    %39 = arith.mulf %37, %38 : vector<4x128xbf16>
    %c5 = arith.constant 5 : index
    %c0_20 = arith.constant 0 : index
    %c0_21 = arith.constant 0 : index
    %40 = vector.load %arg4[%c5, %c0_20, %c0_21] : memref<9x8x4xbf16, #tpu.memory_space<vmem>>, vector<1x8x4xbf16>
    %41 = vector.shape_cast %40 : vector<1x8x4xbf16> to vector<8x4xbf16>
    %cst_22 = arith.constant dense<0.000000e+00> : vector<8x128xf32>
    %42 = tpu.matmul %41, %39, %cst_22 {dimension_numbers = #tpu.dot_dimension_numbers<[1], [0], [0], [1], [0, 0, 1, 1], [], []>} : vector<8x4xbf16>, vector<4x128xbf16>, vector<8x128xf32> -> vector<8x128xf32>
    %43 = arith.addf %36, %42 : vector<8x128xf32>
    %44 = vector.extract_strided_slice %5 {offsets = [0, 32], sizes = [4, 128], strides = [1, 1]} : vector<4x162xbf16> to vector<4x128xbf16>
    %45 = vector.broadcast %2 : vector<1x128xbf16> to vector<4x128xbf16>
    %46 = arith.mulf %44, %45 : vector<4x128xbf16>
    %c6 = arith.constant 6 : index
    %c0_23 = arith.constant 0 : index
    %c0_24 = arith.constant 0 : index
    %47 = vector.load %arg4[%c6, %c0_23, %c0_24] : memref<9x8x4xbf16, #tpu.memory_space<vmem>>, vector<1x8x4xbf16>
    %48 = vector.shape_cast %47 : vector<1x8x4xbf16> to vector<8x4xbf16>
    %cst_25 = arith.constant dense<0.000000e+00> : vector<8x128xf32>
    %49 = tpu.matmul %48, %46, %cst_25 {dimension_numbers = #tpu.dot_dimension_numbers<[1], [0], [0], [1], [0, 0, 1, 1], [], []>} : vector<8x4xbf16>, vector<4x128xbf16>, vector<8x128xf32> -> vector<8x128xf32>
    %50 = arith.addf %43, %49 : vector<8x128xf32>
    %51 = vector.extract_strided_slice %5 {offsets = [0, 33], sizes = [4, 128], strides = [1, 1]} : vector<4x162xbf16> to vector<4x128xbf16>
    %c7 = arith.constant 7 : index
    %c0_26 = arith.constant 0 : index
    %c0_27 = arith.constant 0 : index
    %52 = vector.load %arg4[%c7, %c0_26, %c0_27] : memref<9x8x4xbf16, #tpu.memory_space<vmem>>, vector<1x8x4xbf16>
    %53 = vector.shape_cast %52 : vector<1x8x4xbf16> to vector<8x4xbf16>
    %cst_28 = arith.constant dense<0.000000e+00> : vector<8x128xf32>
    %54 = tpu.matmul %53, %51, %cst_28 {dimension_numbers = #tpu.dot_dimension_numbers<[1], [0], [0], [1], [0, 0, 1, 1], [], []>} : vector<8x4xbf16>, vector<4x128xbf16>, vector<8x128xf32> -> vector<8x128xf32>
    %55 = arith.addf %50, %54 : vector<8x128xf32>
    %56 = vector.extract_strided_slice %5 {offsets = [0, 34], sizes = [4, 128], strides = [1, 1]} : vector<4x162xbf16> to vector<4x128xbf16>
    %57 = vector.broadcast %1 : vector<1x128xbf16> to vector<4x128xbf16>
    %58 = arith.mulf %56, %57 : vector<4x128xbf16>
    %c8 = arith.constant 8 : index
    %c0_29 = arith.constant 0 : index
    %c0_30 = arith.constant 0 : index
    %59 = vector.load %arg4[%c8, %c0_29, %c0_30] : memref<9x8x4xbf16, #tpu.memory_space<vmem>>, vector<1x8x4xbf16>
    %60 = vector.shape_cast %59 : vector<1x8x4xbf16> to vector<8x4xbf16>
    %cst_31 = arith.constant dense<0.000000e+00> : vector<8x128xf32>
    %61 = tpu.matmul %60, %58, %cst_31 {dimension_numbers = #tpu.dot_dimension_numbers<[1], [0], [0], [1], [0, 0, 1, 1], [], []>} : vector<8x4xbf16>, vector<4x128xbf16>, vector<8x128xf32> -> vector<8x128xf32>
    %62 = arith.addf %55, %61 : vector<8x128xf32>
    %c0_32 = arith.constant 0 : index
    %c0_33 = arith.constant 0 : index
    %c0_34 = arith.constant 0 : index
    %63 = vector.load %arg2[%c0_32, %c0_33, %c0_34] : memref<1x4x162xbf16, #tpu.memory_space<vmem>>, vector<1x4x162xbf16>
    %64 = vector.shape_cast %63 : vector<1x4x162xbf16> to vector<4x162xbf16>
    %65 = vector.extract_strided_slice %64 {offsets = [0, 0], sizes = [4, 128], strides = [1, 1]} : vector<4x162xbf16> to vector<4x128xbf16>
    %66 = vector.broadcast %2 : vector<1x128xbf16> to vector<4x128xbf16>
    %67 = arith.mulf %65, %66 : vector<4x128xbf16>
    %c0_35 = arith.constant 0 : index
    %c0_36 = arith.constant 0 : index
    %c0_37 = arith.constant 0 : index
    %68 = vector.load %arg5[%c0_35, %c0_36, %c0_37] : memref<9x8x4xbf16, #tpu.memory_space<vmem>>, vector<1x8x4xbf16>
    %69 = vector.shape_cast %68 : vector<1x8x4xbf16> to vector<8x4xbf16>
    %cst_38 = arith.constant dense<0.000000e+00> : vector<8x128xf32>
    %70 = tpu.matmul %69, %67, %cst_38 {dimension_numbers = #tpu.dot_dimension_numbers<[1], [0], [0], [1], [0, 0, 1, 1], [], []>} : vector<8x4xbf16>, vector<4x128xbf16>, vector<8x128xf32> -> vector<8x128xf32>
    %71 = arith.addf %62, %70 : vector<8x128xf32>
    %72 = vector.extract_strided_slice %64 {offsets = [0, 1], sizes = [4, 128], strides = [1, 1]} : vector<4x162xbf16> to vector<4x128xbf16>
    %c1_39 = arith.constant 1 : index
    %c0_40 = arith.constant 0 : index
    %c0_41 = arith.constant 0 : index
    %73 = vector.load %arg5[%c1_39, %c0_40, %c0_41] : memref<9x8x4xbf16, #tpu.memory_space<vmem>>, vector<1x8x4xbf16>
    %74 = vector.shape_cast %73 : vector<1x8x4xbf16> to vector<8x4xbf16>
    %cst_42 = arith.constant dense<0.000000e+00> : vector<8x128xf32>
    %75 = tpu.matmul %74, %72, %cst_42 {dimension_numbers = #tpu.dot_dimension_numbers<[1], [0], [0], [1], [0, 0, 1, 1], [], []>} : vector<8x4xbf16>, vector<4x128xbf16>, vector<8x128xf32> -> vector<8x128xf32>
    %76 = arith.addf %71, %75 : vector<8x128xf32>
    %77 = vector.extract_strided_slice %64 {offsets = [0, 2], sizes = [4, 128], strides = [1, 1]} : vector<4x162xbf16> to vector<4x128xbf16>
    %78 = vector.broadcast %1 : vector<1x128xbf16> to vector<4x128xbf16>
    %79 = arith.mulf %77, %78 : vector<4x128xbf16>
    %c2_43 = arith.constant 2 : index
    %c0_44 = arith.constant 0 : index
    %c0_45 = arith.constant 0 : index
    %80 = vector.load %arg5[%c2_43, %c0_44, %c0_45] : memref<9x8x4xbf16, #tpu.memory_space<vmem>>, vector<1x8x4xbf16>
    %81 = vector.shape_cast %80 : vector<1x8x4xbf16> to vector<8x4xbf16>
    %cst_46 = arith.constant dense<0.000000e+00> : vector<8x128xf32>
    %82 = tpu.matmul %81, %79, %cst_46 {dimension_numbers = #tpu.dot_dimension_numbers<[1], [0], [0], [1], [0, 0, 1, 1], [], []>} : vector<8x4xbf16>, vector<4x128xbf16>, vector<8x128xf32> -> vector<8x128xf32>
    %83 = arith.addf %76, %82 : vector<8x128xf32>
    %84 = vector.extract_strided_slice %64 {offsets = [0, 16], sizes = [4, 128], strides = [1, 1]} : vector<4x162xbf16> to vector<4x128xbf16>
    %85 = vector.broadcast %2 : vector<1x128xbf16> to vector<4x128xbf16>
    %86 = arith.mulf %84, %85 : vector<4x128xbf16>
    %c3_47 = arith.constant 3 : index
    %c0_48 = arith.constant 0 : index
    %c0_49 = arith.constant 0 : index
    %87 = vector.load %arg5[%c3_47, %c0_48, %c0_49] : memref<9x8x4xbf16, #tpu.memory_space<vmem>>, vector<1x8x4xbf16>
    %88 = vector.shape_cast %87 : vector<1x8x4xbf16> to vector<8x4xbf16>
    %cst_50 = arith.constant dense<0.000000e+00> : vector<8x128xf32>
    %89 = tpu.matmul %88, %86, %cst_50 {dimension_numbers = #tpu.dot_dimension_numbers<[1], [0], [0], [1], [0, 0, 1, 1], [], []>} : vector<8x4xbf16>, vector<4x128xbf16>, vector<8x128xf32> -> vector<8x128xf32>
    %90 = arith.addf %83, %89 : vector<8x128xf32>
    %91 = vector.extract_strided_slice %64 {offsets = [0, 17], sizes = [4, 128], strides = [1, 1]} : vector<4x162xbf16> to vector<4x128xbf16>
    %c4_51 = arith.constant 4 : index
    %c0_52 = arith.constant 0 : index
    %c0_53 = arith.constant 0 : index
    %92 = vector.load %arg5[%c4_51, %c0_52, %c0_53] : memref<9x8x4xbf16, #tpu.memory_space<vmem>>, vector<1x8x4xbf16>
    %93 = vector.shape_cast %92 : vector<1x8x4xbf16> to vector<8x4xbf16>
    %cst_54 = arith.constant dense<0.000000e+00> : vector<8x128xf32>
    %94 = tpu.matmul %93, %91, %cst_54 {dimension_numbers = #tpu.dot_dimension_numbers<[1], [0], [0], [1], [0, 0, 1, 1], [], []>} : vector<8x4xbf16>, vector<4x128xbf16>, vector<8x128xf32> -> vector<8x128xf32>
    %95 = arith.addf %90, %94 : vector<8x128xf32>
    %96 = vector.extract_strided_slice %64 {offsets = [0, 18], sizes = [4, 128], strides = [1, 1]} : vector<4x162xbf16> to vector<4x128xbf16>
    %97 = vector.broadcast %1 : vector<1x128xbf16> to vector<4x128xbf16>
    %98 = arith.mulf %96, %97 : vector<4x128xbf16>
    %c5_55 = arith.constant 5 : index
    %c0_56 = arith.constant 0 : index
    %c0_57 = arith.constant 0 : index
    %99 = vector.load %arg5[%c5_55, %c0_56, %c0_57] : memref<9x8x4xbf16, #tpu.memory_space<vmem>>, vector<1x8x4xbf16>
    %100 = vector.shape_cast %99 : vector<1x8x4xbf16> to vector<8x4xbf16>
    %cst_58 = arith.constant dense<0.000000e+00> : vector<8x128xf32>
    %101 = tpu.matmul %100, %98, %cst_58 {dimension_numbers = #tpu.dot_dimension_numbers<[1], [0], [0], [1], [0, 0, 1, 1], [], []>} : vector<8x4xbf16>, vector<4x128xbf16>, vector<8x128xf32> -> vector<8x128xf32>
    %102 = arith.addf %95, %101 : vector<8x128xf32>
    %103 = vector.extract_strided_slice %64 {offsets = [0, 32], sizes = [4, 128], strides = [1, 1]} : vector<4x162xbf16> to vector<4x128xbf16>
    %104 = vector.broadcast %2 : vector<1x128xbf16> to vector<4x128xbf16>
    %105 = arith.mulf %103, %104 : vector<4x128xbf16>
    %c6_59 = arith.constant 6 : index
    %c0_60 = arith.constant 0 : index
    %c0_61 = arith.constant 0 : index
    %106 = vector.load %arg5[%c6_59, %c0_60, %c0_61] : memref<9x8x4xbf16, #tpu.memory_space<vmem>>, vector<1x8x4xbf16>
    %107 = vector.shape_cast %106 : vector<1x8x4xbf16> to vector<8x4xbf16>
    %cst_62 = arith.constant dense<0.000000e+00> : vector<8x128xf32>
    %108 = tpu.matmul %107, %105, %cst_62 {dimension_numbers = #tpu.dot_dimension_numbers<[1], [0], [0], [1], [0, 0, 1, 1], [], []>} : vector<8x4xbf16>, vector<4x128xbf16>, vector<8x128xf32> -> vector<8x128xf32>
    %109 = arith.addf %102, %108 : vector<8x128xf32>
    %110 = vector.extract_strided_slice %64 {offsets = [0, 33], sizes = [4, 128], strides = [1, 1]} : vector<4x162xbf16> to vector<4x128xbf16>
    %c7_63 = arith.constant 7 : index
    %c0_64 = arith.constant 0 : index
    %c0_65 = arith.constant 0 : index
    %111 = vector.load %arg5[%c7_63, %c0_64, %c0_65] : memref<9x8x4xbf16, #tpu.memory_space<vmem>>, vector<1x8x4xbf16>
    %112 = vector.shape_cast %111 : vector<1x8x4xbf16> to vector<8x4xbf16>
    %cst_66 = arith.constant dense<0.000000e+00> : vector<8x128xf32>
    %113 = tpu.matmul %112, %110, %cst_66 {dimension_numbers = #tpu.dot_dimension_numbers<[1], [0], [0], [1], [0, 0, 1, 1], [], []>} : vector<8x4xbf16>, vector<4x128xbf16>, vector<8x128xf32> -> vector<8x128xf32>
    %114 = arith.addf %109, %113 : vector<8x128xf32>
    %115 = vector.extract_strided_slice %64 {offsets = [0, 34], sizes = [4, 128], strides = [1, 1]} : vector<4x162xbf16> to vector<4x128xbf16>
    %116 = vector.broadcast %1 : vector<1x128xbf16> to vector<4x128xbf16>
    %117 = arith.mulf %115, %116 : vector<4x128xbf16>
    %c8_67 = arith.constant 8 : index
    %c0_68 = arith.constant 0 : index
    %c0_69 = arith.constant 0 : index
    %118 = vector.load %arg5[%c8_67, %c0_68, %c0_69] : memref<9x8x4xbf16, #tpu.memory_space<vmem>>, vector<1x8x4xbf16>
    %119 = vector.shape_cast %118 : vector<1x8x4xbf16> to vector<8x4xbf16>
    %cst_70 = arith.constant dense<0.000000e+00> : vector<8x128xf32>
    %120 = tpu.matmul %119, %117, %cst_70 {dimension_numbers = #tpu.dot_dimension_numbers<[1], [0], [0], [1], [0, 0, 1, 1], [], []>} : vector<8x4xbf16>, vector<4x128xbf16>, vector<8x128xf32> -> vector<8x128xf32>
    %121 = arith.addf %114, %120 : vector<8x128xf32>
    %c0_71 = arith.constant 0 : index
    %c0_72 = arith.constant 0 : index
    %122 = vector.load %arg6[%c0_71, %c0_72] : memref<8x1xf32, #tpu.memory_space<vmem>>, vector<8x1xf32>
    %123 = vector.broadcast %122 : vector<8x1xf32> to vector<8x128xf32>
    %124 = arith.addf %121, %123 : vector<8x128xf32>
    %c0_73 = arith.constant 0 : index
    %c0_74 = arith.constant 0 : index
    %125 = vector.load %arg7[%c0_73, %c0_74] : memref<8x128xf32, #tpu.memory_space<vmem>>, vector<8x128xf32>
    tpu.vector_store %arg7[%c0_73, %c0_74], %124 {strides = array<i32>} : memref<8x128xf32, #tpu.memory_space<vmem>>, vector<8x128xf32>,
    return
  }
  func.func @transform_0(%arg0: i32) -> (i32, i32, i32) {
    %c0_i32 = arith.constant 0 : i32
    %c0_i32_0 = arith.constant 0 : i32
    %c0_i32_1 = arith.constant 0 : i32
    return %arg0, %c0_i32, %c0_i32_0 : i32, i32, i32
  }
  func.func @transform_1(%arg0: i32) -> (i32, i32, i32) {
    %c0_i32 = arith.constant 0 : i32
    %c0_i32_0 = arith.constant 0 : i32
    %c0_i32_1 = arith.constant 0 : i32
    return %arg0, %c0_i32, %c0_i32_0 : i32, i32, i32
  }
  func.func @transform_2(%arg0: i32) -> (i32, i32) {
    %c0_i32 = arith.constant 0 : i32
    %c0_i32_0 = arith.constant 0 : i32
    %c0_i32_1 = arith.constant 0 : i32
    return %c0_i32, %c0_i32_0 : i32, i32
  }
  func.func @transform_3(%arg0: i32) -> (i32, i32, i32) {
    %c0_i32 = arith.constant 0 : i32
    %c0_i32_0 = arith.constant 0 : i32
    %c0_i32_1 = arith.constant 0 : i32
    %c0_i32_2 = arith.constant 0 : i32
    return %c0_i32, %c0_i32_0, %c0_i32_1 : i32, i32, i32
  }
  func.func @transform_4(%arg0: i32) -> (i32, i32, i32) {
    %c0_i32 = arith.constant 0 : i32
    %c0_i32_0 = arith.constant 0 : i32
    %c0_i32_1 = arith.constant 0 : i32
    %c0_i32_2 = arith.constant 0 : i32
    return %c0_i32, %c0_i32_0, %c0_i32_1 : i32, i32, i32
  }
  func.func @transform_5(%arg0: i32) -> (i32, i32) {
    %c0_i32 = arith.constant 0 : i32
    %c0_i32_0 = arith.constant 0 : i32
    %c0_i32_1 = arith.constant 0 : i32
    return %c0_i32, %c0_i32_0 : i32, i32
  }
  func.func @transform_6(%arg0: i32) -> (i32, i32) {
    %c0_i32 = arith.constant 0 : i32
    %c0_i32_0 = arith.constant 0 : i32
    return %c0_i32, %arg0 : i32, i32
  }
}

</mosaic_0001>

<bundles_post_ra>
// kernel: mobilevit_block.3
= control target key start
LH: loop header
LB: loop body
LE: loop exit
PB: predicated region body
PF: predicated region fallthrough
CT: control target
= control target key end

     0   :  { %s1407_s21 = smov 0   ;;  %s1409_s22 = smov 0   ;;  %s1589_s0 = inlined_call_operand.vmem [shape: bf16[4,4,162], index: 0, kind: input, shape index: {}]   ;;  %s1590_s1 = inlined_call_operand.vmem [shape: bf16[2,128], index: 1, kind: input, shape index: {}]   ;;  %s1591_s2 = inlined_call_operand.vmem [shape: bf16[9,4,4], index: 2, kind: input, shape index: {}]   ;;  %s1592_s3 = inlined_call_operand.vmem [shape: f32[4,1], index: 3, kind: input, shape index: {}]   ;;  %s1593_s4 = inlined_call_operand.vmem [shape: bf16[32,4], index: 4, kind: input, shape index: {}]   ;;  %s1594_s5 = inlined_call_operand.vmem [shape: f32[32,1], index: 5, kind: input, shape index: {}]   ;;  %s1595_s6 = inlined_call_operand.vmem [shape: bf16[32,512], index: 6, kind: output, shape index: {}]  }
   0x1   :  { %s1411_s23 = smov 0  }
   0x2 LB: > { %s1420_s24 = sadd.s32 4294967295, %s1353_s23   ;;  %s1422_s25 = sadd.s32 1, %s1353_s23   ;;  %s1353_s23 = sphi %s1411_s23, %s1599_s23   ;;  %s1349_s22 = sphi %s1409_s22, %s1598_s22   ;;  %s1345_s21 = sphi %s1407_s21, %s1597_s21  }
   0x3   : > { %s151_s26 = ssub.s32 %s1353_s23, %s1422_s25  ;;  %s154_s27 = sadd.s32 1, %s1349_s22 }
   0x4   : > { %p152_p0 = scmp.eq.s32.totalorder %s151_s26, 0  ;;  %p164_p1 = scmp.ne.s32.totalorder %s1349_s22, %s1345_s21 }
   0x5   : > { %p165_p2 = scmp.eq.s32.totalorder %s1420_s24, 3  ;;  %p1130_p3 = scmp.ge.s32.totalorder %s1353_s23, 1 }
   0x6   : > { %s1430_s28 = scalar_select %p152_p0, %s1349_s22, %s154_s27  }
   0x7   : > { %p1432_p4 = por %p165_p2, %p164_p1  ;;  %p212_p5 = scmp.lt.s32.totalorder %s1353_s23, 5 }
   0x9   : > { %p213_p6 = pnand %p1130_p3, %p212_p5 }
   0xa   : > { %v248_v0 = vld [vmem:[%s1590_s1] sm:$0x1] (!%p213_p6)  ;;  %v253_v1 = vlaneseq (!%p213_p6)  ;;  %v1355_v2 = vmov (!%p213_p6), 1983009808   ;;  %p241_p7 = scmp.lt.s32.totalorder (!%p213_p6), %s1420_s24, 3  ;;  %s1356_s13 = smov (!%p213_p6), 2  }
   0xb   : > { %216 = sbr.rel (%p213_p6) target bundleno = 795 (0x31b), region = 44  ;;  %v263_v3 = vunpack.c.l.s4 (!%p213_p6), %v1355_v2  ;;  %v250_v4 = vshrl.u32 (!%p213_p6), %v248_v0, 16  ;;  %v370_v6 = vpack.i.b16 (!%p213_p6), %v248_v0, %v248_v0  ;;  %s1357_s14 = smov (!%p213_p6), 18   ;;  %v1362_v18 = vmov (!%p213_p6), 0.0   ;;  %v258_v21 = vld [vmem:[%s1591_s2] sm:$0x3] (!%p213_p6) }
   0xc   : > { %v254_v5 = vshrl.u32 (!%p213_p6), %v253_v1, 7  ;;  %s1358_s15 = smov (!%p213_p6), 16   ;;  %s1359_s16 = smov (!%p213_p6), 32   ;;  %1205 = vmatprep.subr.bf16.mxu0 (!%p213_p6), %v1362_v18  ;;  %vm1363_vm0 = vmmov (!%p213_p6), 0   ;;  %vm280_vm1 = vcmask (!%p213_p6), 1041408   ;;  %1211 = vmatprep.subr.bf16.mxu1 (!%p213_p6), %v1362_v18  ;;  %vm276_vm2 = vcmask (!%p213_p6), 31744  }
   0xd   : > { %v264_v7 = vunpack.c.0.s8 (!%p213_p6), %v263_v3  ;;  %v251_v8 = vpack.i.b16 (!%p213_p6), %v250_v4, %v250_v4  ;;  %s1360_s17 = smov (!%p213_p6), 34   ;;  %s1361_s18 = smov (!%p213_p6), 127   ;;  %1207 = vmatprep.mubr.msk.bf16.mxu0 (!%p213_p6), %vm1363_vm0, %v1362_v18  ;;  %1213 = vmatprep.mubr.msk.bf16.mxu1 (!%p213_p6), %vm1363_vm0, %v1362_v18  ;;  %vm387_vm3 = vcmask (!%p213_p6), 15360   ;;  %vm466_vm4 = vcmask (!%p213_p6), 130048   ;;  %v1134_v46 = vld [vmem:[%s1591_s2 + $0x2] sm:$0x3] (!%p213_p6) }
   0xe   : > { %v255_v9 = vsub.s32 (!%p213_p6), 0, %v254_v5  ;;  %vm592_vm5 = vcmask (!%p213_p6), 146432   ;;  %s1364_s23 = smov (!%p213_p6), 126   ;;  %vm663_vm6 = vcmask (!%p213_p6), 261120   ;;  %vm274_vm7 = vcmask (!%p213_p6), 1039360   ;;  %s1365_s26 = smov (!%p213_p6), 112  }
   0xf   : > { %v1441_v10 = vsub.s32 (!%p213_p6), %v264_v7, %v254_v5  ;;  %s1366_s7 = smov (!%p213_p6), 111   ;;  %vm789_vm8 = vcmask (!%p213_p6), 277504   ;;  %v1369_v55 = vmov (!%p213_p6), 0   ;;  %s1370_s10 = smov (!%p213_p6), 95   ;;  %v857_v58 = vld [vmem:[%s1592_s3] sm:$0xf] (!%p213_p6) }
  0x10   : > { %v375_v11 = vrot.slane (!%p213_p6), %v370_v6, %v255_v9  ;;  %v256_v12 = vrot.slane (!%p213_p6), %v251_v8, %v255_v9  ;;  %1307 = vset.pattern.permute.xlu1 (!%p213_p6), %v1369_v55  ;;  %1308 = vset.pattern.permute.xlu0 (!%p213_p6), %v1369_v55  ;;  %s1371_s11 = smov (!%p213_p6), 94   ;;  %v877_v59 = vld [vmem:[%s1594_s5 + $0x8] sm:$0xff] (!%p213_p6)  ;;  %v878_v60 = vld [vmem:[%s1594_s5 + $0x10] sm:$0xff] (!%p213_p6)  ;;  %vm406_vm9 = vcmask (!%p213_p6), 1031168   ;;  %vm485_vm10 = vcmask (!%p213_p6), 916480  }
  0x11   : > { %v1137_v2 = vld [vmem:[%s1591_s2 + $0x4] sm:$0x3] (!%p213_p6)  ;;  %vm540_vm11 = vcmask (!%p213_p6), 908288   ;;  %v1139_v7 = vld [vmem:[%s1591_s2 + $0x6] sm:$0x3] (!%p213_p6)  ;;  %vm611_vm12 = vcmask (!%p213_p6), 900096  }
  0x12   : > { %s242_s8 = scalar_select %p241_p7, %s1420_s24, 3  ;;  %v383_v13 = vrot.slane %v375_v11, %v1441_v10  ;;  %v462_v14 = vrot.slane %v256_v12, %v1441_v10  ;;  %vm682_vm13 = vcmask 785408   ;;  %vm737_vm14 = vcmask 777216  }
  0x13   : > { %vm808_vm15 = vcmask 769024  }
  0x14   : > { %s1168_s9 = sshll.u32 %s242_s8, 2  ;;  %384 = vrot.lane.b32.xlu0 %v383_v13, %s1356_s13  ;;  %589 = vrot.lane.b32.xlu1 %v383_v13, %s1357_s14  ;;  %s1367_s8 = smov 110  }
  0x15   : > { %s245_s12 = scalar_lea.vmem %s1589_s0, %s1168_s9  ;;  %s1368_s9 = smov 96  }
  0x16   : > { %v1448_v15 = vld [vmem:[%s245_s12] sm:$0xf] }
  0x17   : > { %v1452_v16 = vrot.slane %v1448_v15, %v1441_v10  ;;  %v257_v19 = vmul.bf16 %v256_v12, %v1448_v15  ;;  %v1141_v12 = vld [vmem:[%s1591_s2 + $0x8] sm:$0x3] }
  0x18   : > { %463 = vrot.lane.b32.xlu0 %v462_v14, %s1358_s15  ;;  %660 = vrot.lane.b32.xlu1 %v462_v14, %s1359_s16 }
  0x19   : > { %v1457_v17 = vcombine.high %v1452_v16, %v1452_v16  ;;  %v328_v20 = vsel %vm280_vm1, %v257_v19, 0 }
  0x1a   : > { %1212 = vmatpush3.bf16.msra.mxu1 %v328_v20 }
  0x1b   : > { %1223 = vmatprep.subr.bf16.mxu1 %v1362_v18 }
  0x1c   : > { %786 = vrot.lane.b32.xlu0 %v383_v13, %s1360_s17  ;;  %270 = vrot.lane.b32.xlu1 %v1452_v16, %s1361_s18 }
  0x1d   : > { %1214 = vmatmul.mubr.msk.bf16.vlgmr.msra.gmra.mrb[0].mxu1 %vm276_vm2, %v258_v21 }
  0x1e   : > { %1225 = vmatprep.mubr.msk.bf16.mxu1 %vm1363_vm0, %v1362_v18 }
  0x20   : > { %272 = vrot.lane.b32.xlu0 %v1457_v17, %s1361_s18 }
  0x86   : > { %v385_v22 = vpop.permute.xlu0 %384  ;;  %v590_v23 = vpop.permute.xlu1 %589 }
  0x87   : > { %v386_v24 = vrot.slane %v385_v22, 6  ;;  %v591_v29 = vrot.slane %v590_v23, 6 }
  0x89   : > { %v388_v25 = vsel %vm387_vm3, %v386_v24, %v385_v22  ;;  %v593_v36 = vsel %vm592_vm5, %v591_v29, %v590_v23  ;;  %v1145_v23 = vld [vmem:[%s1591_s2 + $0xc] sm:$0x3] }
  0x8a   : > { %v390_v26 = vmul.bf16 %v388_v25, %v1448_v15  ;;  %v464_v27 = vpop.permute.xlu0 %463  ;;  %v661_v31 = vpop.permute.xlu1 %660  ;;  %v595_v40 = vmul.bf16 %v593_v36, %v1448_v15 }
  0x8b   : > { %v465_v28 = vrot.slane %v464_v27, 6  ;;  %v662_v37 = vrot.slane %v661_v31, 6 }
  0x8c   : > { %v400_v30 = vrot.slane %v390_v26, %v1441_v10  ;;  %v605_v48 = vrot.slane %v595_v40, %v1441_v10 }
  0x8d   : > { %v467_v32 = vsel %vm466_vm4, %v465_v28, %v464_v27  ;;  %v664_v43 = vsel %vm663_vm6, %v662_v37, %v661_v31  ;;  %v1147_v27 = vld [vmem:[%s1591_s2 + $0xe] sm:$0x3] }
  0x8e   : > { %v469_v33 = vmul.bf16 %v467_v32, %v1448_v15  ;;  %402 = vrot.lane.b32.xlu1 %v400_v30, %s1364_s23  ;;  %v401_v34 = vcombine.high %v400_v30, %v400_v30  ;;  %v787_v35 = vpop.permute.xlu0 %786  ;;  %v271_v39 = vpop.permute.xlu1 %270  ;;  %v666_v47 = vmul.bf16 %v664_v43, %v1448_v15  ;;  %v606_v50 = vcombine.high %v605_v48, %v605_v48  ;;  %v1149_v32 = vld [vmem:[%s1591_s2 + $0x10] sm:$0x3]  ;;  %v879_v43 = vld [vmem:[%s1594_s5 + $0x18] sm:$0xff] }
  0x8f   : > { %v788_v49 = vrot.slane %v787_v35, 6 }
  0x90   : > { %404 = vrot.lane.b32.xlu0 %v401_v34, %s1364_s23  ;;  %v479_v38 = vrot.slane %v469_v33, %v1441_v10  ;;  %v676_v51 = vrot.slane %v666_v47, %v1441_v10 }
  0x91   : > { %v790_v52 = vsel %vm789_vm8, %v788_v49, %v787_v35 }
  0x92   : > { %481 = vrot.lane.b32.xlu1 %v479_v38, %s1365_s26  ;;  %v480_v41 = vcombine.high %v479_v38, %v479_v38  ;;  %v273_v42 = vpop.permute.xlu0 %272  ;;  %v792_v53 = vmul.bf16 %v790_v52, %v1448_v15  ;;  %v677_v54 = vcombine.high %v676_v51, %v676_v51 }
  0x93   : > { %v275_v44 = vsel %vm274_vm7, %v271_v39, %v273_v42  ;;  %v876_v42 = vld [vmem:[%s1594_s5] sm:$0xff] }
  0x94   : > { %483 = vrot.lane.b32.xlu0 %v480_v41, %s1365_s26  ;;  %v282_v45 = vsel %vm280_vm1, %v275_v44, 0  ;;  %v802_v56 = vrot.slane %v792_v53, %v1441_v10  ;;  %v1309_v41 = vld [vmem:[%s1593_s4] sm:$0xff]   ;;  %s238_s26 = sand.u32 1, %s1345_s21  }
  0x95   : > { %1206 = vmatpush3.bf16.msra.mxu0 %v282_v45  ;;  %s1131_s27 = sshll.u32 %s238_s26, 4 }
  0x96   : > { %536 = vrot.lane.b32.xlu1 %v1452_v16, %s1366_s7  ;;  %1217 = vmatprep.subr.bf16.mxu0 %v1362_v18  ;;  %v803_v57 = vcombine.high %v802_v56, %v802_v56  ;;  %s240_s30 = scalar_lea.vmem [#allocation2], %s1131_s27 }
  0x98   : > { %538 = vrot.lane.b32.xlu0 %v1457_v17, %s1366_s7  ;;  %1208 = vmatmul.mubr.msk.bf16.vlgmr.msra.gmra.mrb[0].mxu0 %vm276_vm2, %v1134_v46  ;;  %s1165_s7 = sshll.u32 (%p1432_p4), %s1420_s24, 2 }
  0x99   : > { %1219 = vmatprep.mubr.msk.bf16.mxu0 %vm1363_vm0, %v1362_v18 }
  0x9a   : > { %607 = vrot.lane.b32.xlu1 %v605_v48, %s1367_s8 }
  0x9c   : > { %609 = vrot.lane.b32.xlu0 %v606_v50, %s1367_s8 }
  0x9e   : > { %678 = vrot.lane.b32.xlu1 %v676_v51, %s1368_s9 }
  0xa0   : > { %680 = vrot.lane.b32.xlu0 %v677_v54, %s1368_s9  ;;  %s1024_s9 = scalar_lea.vmem (%p1432_p4), %s1595_s6, %s1165_s7 }
  0xa2   : > { %733 = vrot.lane.b32.xlu1 %v1452_v16, %s1370_s10 }
  0xa4   : > { %735 = vrot.lane.b32.xlu0 %v1457_v17, %s1370_s10  ;;  %v1143_v17 = vld [vmem:[%s1591_s2 + $0xa] sm:$0x3] }
  0xa6   : > { %804 = vrot.lane.b32.xlu1 %v802_v56, %s1371_s11 }
  0xa8   : > { %806 = vrot.lane.b32.xlu0 %v803_v57, %s1371_s11 }
  0xaa   : > { %860 = vperm.xlu1 %1307, %v857_v58  }
  0xac   : > { %882 = vperm.xlu0 %1308, %v876_v42  }
  0xae   : > { %887 = vperm.xlu1 %1307, %v877_v59  }
  0xb0   : > { %897 = vperm.xlu0 %1308, %v879_v43  }
  0xb2   : > { %892 = vperm.xlu1 %1307, %v878_v60  }
  0xf0   : > { %v364_v33 = vpop.f32.mrb[0].mxu1 }
  0xf1   : > { %v1215_v34 = vpop.f32.mrb[1].mxu1 }
  0xf2   : > { %v367_v35 = vpop.f32.mrb[2].mxu1 }
  0xf3   : > { %v1216_v36 = vpop.f32.mrb[3].mxu1 }
 0x100   : > { %v403_v61 = vpop.permute.xlu1 %402 }
 0x102   : > { %v405_v62 = vpop.permute.xlu0 %404 }
 0x103   : > { %v407_v63 = vsel %vm406_vm9, %v403_v61, %v405_v62 }
 0x104   : > { %v412_v0 = vsel %vm280_vm1, %v407_v63, 0  ;;  %v482_v1 = vpop.permute.xlu1 %481 }
 0x105   : > { %1218 = vmatpush3.bf16.msra.mxu0 %v412_v0 }
 0x106   : > { %v484_v3 = vpop.permute.xlu0 %483  ;;  %1229 = vmatprep.subr.bf16.mxu0 %v1362_v18 }
 0x107   : > { %v486_v4 = vsel %vm485_vm10, %v482_v1, %v484_v3 }
 0x108   : > { %v491_v5 = vsel %vm280_vm1, %v486_v4, 0  ;;  %v537_v6 = vpop.permute.xlu1 %536  ;;  %1220 = vmatmul.mubr.msk.bf16.vlgmr.msra.gmra.mrb[4].mxu0 %vm276_vm2, %v1137_v2 }
 0x109   : > { %1224 = vmatpush3.bf16.msra.mxu1 %v491_v5  ;;  %1231 = vmatprep.mubr.msk.bf16.mxu0 %vm1363_vm0, %v1362_v18 }
 0x10a   : > { %v539_v8 = vpop.permute.xlu0 %538  ;;  %1235 = vmatprep.subr.bf16.mxu1 %v1362_v18 }
 0x10b   : > { %v541_v9 = vsel %vm540_vm11, %v537_v6, %v539_v8 }
 0x10c   : > { %v546_v10 = vsel %vm280_vm1, %v541_v9, 0  ;;  %v608_v11 = vpop.permute.xlu1 %607  ;;  %1226 = vmatmul.mubr.msk.bf16.vlgmr.msra.gmra.mrb[4].mxu1 %vm276_vm2, %v1139_v7 }
 0x10d   : > { %1230 = vmatpush3.bf16.msra.mxu0 %v546_v10  ;;  %1237 = vmatprep.mubr.msk.bf16.mxu1 %vm1363_vm0, %v1362_v18 }
 0x10e   : > { %v610_v13 = vpop.permute.xlu0 %609  ;;  %1241 = vmatprep.subr.bf16.mxu0 %v1362_v18 }
 0x10f   : > { %v612_v14 = vsel %vm611_vm12, %v608_v11, %v610_v13 }
 0x110   : > { %v617_v15 = vsel %vm280_vm1, %v612_v14, 0  ;;  %v679_v16 = vpop.permute.xlu1 %678  ;;  %1232 = vmatmul.mubr.msk.bf16.vlgmr.msra.gmra.mrb[8].mxu0 %vm276_vm2, %v1141_v12 }
 0x111   : > { %1236 = vmatpush3.bf16.msra.mxu1 %v617_v15  ;;  %1243 = vmatprep.mubr.msk.bf16.mxu0 %vm1363_vm0, %v1362_v18 }
 0x112   : > { %v681_v19 = vpop.permute.xlu0 %680  ;;  %1247 = vmatprep.subr.bf16.mxu1 %v1362_v18 }
 0x113   : > { %v683_v20 = vsel %vm682_vm13, %v679_v16, %v681_v19 }
 0x114   : > { %v688_v21 = vsel %vm280_vm1, %v683_v20, 0  ;;  %v734_v22 = vpop.permute.xlu1 %733  ;;  %1238 = vmatmul.mubr.msk.bf16.vlgmr.msra.gmra.mrb[8].mxu1 %vm276_vm2, %v1143_v17 }
 0x115   : > { %1242 = vmatpush3.bf16.msra.mxu0 %v688_v21  ;;  %1249 = vmatprep.mubr.msk.bf16.mxu1 %vm1363_vm0, %v1362_v18 }
 0x116   : > { %v736_v24 = vpop.permute.xlu0 %735  ;;  %1253 = vmatprep.subr.bf16.mxu0 %v1362_v18 }
 0x117   : > { %v738_v25 = vsel %vm737_vm14, %v734_v22, %v736_v24 }
 0x118   : > { %v743_v26 = vsel %vm280_vm1, %v738_v25, 0  ;;  %1244 = vmatmul.mubr.msk.bf16.vlgmr.msra.gmra.mrb[12].mxu0 %vm276_vm2, %v1145_v23  ;;  %v805_v28 = vpop.permute.xlu1 %804  ;;  %v1310_v25 = vld [vmem:[%s1593_s4 + $0x8] sm:$0xff]  }
 0x119   : > { %1248 = vmatpush3.bf16.msra.mxu1 %v743_v26  ;;  %1255 = vmatprep.mubr.msk.bf16.mxu0 %vm1363_vm0, %v1362_v18 }
 0x11a   : > { %v807_v29 = vpop.permute.xlu0 %806 }
 0x11b   : > { %v809_v30 = vsel %vm808_vm15, %v805_v28, %v807_v29 }
 0x11c   : > { %v814_v31 = vsel %vm280_vm1, %v809_v30, 0  ;;  %1250 = vmatmul.mubr.msk.bf16.vlgmr.msra.gmra.mrb[12].mxu1 %vm276_vm2, %v1147_v27 }
 0x11d   : > { %1254 = vmatpush3.bf16.msra.mxu0 %v814_v31  ;;  %1261 = vmatprep.mubr.msk.bf16.mxu1 %vm276_vm2, %v1309_v41 }
 0x120   : > { %1256 = vmatmul.mubr.msk.bf16.vlgmr.msra.gmra.mrb[16].mxu0 %vm276_vm2, %v1149_v32 }
 0x129   : > { %v861_v13 = vpop.permute.xlu1 %860 }
 0x12b   : > { %v883_v27 = vpop.permute.xlu0 %882 }
 0x12d   : > { %v888_v26 = vpop.permute.xlu1 %887 }
 0x131   : > { %v893_v28 = vpop.permute.xlu1 %892 }
 0x16b   : > { %v318_v37 = vpop.f32.mrb[0].mxu0 }
 0x16c   : > { %v1209_v18 = vpop.f32.mrb[1].mxu0  ;;  %v365_v38 = vadd.f32 %v364_v33, %v318_v37  ;;  %v898_v33 = vpop.permute.xlu0 %897 }
 0x16d   : > { %v321_v39 = vpop.f32.mrb[2].mxu0 }
 0x16e   : > { %v1210_v40 = vpop.f32.mrb[3].mxu0 }
 0x1db   : > { %v448_v44 = vpop.f32.mrb[4].mxu0 }
 0x1dc   : > { %v454_v45 = vadd.f32 %v448_v44, %v365_v38  ;;  %v1221_v46 = vpop.f32.mrb[5].mxu0 }
 0x1dd   : > { %v451_v47 = vpop.f32.mrb[6].mxu0 }
 0x1de   : > { %v1222_v48 = vpop.f32.mrb[7].mxu0 }
 0x1df   : > { %v527_v49 = vpop.f32.mrb[4].mxu1 }
 0x1e0   : > { %v533_v50 = vadd.f32 %v527_v49, %v454_v45  ;;  %v1227_v51 = vpop.f32.mrb[5].mxu1 }
 0x1e1   : > { %v530_v52 = vpop.f32.mrb[6].mxu1 }
 0x1e2   : > { %v1228_v53 = vpop.f32.mrb[7].mxu1 }
 0x1e3   : > { %v582_v54 = vpop.f32.mrb[8].mxu0 }
 0x1e4   : > { %v588_v55 = vadd.f32 %v582_v54, %v533_v50  ;;  %v1233_v56 = vpop.f32.mrb[9].mxu0 }
 0x1e5   : > { %v585_v57 = vpop.f32.mrb[10].mxu0 }
 0x1e6   : > { %v1234_v58 = vpop.f32.mrb[11].mxu0 }
 0x1e7   : > { %v653_v59 = vpop.f32.mrb[8].mxu1 }
 0x1e8   : > { %v659_v60 = vadd.f32 %v653_v59, %v588_v55  ;;  %v1239_v61 = vpop.f32.mrb[9].mxu1 }
 0x1e9   : > { %v656_v62 = vpop.f32.mrb[10].mxu1 }
 0x1ea   : > { %v1240_v63 = vpop.f32.mrb[11].mxu1 }
 0x1eb   : > { %v724_v0 = vpop.f32.mrb[12].mxu0 }
 0x1ec   : > { %v730_v1 = vadd.f32 %v724_v0, %v659_v60  ;;  %v1245_v2 = vpop.f32.mrb[13].mxu0 }
 0x1ed   : > { %v727_v3 = vpop.f32.mrb[14].mxu0 }
 0x1ee   : > { %v1246_v4 = vpop.f32.mrb[15].mxu0 }
 0x1ef   : > { %v779_v5 = vpop.f32.mrb[12].mxu1 }
 0x1f0   : > { %v785_v6 = vadd.f32 %v779_v5, %v730_v1  ;;  %v1251_v7 = vpop.f32.mrb[13].mxu1 }
 0x1f1   : > { %v782_v8 = vpop.f32.mrb[14].mxu1 }
 0x1f2   : > { %v1252_v9 = vpop.f32.mrb[15].mxu1 }
 0x1f3   : > { %v850_v10 = vpop.f32.mrb[16].mxu0 }
 0x1f4   : > { %v856_v11 = vadd.f32 %v850_v10, %v785_v6  ;;  %v1257_v12 = vpop.f32.mrb[17].mxu0 }
 0x1f5   : > { %v853_v14 = vpop.f32.mrb[18].mxu0 }
 0x1f6   : > { %v863_v15 = vadd.f32 %v861_v13, %v856_v11  ;;  %v1258_v16 = vpop.f32.mrb[19].mxu0 }
 0x1f8   : > { %v1151_v17 = vmul.f32 -1.442695, %v863_v15 }
 0x1fa   : > { %1311 = vpow2.f32 %v1151_v17 }
 0x204   : > { %v1312_v19 = vpop.eup %1311 }
 0x205   : > { %v867_v20 = vadd.f32 1.0, %v1312_v19 }
 0x207   : > { %1313 = vrcp.f32 %v867_v20 }
 0x211   : > { %v1314_v21 = vpop.eup %1313 }
 0x212   : > { %v870_v22 = vmul.f32 %v1314_v21, %v863_v15 }
 0x214   : > { %v871_v23 = vpack.c.bf16 %v870_v22, %v870_v22 }
 0x216   : > { %1265 = vmatprep.subr.msk.bf16.mxu1 %vm280_vm1, %v871_v23  ;;  %v917_v24 = vsel %vm280_vm1, %v871_v23, 0 }
 0x217   : > { %1260 = vmatpush3.bf16.msra.mxu1 %v917_v24 }
 0x21a   : > { %1262 = vmatmul.mubr.msk.bf16.vlgmr.msra.gmra.mrb[16].mxu1 %vm276_vm2, %v1310_v25 }
 0x2ed   : > { %v1263_v29 = vpop.f32.mrb[16].mxu1 }
 0x2ee   : > { %v962_v30 = vadd.f32 %v1263_v29, %v893_v28  ;;  %v953_v31 = vpop.f32.mrb[17].mxu1 }
 0x2ef   : > { %v954_v32 = vadd.f32 %v953_v31, %v883_v27  ;;  %v1264_v34 = vpop.f32.mrb[18].mxu1 }
 0x2f0   : > { %v1158_v35 = vmul.f32 -1.442695, %v962_v30  ;;  %v965_v36 = vadd.f32 %v1264_v34, %v898_v33  ;;  %v956_v37 = vpop.f32.mrb[19].mxu1 }
 0x2f1   : > { %v1156_v18 = vmul.f32 -1.442695, %v954_v32  ;;  %v957_v38 = vadd.f32 %v956_v37, %v888_v26 }
 0x2f2   : > { %1315 = vpow2.f32 %v1158_v35  ;;  %v1159_v39 = vmul.f32 -1.442695, %v965_v36 }
 0x2f3   : > { %1317 = vpow2.f32 %v1156_v18  ;;  %v1157_v40 = vmul.f32 -1.442695, %v957_v38 }
 0x2f4   : > { %1319 = vpow2.f32 %v1159_v39 }
 0x2f5   : > { %1321 = vpow2.f32 %v1157_v40 }
 0x2fc   : > { %v1316_v41 = vpop.eup %1315 }
 0x2fd   : > { %v1318_v42 = vpop.eup %1317  ;;  %v982_v43 = vadd.f32 1.0, %v1316_v41 }
 0x2fe   : > { %v1320_v44 = vpop.eup %1319  ;;  %v980_v45 = vadd.f32 1.0, %v1318_v42 }
 0x2ff   : > { %v1322_v46 = vpop.eup %1321  ;;  %1323 = vrcp.f32 %v982_v43  ;;  %v983_v47 = vadd.f32 1.0, %v1320_v44 }
 0x300   : > { %1325 = vrcp.f32 %v980_v45  ;;  %v981_v48 = vadd.f32 1.0, %v1322_v46 }
 0x301   : > { %1327 = vrcp.f32 %v983_v47 }
 0x302   : > { %1329 = vrcp.f32 %v981_v48 }
 0x309   : > { %v1324_v49 = vpop.eup %1323 }
 0x30a   : > { %v1326_v50 = vpop.eup %1325  ;;  %v994_v53 = vmul.f32 %v1324_v49, %v962_v30 }
 0x30b   : > { %v1328_v51 = vpop.eup %1327  ;;  %v992_v55 = vmul.f32 %v1326_v50, %v954_v32  ;;  %1022 = sbr.rel (!%p1432_p4) target bundleno = 795 (0x31b), region = 48 }
 0x30c   : > { %v1330_v52 = vpop.eup %1329  ;;  %v995_v54 = vmul.f32 %v1328_v51, %v965_v36 }
 0x30d   : > { %v993_v56 = vmul.f32 %v1330_v52, %v957_v38 }
 0x30e   : > { %v1181_v57 = vpack.c.bf16 %v995_v54, %v994_v53 }
 0x30f   : > { %v1176_v58 = vpack.c.bf16 %v993_v56, %v992_v55 }
 0x310   : > { %1183 = vst [vmem:[%s240_s30 + $0x8] sm:$0xff] %v1181_v57  }
 0x311   : > { %1177 = vst [vmem:[%s240_s30] sm:$0xff] %v1176_v58  }
 0x317   : > { %v1044_v61 = vld [vmem:[%s240_s30 + $0x8] sm:$0xf]  ;;  %v1046_v62 = vld [vmem:[%s240_s30 + $0xc] sm:$0xf] }
 0x318   : > { %v1040_v59 = vld [vmem:[%s240_s30] sm:$0xf]  ;;  %v1042_v60 = vld [vmem:[%s240_s30 + $0x4] sm:$0xf]  ;;  %1045 = vst [vmem:[%s1024_s9 + $0x20] sm:$0xf] %v1044_v61 }
 0x319   : > { %1041 = vst [vmem:[%s1024_s9] sm:$0xf] %v1040_v59  ;;  %1043 = vst [vmem:[%s1024_s9 + $0x10] sm:$0xf] %v1042_v60 }
 0x31a   : > { %1047 = vst [vmem:[%s1024_s9 + $0x30] sm:$0xf] %v1046_v62 }
 0x31b PF: > { %p13_p8 = scmp.ge.s32.totalorder %s1422_s25, 6   ;;  %s1597_s21 = smov %s1349_s22 }
 0x31c   : > { %s1598_s22 = smov %s1430_s28  ;;  %s1599_s23 = smov %s1422_s25 }
 0x31d   :  { %15 = sbr.rel (!%p13_p8) target bundleno = 2 (0x2), region = 123 }

// kernel: mobilevit_block.4
= control target key start
LH: loop header
LB: loop body
LE: loop exit
PB: predicated region body
PF: predicated region fallthrough
CT: control target
= control target key end

     0   :  { %s4103_s18 = smov 0   ;;  %s5194_s0 = inlined_call_operand.vmem [shape: bf16[8,64,32], index: 0, kind: input, shape index: {}]   ;;  %s5195_s1 = inlined_call_operand.vmem [shape: f32[2,1,32], index: 1, kind: input, shape index: {}]   ;;  %s5196_s2 = inlined_call_operand.vmem [shape: f32[2,1,32], index: 2, kind: input, shape index: {}]   ;;  %s5197_s3 = inlined_call_operand.vmem [shape: bf16[2,32,32], index: 3, kind: input, shape index: {}]   ;;  %s5198_s4 = inlined_call_operand.vmem [shape: bf16[2,32,32], index: 4, kind: input, shape index: {}]   ;;  %s5199_s5 = inlined_call_operand.vmem [shape: bf16[2,32,32], index: 5, kind: input, shape index: {}]   ;;  %s5200_s6 = inlined_call_operand.vmem [shape: bf16[2,32,32], index: 6, kind: input, shape index: {}]   ;;  %s5201_s7 = inlined_call_operand.vmem [shape: f32[2,1,32], index: 7, kind: input, shape index: {}]   ;;  %s5202_s8 = inlined_call_operand.vmem [shape: f32[2,1,32], index: 8, kind: input, shape index: {}]   ;;  %s5203_s9 = inlined_call_operand.vmem [shape: bf16[2,32,64], index: 9, kind: input, shape index: {}]   ;;  %s5204_s10 = inlined_call_operand.vmem [shape: f32[2,1,64], index: 10, kind: input, shape index: {}]   ;;  %s5205_s11 = inlined_call_operand.vmem [shape: bf16[2,64,32], index: 11, kind: input, shape index: {}]   ;;  %s5206_s12 = inlined_call_operand.vmem [shape: f32[2,1,32], index: 12, kind: input, shape index: {}]   ;;  %s5207_s13 = inlined_call_operand.vmem [shape: bf16[32,4], index: 13, kind: input, shape index: {}]   ;;  %s5208_s14 = inlined_call_operand.vmem [shape: f32[1,4], index: 14, kind: input, shape index: {}]   ;;  %s5209_s15 = inlined_call_operand.vmem [shape: bf16[8,64,4], index: 15, kind: output, shape index: {}]  }
   0x1 LB: > { %s2988_s19 = sadd.s32 4294967295, %s3953_s18   ;;  %p2992_p0 = scmp.ge.s32.totalorder %s3953_s18, 1  ;;  %s3953_s18 = sphi %s4103_s18, %s25_s18  }
   0x2   : > { %p439_p1 = scmp.lt.s32.totalorder %s3953_s18, 5 }
   0x4   : > { %p440_p2 = pnand %p2992_p0, %p439_p1 }
   0x5   : > { %s2993_s20 = sshll.u32 (!%p440_p2), %s2988_s19, 1  ;;  %s4151_s28 = smov (!%p440_p2), 0  }
   0x6   : > { %443 = sbr.rel (%p440_p2) target bundleno = 2619 (0xa3b), region = 80  ;;  %p490_p3 = scmp.lt.s32.totalorder (!%p440_p2), %s2993_s20, 7 }
   0xd   : > { %s5236_s20 = smov (!%p490_p3, %s2993_s20), 7 }
   0xe   : > { %s3136_s21 = sshll.u32 %s5236_s20, 5 }
   0xf   : > { %s494_s24 = scalar_lea.vmem %s5194_s0, %s3136_s21  ;;  %s4117_s27 = scalar_lea.vmem %s5209_s15, %s3136_s21 }
  0x10   : > { %v3161_v0 = vld [vmem:[%s494_s24] sm:$0xff]   ;;  %v3192_v1 = vld [vmem:[%s494_s24 + $0x8] sm:$0xff]   ;;  %v3193_v2 = vld [vmem:[%s494_s24 + $0x10] sm:$0xff]  }
  0x11   : > { %v3162_v3 = vunpack.c.l.bf16 %v3161_v0   ;;  %v3163_v4 = vunpack.c.h.bf16 %v3161_v0   ;;  %v3166_v5 = vunpack.c.l.bf16 %v3192_v1   ;;  %v3167_v6 = vunpack.c.h.bf16 %v3192_v1   ;;  %v3194_v7 = vld [vmem:[%s494_s24 + $0x18] sm:$0xff]   ;;  %v3195_v8 = vld [vmem:[%s494_s24 + $0x20] sm:$0xff]   ;;  %v3196_v9 = vld [vmem:[%s494_s24 + $0x28] sm:$0xff]  }
  0x12   : > { %v3170_v10 = vunpack.c.l.bf16 %v3193_v2   ;;  %v3171_v11 = vunpack.c.h.bf16 %v3193_v2   ;;  %v3174_v12 = vunpack.c.l.bf16 %v3194_v7   ;;  %v3175_v13 = vunpack.c.h.bf16 %v3194_v7   ;;  %v3197_v14 = vld [vmem:[%s494_s24 + $0x30] sm:$0xff]   ;;  %v3198_v15 = vld [vmem:[%s494_s24 + $0x38] sm:$0xff]  }
  0x13   : > { %v3178_v16 = vunpack.c.l.bf16 %v3195_v8   ;;  %v3179_v17 = vunpack.c.h.bf16 %v3195_v8   ;;  %v3182_v18 = vunpack.c.l.bf16 %v3196_v9   ;;  %v3183_v19 = vunpack.c.h.bf16 %v3196_v9  }
  0x14   : > { %v3186_v20 = vunpack.c.l.bf16 %v3197_v14   ;;  %v3187_v21 = vunpack.c.h.bf16 %v3197_v14   ;;  %v3190_v22 = vunpack.c.l.bf16 %v3198_v15   ;;  %v3191_v23 = vunpack.c.h.bf16 %v3198_v15  }
  0x15 LB: >> { %vm562_vm0 = vcmask 261120   ;;  %s4333_s29 = sshll.u32 %s4021_s28, 4  ;;  %s558_s30 = scalar_lea.vmem %s5195_s1, %s4021_s28  ;;  %vm1396_vm1 = vcmask 523264   ;;  %s4021_s28 = sphi %s4151_s28, %s541_s28   ;;  %v4017_v3 = vphi %v3162_v3, %v5234_v3   ;;  %v4013_v4 = vphi %v3163_v4, %v5233_v4   ;;  %v4009_v5 = vphi %v3166_v5, %v5232_v5   ;;  %v4005_v6 = vphi %v3167_v6, %v5231_v6   ;;  %v4001_v10 = vphi %v3170_v10, %v5230_v10   ;;  %v3997_v11 = vphi %v3171_v11, %v5229_v11   ;;  %v3993_v12 = vphi %v3174_v12, %v5228_v12   ;;  %v3989_v13 = vphi %v3175_v13, %v5227_v13   ;;  %v3985_v16 = vphi %v3178_v16, %v5226_v16   ;;  %v3981_v17 = vphi %v3179_v17, %v5225_v17   ;;  %v3977_v18 = vphi %v3182_v18, %v5224_v18   ;;  %v3973_v19 = vphi %v3183_v19, %v5223_v19   ;;  %v3969_v20 = vphi %v3186_v20, %v5222_v20   ;;  %v3965_v21 = vphi %v3187_v21, %v5221_v21   ;;  %v3961_v22 = vphi %v3190_v22, %v5220_v22   ;;  %v3957_v23 = vphi %v3191_v23, %v5219_v23  }
  0x16   : >> { %v587_v24 = vsel %vm562_vm0, %v3985_v16, 0.0  ;;  %v593_v25 = vsel %vm562_vm0, %v3977_v18, 0.0  ;;  %v590_v26 = vsel %vm562_vm0, %v3981_v17, 0.0  ;;  %v596_v27 = vsel %vm562_vm0, %v3973_v19, 0.0  ;;  %s826_s17 = scalar_lea.vmem %s5197_s3, %s4333_s29  ;;  %s4343_s21 = scalar_lea.vmem %s5198_s4, %s4333_s29 }
  0x17   : >> { %588 = vadd.xlane.f32.xlu0 %v587_v24  ;;  %594 = vadd.xlane.f32.xlu1 %v593_v25  ;;  %v599_v28 = vsel %vm562_vm0, %v3969_v20, 0.0  ;;  %v602_v29 = vsel %vm562_vm0, %v3965_v21, 0.0  ;;  %v605_v30 = vsel %vm562_vm0, %v3961_v22, 0.0  ;;  %v608_v31 = vsel %vm562_vm0, %v3957_v23, 0.0  ;;  %s4353_s24 = scalar_lea.vmem %s5199_s5, %s4333_s29  ;;  %s560_s19 = scalar_lea.vmem %s5196_s2, %s4021_s28 }
  0x18   : >> { %v563_v32 = vsel %vm562_vm0, %v4017_v3, 0.0  ;;  %v566_v33 = vsel %vm562_vm0, %v4013_v4, 0.0  ;;  %v569_v34 = vsel %vm562_vm0, %v4009_v5, 0.0  ;;  %v572_v35 = vsel %vm562_vm0, %v4005_v6, 0.0  ;;  %s1744_s22 = scalar_lea.vmem %s5200_s6, %s4333_s29  ;;  %s2163_s25 = scalar_lea.vmem %s5203_s9, %s4333_s29 }
  0x19   : >> { %v575_v36 = vsel %vm562_vm0, %v4001_v10, 0.0  ;;  %v578_v37 = vsel %vm562_vm0, %v3997_v11, 0.0  ;;  %v581_v38 = vsel %vm562_vm0, %v3993_v12, 0.0  ;;  %v584_v39 = vsel %vm562_vm0, %v3989_v13, 0.0  ;;  %s3143_s20 = sshll.u32 %s4021_s28, 5  ;;  %s2168_s29 = scalar_lea.vmem %s5204_s10, %s4021_s28 }
  0x1a   : >> { %s2431_s23 = scalar_lea.vmem %s5205_s11, %s3143_s20  ;;  %s2601_s16 = scalar_lea.vmem %s5206_s12, %s4021_s28 }
  0x1b   : >> { %591 = vadd.xlane.f32.xlu0 %v590_v26  ;;  %597 = vadd.xlane.f32.xlu1 %v596_v27 }
  0x1f   : >> { %600 = vadd.xlane.f32.xlu0 %v599_v28  ;;  %603 = vadd.xlane.f32.xlu1 %v602_v29 }
  0x23   : >> { %606 = vadd.xlane.f32.xlu0 %v605_v30  ;;  %609 = vadd.xlane.f32.xlu1 %v608_v31 }
  0x27   : >> { %564 = vadd.xlane.f32.xlu0 %v563_v32  ;;  %567 = vadd.xlane.f32.xlu1 %v566_v33 }
  0x2b   : >> { %570 = vadd.xlane.f32.xlu0 %v569_v34  ;;  %573 = vadd.xlane.f32.xlu1 %v572_v35 }
  0x2f   : >> { %576 = vadd.xlane.f32.xlu0 %v575_v36  ;;  %579 = vadd.xlane.f32.xlu1 %v578_v37 }
  0x33   : >> { %582 = vadd.xlane.f32.xlu0 %v581_v38  ;;  %585 = vadd.xlane.f32.xlu1 %v584_v39 }
  0xa4   : >> { %v589_v40 = vpop.xlane.xlu0 %588  ;;  %v595_v41 = vpop.xlane.xlu1 %594 }
  0xa5   : >> { %v620_v42 = vmul.f32 0.03125, %v589_v40  ;;  %v622_v43 = vmul.f32 0.03125, %v595_v41 }
  0xa7   : >> { %v4237_v44 = vsub.f32 %v3985_v16, %v620_v42  ;;  %v4240_v45 = vsub.f32 %v3977_v18, %v622_v43 }
  0xa8   : >> { %v592_v46 = vpop.xlane.xlu0 %591  ;;  %v598_v47 = vpop.xlane.xlu1 %597 }
  0xa9   : >> { %v621_v48 = vmul.f32 0.03125, %v592_v46  ;;  %v623_v49 = vmul.f32 0.03125, %v598_v47  ;;  %v652_v50 = vmul.f32 %v4237_v44, %v4237_v44  ;;  %v654_v51 = vmul.f32 %v4240_v45, %v4240_v45 }
  0xab   : >> { %v4247_v52 = vsub.f32 %v3981_v17, %v621_v48  ;;  %v4250_v53 = vsub.f32 %v3973_v19, %v623_v49  ;;  %v684_v54 = vsel %vm562_vm0, %v652_v50, 0.0  ;;  %v690_v57 = vsel %vm562_vm0, %v654_v51, 0.0 }
  0xac   : >> { %v601_v55 = vpop.xlane.xlu0 %600  ;;  %685 = vadd.xlane.f32.xlu0 %v684_v54  ;;  %v604_v56 = vpop.xlane.xlu1 %603 }
  0xad   : >> { %v624_v58 = vmul.f32 0.03125, %v601_v55  ;;  %v625_v59 = vmul.f32 0.03125, %v604_v56  ;;  %v653_v60 = vmul.f32 %v4247_v52, %v4247_v52  ;;  %v655_v61 = vmul.f32 %v4250_v53, %v4250_v53 }
  0xaf   : >> { %v4259_v62 = vsub.f32 %v3969_v20, %v624_v58  ;;  %v4262_v63 = vsub.f32 %v3965_v21, %v625_v59  ;;  %v687_v0 = vsel %vm562_vm0, %v653_v60, 0.0  ;;  %v693_v2 = vsel %vm562_vm0, %v655_v61, 0.0 }
  0xb0   : >> { %691 = vadd.xlane.f32.xlu0 %v690_v57  ;;  %v607_v1 = vpop.xlane.xlu0 %606  ;;  %688 = vadd.xlane.f32.xlu1 %v687_v0  ;;  %v610_v7 = vpop.xlane.xlu1 %609 }
  0xb1   : >> { %v626_v8 = vmul.f32 0.03125, %v607_v1  ;;  %v656_v9 = vmul.f32 %v4259_v62, %v4259_v62  ;;  %v627_v14 = vmul.f32 0.03125, %v610_v7  ;;  %v657_v15 = vmul.f32 %v4262_v63, %v4262_v63 }
  0xb3   : >> { %v4271_v24 = vsub.f32 %v3961_v22, %v626_v8  ;;  %v696_v25 = vsel %vm562_vm0, %v656_v9, 0.0  ;;  %v4275_v26 = vsub.f32 %v3957_v23, %v627_v14  ;;  %v699_v28 = vsel %vm562_vm0, %v657_v15, 0.0 }
  0xb4   : >> { %697 = vadd.xlane.f32.xlu0 %v696_v25  ;;  %v565_v27 = vpop.xlane.xlu0 %564  ;;  %694 = vadd.xlane.f32.xlu1 %v693_v2  ;;  %v568_v29 = vpop.xlane.xlu1 %567 }
  0xb5   : >> { %v612_v30 = vmul.f32 0.03125, %v565_v27  ;;  %v658_v31 = vmul.f32 %v4271_v24, %v4271_v24  ;;  %v613_v32 = vmul.f32 0.03125, %v568_v29  ;;  %v659_v33 = vmul.f32 %v4275_v26, %v4275_v26 }
  0xb7   : >> { %v4283_v34 = vsub.f32 %v4017_v3, %v612_v30  ;;  %v702_v35 = vsel %vm562_vm0, %v658_v31, 0.0  ;;  %v4287_v36 = vsub.f32 %v4013_v4, %v613_v32  ;;  %v705_v38 = vsel %vm562_vm0, %v659_v33, 0.0  ;;  %v3671_v32 = vld [vmem:[%s826_s17] sm:$0xff]   ;;  %v3672_v33 = vld [vmem:[%s826_s17 + $0x8] sm:$0xff]  }
  0xb8   : >> { %703 = vadd.xlane.f32.xlu0 %v702_v35  ;;  %v571_v37 = vpop.xlane.xlu0 %570  ;;  %700 = vadd.xlane.f32.xlu1 %v699_v28  ;;  %v574_v39 = vpop.xlane.xlu1 %573  ;;  %v4346_v35 = vld [vmem:[%s4343_s21] sm:$0xff]  }
  0xb9   : >> { %v614_v40 = vmul.f32 0.03125, %v571_v37  ;;  %v644_v41 = vmul.f32 %v4283_v34, %v4283_v34  ;;  %v615_v42 = vmul.f32 0.03125, %v574_v39  ;;  %v645_v43 = vmul.f32 %v4287_v36, %v4287_v36  ;;  %3511 = vmatprep.subr.bf16.mxu1 %v3671_v32  ;;  %3303 = vmatprep.subr.bf16.mxu0 %v3671_v32  ;;  %v4356_v37 = vld [vmem:[%s4353_s24] sm:$0xff]  }
  0xba   : >> { %3513 = vmatpush3.bf16.msra.mxu1 %v3671_v32  ;;  %3304 = vmatpush3.bf16.msra.mxu0 %v3671_v32 }
  0xbb   : >> { %v4295_v46 = vsub.f32 %v4009_v5, %v614_v40  ;;  %v660_v47 = vsel %vm562_vm0, %v644_v41, 0.0  ;;  %v4299_v48 = vsub.f32 %v4005_v6, %v615_v42  ;;  %v663_v50 = vsel %vm562_vm0, %v645_v43, 0.0  ;;  %3512 = vmatprep.subr.bf16.mxu1 %v3672_v33  ;;  %3305 = vmatprep.subr.bf16.mxu0 %v3672_v33 }
  0xbc   : >> { %661 = vadd.xlane.f32.xlu0 %v660_v47  ;;  %v577_v49 = vpop.xlane.xlu0 %576  ;;  %706 = vadd.xlane.f32.xlu1 %v705_v38  ;;  %v580_v51 = vpop.xlane.xlu1 %579 }
  0xbd   : >> { %v616_v54 = vmul.f32 0.03125, %v577_v49  ;;  %v646_v55 = vmul.f32 %v4295_v46, %v4295_v46  ;;  %v617_v56 = vmul.f32 0.03125, %v580_v51  ;;  %v647_v57 = vmul.f32 %v4299_v48, %v4299_v48 }
  0xbe   : >> { %3514 = vmatpush3.bf16.msra.mxu1 %v3672_v33  ;;  %3306 = vmatpush3.bf16.msra.mxu0 %v3672_v33 }
  0xbf   : >> { %v4307_v58 = vsub.f32 %v4001_v10, %v616_v54  ;;  %v666_v59 = vsel %vm562_vm0, %v646_v55, 0.0  ;;  %v4311_v60 = vsub.f32 %v3997_v11, %v617_v56  ;;  %v669_v0 = vsel %vm562_vm0, %v647_v57, 0.0  ;;  %3323 = vmatprep.subr.bf16.mxu1 %v4346_v35  ;;  %3343 = vmatprep.subr.bf16.mxu0 %v4356_v37 }
  0xc0   : >> { %667 = vadd.xlane.f32.xlu0 %v666_v59  ;;  %v583_v61 = vpop.xlane.xlu0 %582  ;;  %664 = vadd.xlane.f32.xlu1 %v663_v50  ;;  %v586_v1 = vpop.xlane.xlu1 %585 }
  0xc1   : >> { %v618_v2 = vmul.f32 0.03125, %v583_v61  ;;  %v648_v7 = vmul.f32 %v4307_v58, %v4307_v58  ;;  %v619_v8 = vmul.f32 0.03125, %v586_v1  ;;  %v649_v9 = vmul.f32 %v4311_v60, %v4311_v60 }
  0xc3   : >> { %v4319_v14 = vsub.f32 %v3993_v12, %v618_v2  ;;  %v672_v15 = vsel %vm562_vm0, %v648_v7, 0.0  ;;  %v4323_v25 = vsub.f32 %v3989_v13, %v619_v8  ;;  %v675_v28 = vsel %vm562_vm0, %v649_v9, 0.0 }
  0xc4   : >> { %673 = vadd.xlane.f32.xlu0 %v672_v15  ;;  %670 = vadd.xlane.f32.xlu1 %v669_v0 }
  0xc5   : >> { %v650_v27 = vmul.f32 %v4319_v14, %v4319_v14  ;;  %v651_v29 = vmul.f32 %v4323_v25, %v4323_v25 }
  0xc7   : >> { %v678_v30 = vsel %vm562_vm0, %v650_v27, 0.0  ;;  %v681_v31 = vsel %vm562_vm0, %v651_v29, 0.0 }
  0xc8   : >> { %679 = vadd.xlane.f32.xlu0 %v678_v30  ;;  %676 = vadd.xlane.f32.xlu1 %v675_v28 }
  0xcc   : >> { %682 = vadd.xlane.f32.xlu1 %v681_v31 }
 0x139   : >> { %v686_v38 = vpop.xlane.xlu0 %685 }
 0x13a   : >> { %v716_v39 = vmul.f32 0.03125, %v686_v38  ;;  %v4364_v38 = vld [vmem:[%s558_s30] ss:$0 sm:$0xff]  ;;  %s1898_s30 = scalar_lea.vmem %s5201_s7, %s4021_s28 }
 0x13c   : >> { %v732_v40 = vadd.f32 1e-05, %v716_v39 }
 0x13d   : >> { %v692_v41 = vpop.xlane.xlu0 %691  ;;  %v689_v42 = vpop.xlane.xlu1 %688 }
 0x13e   : >> { %3685 = vrsqrt.f32 %v732_v40  ;;  %v718_v43 = vmul.f32 0.03125, %v692_v41  ;;  %v717_v47 = vmul.f32 0.03125, %v689_v42 }
 0x140   : >> { %v734_v49 = vadd.f32 1e-05, %v718_v43  ;;  %v733_v50 = vadd.f32 1e-05, %v717_v47 }
 0x141   : >> { %v698_v51 = vpop.xlane.xlu0 %697  ;;  %v695_v54 = vpop.xlane.xlu1 %694 }
 0x142   : >> { %3687 = vrsqrt.f32 %v734_v49  ;;  %v720_v55 = vmul.f32 0.03125, %v698_v51  ;;  %v719_v56 = vmul.f32 0.03125, %v695_v54 }
 0x143   : >> { %3689 = vrsqrt.f32 %v733_v50 }
 0x144   : >> { %v736_v57 = vadd.f32 1e-05, %v720_v55  ;;  %v735_v59 = vadd.f32 1e-05, %v719_v56  ;;  %v4373_v55 = vld [vmem:[%s560_s19] ss:$0 sm:$0xff]  ;;  %s1900_s19 = scalar_lea.vmem %s5202_s8, %s4021_s28 }
 0x145   : >> { %v704_v61 = vpop.xlane.xlu0 %703  ;;  %v701_v0 = vpop.xlane.xlu1 %700  ;;  %s541_s28 = sadd.s32 1, %s4021_s28  }
 0x146   : >> { %3691 = vrsqrt.f32 %v736_v57  ;;  %v722_v1 = vmul.f32 0.03125, %v704_v61  ;;  %v721_v2 = vmul.f32 0.03125, %v701_v0  ;;  %p5086_p4 = scmp.ge.s32.totalorder %s541_s28, 2  }
 0x147   : >> { %3693 = vrsqrt.f32 %v735_v59  ;;  %vm2842_vm2 = vcmask (%p5086_p4), 27648  }
 0x148   : >> { %v3686_v7 = vpop.eup %3685  ;;  %v738_v8 = vadd.f32 1e-05, %v722_v1  ;;  %v737_v9 = vadd.f32 1e-05, %v721_v2 }
 0x149   : >> { %v662_v15 = vpop.xlane.xlu0 %661  ;;  %v707_v27 = vpop.xlane.xlu1 %706  ;;  %v764_v30 = vmul.f32 %v3686_v7, %v4237_v44 }
 0x14a   : >> { %3695 = vrsqrt.f32 %v738_v8  ;;  %v708_v28 = vmul.f32 0.03125, %v662_v15  ;;  %v723_v29 = vmul.f32 0.03125, %v707_v27 }
 0x14b   : >> { %3697 = vrsqrt.f32 %v737_v9  ;;  %v786_v44 = vmul.f32 %v4364_v38, %v764_v30 }
 0x14c   : >> { %v3688_v31 = vpop.eup %3687  ;;  %v724_v32 = vadd.f32 1e-05, %v708_v28  ;;  %v739_v33 = vadd.f32 1e-05, %v723_v29 }
 0x14d   : >> { %v3690_v39 = vpop.eup %3689  ;;  %v668_v40 = vpop.xlane.xlu0 %667  ;;  %v766_v49 = vmul.f32 %v3688_v31, %v4240_v45  ;;  %v808_v2 = vadd.f32 %v4373_v55, %v786_v44 }
 0x14e   : >> { %v665_v41 = vpop.xlane.xlu1 %664  ;;  %3699 = vrsqrt.f32 %v724_v32  ;;  %v710_v42 = vmul.f32 0.03125, %v668_v40  ;;  %v765_v47 = vmul.f32 %v3690_v39, %v4247_v52 }
 0x14f   : >> { %v709_v43 = vmul.f32 0.03125, %v665_v41  ;;  %3701 = vrsqrt.f32 %v739_v33  ;;  %v788_v8 = vmul.f32 %v4364_v38, %v766_v49 }
 0x150   : >> { %v3692_v50 = vpop.eup %3691  ;;  %v726_v51 = vadd.f32 1e-05, %v710_v42  ;;  %v787_v56 = vmul.f32 %v4364_v38, %v765_v47 }
 0x151   : >> { %v725_v54 = vadd.f32 1e-05, %v709_v43  ;;  %v3694_v57 = vpop.eup %3693  ;;  %v768_v59 = vmul.f32 %v3692_v50, %v4259_v62  ;;  %v674_v61 = vpop.xlane.xlu0 %673  ;;  %v810_v41 = vadd.f32 %v4373_v55, %v788_v8 }
 0x152   : >> { %v671_v0 = vpop.xlane.xlu1 %670  ;;  %v767_v1 = vmul.f32 %v3694_v57, %v4250_v53  ;;  %3703 = vrsqrt.f32 %v726_v51  ;;  %v712_v52 = vmul.f32 0.03125, %v674_v61  ;;  %v809_v7 = vadd.f32 %v4373_v55, %v787_v56  ;;  %v3674_v56 = vld [vmem:[%s4343_s21 + $0x8] sm:$0xff]  }
 0x153   : >> { %v711_v45 = vmul.f32 0.03125, %v671_v0  ;;  %3705 = vrsqrt.f32 %v725_v54  ;;  %v790_v32 = vmul.f32 %v4364_v38, %v768_v59 }
 0x154   : >> { %v3696_v9 = vpop.eup %3695  ;;  %v728_v15 = vadd.f32 1e-05, %v712_v52  ;;  %v789_v28 = vmul.f32 %v4364_v38, %v767_v1  ;;  %v4383_v53 = vpack.c.bf16 %v809_v7, %v808_v2 }
 0x155   : >> { %v727_v27 = vadd.f32 1e-05, %v711_v45  ;;  %v3698_v62 = vpop.eup %3697  ;;  %v770_v29 = vmul.f32 %v3696_v9, %v4271_v24  ;;  %v680_v30 = vpop.xlane.xlu0 %679  ;;  %v812_v51 = vadd.f32 %v4373_v55, %v790_v32 }
 0x156   : >> { %v677_v31 = vpop.xlane.xlu1 %676  ;;  %v769_v33 = vmul.f32 %v3698_v62, %v4262_v63  ;;  %3707 = vrsqrt.f32 %v728_v15  ;;  %v714_v39 = vmul.f32 0.03125, %v680_v30  ;;  %3315 = vmatprep.mubr.msk.bf16.mxu1 %vm562_vm0, %v4383_v53  ;;  %v811_v24 = vadd.f32 %v4373_v55, %v789_v28 }
 0x157   : >> { %v713_v40 = vmul.f32 0.03125, %v677_v31  ;;  %3709 = vrsqrt.f32 %v727_v27  ;;  %v792_v54 = vmul.f32 %v4364_v38, %v770_v29 }
 0x158   : >> { %v3700_v42 = vpop.eup %3699  ;;  %v730_v43 = vadd.f32 1e-05, %v714_v39  ;;  %v791_v49 = vmul.f32 %v4364_v38, %v769_v33  ;;  %v4392_v50 = vpack.c.bf16 %v811_v24, %v810_v41 }
 0x159   : >> { %v729_v47 = vadd.f32 1e-05, %v713_v40  ;;  %v3702_v44 = vpop.eup %3701  ;;  %v756_v57 = vmul.f32 %v3700_v42, %v4283_v34 }
 0x15a   : >> { %v683_v63 = vpop.xlane.xlu1 %682  ;;  %v771_v59 = vmul.f32 %v3702_v44, %v4275_v26  ;;  %3711 = vrsqrt.f32 %v730_v43  ;;  %v813_v0 = vadd.f32 %v4373_v55, %v791_v49  ;;  %3316 = vmatmul.mubr.msk.bf16.vlgmr.msra.gmra.mrb[0].mxu1 %vm562_vm0, %v4392_v50  ;;  %v814_v26 = vadd.f32 %v4373_v55, %v792_v54  ;;  %v3676_v44 = vld [vmem:[%s4353_s24 + $0x8] sm:$0xff]  }
 0x15b   : >> { %v715_v61 = vmul.f32 0.03125, %v683_v63  ;;  %3713 = vrsqrt.f32 %v729_v47  ;;  %3324 = vmatpush3.bf16.msra.mxu1 %v4346_v35  ;;  %v778_v35 = vmul.f32 %v4364_v38, %v756_v57 }
 0x15c   : >> { %v3704_v1 = vpop.eup %3703  ;;  %v4403_v45 = vpack.c.bf16 %v813_v0, %v812_v51  ;;  %v793_v2 = vmul.f32 %v4364_v38, %v771_v59  ;;  %3325 = vmatprep.subr.bf16.mxu1 %v3674_v56 }
 0x15d   : >> { %v731_v52 = vadd.f32 1e-05, %v715_v61  ;;  %v3706_v7 = vpop.eup %3705  ;;  %v758_v34 = vmul.f32 %v3704_v1, %v4295_v46  ;;  %v800_v31 = vadd.f32 %v4373_v55, %v778_v35 }
 0x15e   : >> { %3319 = vmatprep.mubr.msk.bf16.mxu1 %vm562_vm0, %v4403_v45  ;;  %v815_v8 = vadd.f32 %v4373_v55, %v793_v2  ;;  %v757_v9 = vmul.f32 %v3706_v7, %v4287_v36 }
 0x15f   : >> { %3715 = vrsqrt.f32 %v731_v52  ;;  %3326 = vmatpush3.bf16.msra.mxu1 %v3674_v56  ;;  %v780_v46 = vmul.f32 %v4364_v38, %v758_v34 }
 0x160   : >> { %v3708_v15 = vpop.eup %3707  ;;  %v823_v27 = vpack.c.bf16 %v815_v8, %v814_v26  ;;  %v779_v28 = vmul.f32 %v4364_v38, %v757_v9 }
 0x161   : >> { %v3710_v62 = vpop.eup %3709  ;;  %v760_v29 = vmul.f32 %v3708_v15, %v4307_v58  ;;  %v802_v24 = vadd.f32 %v4373_v55, %v780_v46 }
 0x162   : >> { %v759_v30 = vmul.f32 %v3710_v62, %v4299_v48  ;;  %v801_v32 = vadd.f32 %v4373_v55, %v779_v28  ;;  %3320 = vmatmul.mubr.msk.bf16.gmra.mrb[4].mxu1 %vm562_vm0, %v823_v27 }
 0x163   : >> { %v782_v42 = vmul.f32 %v4364_v38, %v760_v29 }
 0x164   : >> { %v3712_v36 = vpop.eup %3711  ;;  %v816_v33 = vpack.c.bf16 %v801_v32, %v800_v31  ;;  %v781_v39 = vmul.f32 %v4364_v38, %v759_v30 }
 0x165   : >> { %v3714_v40 = vpop.eup %3713  ;;  %v762_v41 = vmul.f32 %v3712_v36, %v4319_v14 }
 0x166   : >> { %v761_v58 = vmul.f32 %v3714_v40, %v4311_v60  ;;  %3307 = vmatprep.mubr.msk.bf16.mxu0 %vm562_vm0, %v816_v33  ;;  %3327 = vmatprep.mubr.msk.bf16.mxu1 %vm562_vm0, %v816_v33  ;;  %v803_v48 = vadd.f32 %v4373_v55, %v781_v39  ;;  %v804_v60 = vadd.f32 %v4373_v55, %v782_v42 }
 0x167   : >> { %v784_v14 = vmul.f32 %v4364_v38, %v762_v41 }
 0x168   : >> { %v817_v47 = vpack.c.bf16 %v803_v48, %v802_v24  ;;  %v783_v49 = vmul.f32 %v4364_v38, %v761_v58 }
 0x169   : >> { %v3716_v43 = vpop.eup %3715  ;;  %v806_v57 = vadd.f32 %v4373_v55, %v784_v14 }
 0x16a   : >> { %v763_v63 = vmul.f32 %v3716_v43, %v4323_v25  ;;  %3308 = vmatmul.mubr.msk.bf16.vlgmr.msra.gmra.mrb[0].mxu0 %vm562_vm0, %v817_v47  ;;  %v805_v51 = vadd.f32 %v4373_v55, %v783_v49  ;;  %3328 = vmatmul.mubr.msk.bf16.vlgmr.msra.gmra.mrb[8].mxu1 %vm562_vm0, %v817_v47 }
 0x16b   : >> { %3344 = vmatpush3.bf16.msra.mxu0 %v4356_v37 }
 0x16c   : >> { %v785_v54 = vmul.f32 %v4364_v38, %v763_v63  ;;  %v818_v56 = vpack.c.bf16 %v805_v51, %v804_v60  ;;  %3345 = vmatprep.subr.bf16.mxu0 %v3676_v44 }
 0x16e   : >> { %v807_v25 = vadd.f32 %v4373_v55, %v785_v54  ;;  %3311 = vmatprep.mubr.msk.bf16.mxu0 %vm562_vm0, %v818_v56  ;;  %3331 = vmatprep.mubr.msk.bf16.mxu1 %vm562_vm0, %v818_v56 }
 0x16f   : >> { %3346 = vmatpush3.bf16.msra.mxu0 %v3676_v44 }
 0x170   : >> { %v819_v59 = vpack.c.bf16 %v807_v25, %v806_v57 }
 0x172   : >> { %3312 = vmatmul.mubr.msk.bf16.gmra.mrb[4].mxu0 %vm562_vm0, %v819_v59  ;;  %3332 = vmatmul.mubr.msk.bf16.gmra.mrb[12].mxu1 %vm562_vm0, %v819_v59 }
 0x173   : >> { %3347 = vmatprep.mubr.msk.bf16.mxu0 %vm562_vm0, %v816_v33  ;;  %3335 = vmatprep.mubr.msk.bf16.mxu1 %vm562_vm0, %v4383_v53 }
 0x17a   : >> { %3348 = vmatmul.mubr.msk.bf16.vlgmr.msra.gmra.mrb[8].mxu0 %vm562_vm0, %v817_v47  ;;  %3336 = vmatmul.mubr.msk.bf16.gmra.mrb[16].mxu1 %vm562_vm0, %v4392_v50 }
 0x17b   : >> { %3351 = vmatprep.mubr.msk.bf16.mxu0 %vm562_vm0, %v818_v56  ;;  %3339 = vmatprep.mubr.msk.bf16.mxu1 %vm562_vm0, %v4403_v45 }
 0x182   : >> { %3352 = vmatmul.mubr.msk.bf16.gmra.mrb[12].mxu0 %vm562_vm0, %v819_v59  ;;  %3340 = vmatmul.mubr.msk.bf16.gmra.mrb[20].mxu1 %vm562_vm0, %v823_v27 }
 0x183   : >> { %3355 = vmatprep.mubr.msk.bf16.mxu0 %vm562_vm0, %v4383_v53 }
 0x18a   : >> { %3356 = vmatmul.mubr.msk.bf16.gmra.mrb[16].mxu0 %vm562_vm0, %v4392_v50 }
 0x18b   : >> { %3359 = vmatprep.mubr.msk.bf16.mxu0 %vm562_vm0, %v4403_v45 }
 0x192   : >> { %3360 = vmatmul.mubr.msk.bf16.gmra.mrb[20].mxu0 %vm562_vm0, %v823_v27 }
 0x22d   : >> { %v4462_v37 = vpop.f32.mrb[0].mxu1 }
 0x22e   : >> { %v933_v38 = vpop.f32.mrb[1].mxu1 }
 0x22f   : >> { %v4464_v55 = vpop.f32.mrb[2].mxu1 }
 0x230   : >> { %v1199_v61 = vpack.c.bf16 %v4464_v55, %v4462_v37  ;;  %v936_v0 = vpop.f32.mrb[3].mxu1 }
 0x231   : >> { %v1198_v1 = vpack.c.bf16 %v936_v0, %v933_v38 }
 0x233   : >> { %3387 = vmatprep.mubr.msk.bf16.mxu0 %vm562_vm0, %v1198_v1 }
 0x235   : >> { %v4469_v53 = vpop.f32.mrb[4].mxu1 }
 0x236   : >> { %v4471_v50 = vpop.f32.mrb[5].mxu1 }
 0x237   : >> { %v4473_v52 = vpop.f32.mrb[6].mxu1 }
 0x238   : >> { %v1201_v45 = vpack.c.bf16 %v4473_v52, %v4469_v53  ;;  %v4477_v2 = vpop.f32.mrb[7].mxu1 }
 0x239   : >> { %v1200_v7 = vpack.c.bf16 %v4477_v2, %v4471_v50 }
 0x23d   : >> { %v4481_v34 = vpop.f32.mrb[0].mxu0  ;;  %v3329_v26 = vpop.f32.mrb[8].mxu1 }
 0x23e   : >> { %v901_v8 = vpop.f32.mrb[1].mxu0  ;;  %v1016_v9 = vpop.f32.mrb[9].mxu1 }
 0x23f   : >> { %v4483_v35 = vpop.f32.mrb[2].mxu0  ;;  %v3330_v27 = vpop.f32.mrb[10].mxu1 }
 0x240   : >> { %v1195_v15 = vpack.c.bf16 %v4483_v35, %v4481_v34  ;;  %v904_v28 = vpop.f32.mrb[3].mxu0  ;;  %v1203_v62 = vpack.c.bf16 %v3330_v27, %v3329_v26  ;;  %v1019_v29 = vpop.f32.mrb[11].mxu1 }
 0x241   : >> { %v1194_v46 = vpack.c.bf16 %v904_v28, %v901_v8  ;;  %v1202_v30 = vpack.c.bf16 %v1019_v29, %v1016_v9 }
 0x242   : >> { %v1234_v49 = vsel %vm562_vm0, %v1203_v62, 0 }
 0x243   : >> { %3371 = vmatprep.mubr.msk.bf16.mxu1 %vm562_vm0, %v1194_v46  ;;  %v1231_v31 = vsel %vm562_vm0, %v1202_v30, 0  ;;  %3519 = vmatprep.subr.msk.bf16.mxu1 %vm562_vm0, %v1202_v30 }
 0x244   : >> { %3364 = vmatpush3.bf16.xpose.msra.mxu1 %v1231_v31 }
 0x245   : >> { %v4490_v32 = vpop.f32.mrb[4].mxu0  ;;  %v3333_v36 = vpop.f32.mrb[12].mxu1  ;;  %3520 = vmatprep.subr.msk.bf16.mxu1 %vm562_vm0, %v1203_v62 }
 0x246   : >> { %v917_v33 = vpop.f32.mrb[5].mxu0  ;;  %v1032_v39 = vpop.f32.mrb[13].mxu1 }
 0x247   : >> { %v4493_v40 = vpop.f32.mrb[6].mxu0  ;;  %v3334_v24 = vpop.f32.mrb[14].mxu1 }
 0x248   : >> { %v1197_v41 = vpack.c.bf16 %v4493_v40, %v4490_v32  ;;  %v920_v58 = vpop.f32.mrb[7].mxu0  ;;  %v1205_v48 = vpack.c.bf16 %v3334_v24, %v3333_v36  ;;  %v1035_v43 = vpop.f32.mrb[15].mxu1 }
 0x249   : >> { %v1196_v42 = vpack.c.bf16 %v920_v58, %v917_v33  ;;  %v1204_v47 = vpack.c.bf16 %v1035_v43, %v1032_v39 }
 0x24a   : >> { %v1240_v24 = vsel %vm562_vm0, %v1205_v48, 0 }
 0x24b   : >> { %v1237_v1 = vsel %vm562_vm0, %v1204_v47, 0 }
 0x24c   : >> { %3366 = vmatpush3.bf16.xpose.msra.mxu1 %v1234_v49 }
 0x24d   : >> { %v3349_v44 = vpop.f32.mrb[8].mxu0  ;;  %v3337_v63 = vpop.f32.mrb[16].mxu1  ;;  %3521 = vmatprep.subr.msk.bf16.mxu1 %vm562_vm0, %v1204_v47 }
 0x24e   : >> { %v1131_v14 = vpop.f32.mrb[9].mxu0  ;;  %v1048_v60 = vpop.f32.mrb[17].mxu1 }
 0x24f   : >> { %v3350_v51 = vpop.f32.mrb[10].mxu0  ;;  %v3338_v54 = vpop.f32.mrb[18].mxu1 }
 0x250   : >> { %v1211_v56 = vpack.c.bf16 %v3350_v51, %v3349_v44  ;;  %v1134_v57 = vpop.f32.mrb[11].mxu0  ;;  %v1207_v25 = vpack.c.bf16 %v3338_v54, %v3337_v63  ;;  %v1051_v59 = vpop.f32.mrb[19].mxu1 }
 0x251   : >> { %v1210_v38 = vpack.c.bf16 %v1134_v57, %v1131_v14  ;;  %v1206_v0 = vpack.c.bf16 %v1051_v59, %v1048_v60 }
 0x252   : >> { %v1323_v58 = vsel %vm562_vm0, %v1207_v25, 0 }
 0x253   : >> { %v1320_v26 = vsel %vm562_vm0, %v1206_v0, 0  ;;  %3523 = vmatprep.subr.msk.bf16.mxu0 %vm562_vm0, %v1206_v0 }
 0x254   : >> { %3368 = vmatpush3.bf16.xpose.msra.mxu1 %v1237_v1  ;;  %3380 = vmatpush3.bf16.xpose.msra.mxu0 %v1320_v26 }
 0x255   : >> { %v3353_v8 = vpop.f32.mrb[12].mxu0  ;;  %v3341_v9 = vpop.f32.mrb[20].mxu1  ;;  %3522 = vmatprep.subr.msk.bf16.mxu1 %vm562_vm0, %v1205_v48  ;;  %3524 = vmatprep.subr.msk.bf16.mxu0 %vm562_vm0, %v1207_v25 }
 0x256   : >> { %v1147_v27 = vpop.f32.mrb[13].mxu0  ;;  %v1064_v28 = vpop.f32.mrb[21].mxu1 }
 0x257   : >> { %v3354_v62 = vpop.f32.mrb[14].mxu0  ;;  %v3342_v46 = vpop.f32.mrb[22].mxu1 }
 0x258   : >> { %v1213_v29 = vpack.c.bf16 %v3354_v62, %v3353_v8  ;;  %v1150_v30 = vpop.f32.mrb[15].mxu0  ;;  %v1209_v31 = vpack.c.bf16 %v3342_v46, %v3341_v9  ;;  %v1067_v36 = vpop.f32.mrb[23].mxu1 }
 0x259   : >> { %v1212_v33 = vpack.c.bf16 %v1150_v30, %v1147_v27  ;;  %v1208_v39 = vpack.c.bf16 %v1067_v36, %v1064_v28 }
 0x25a   : >> { %v1329_v34 = vsel %vm562_vm0, %v1209_v31, 0 }
 0x25b   : >> { %v1326_v60 = vsel %vm562_vm0, %v1208_v39, 0 }
 0x25c   : >> { %3370 = vmatpush3.bf16.xpose.msra.mxu1 %v1240_v24  ;;  %3382 = vmatpush3.bf16.xpose.msra.mxu0 %v1323_v58 }
 0x25d   : >> { %v3357_v43 = vpop.f32.mrb[16].mxu0  ;;  %3525 = vmatprep.subr.msk.bf16.mxu0 %vm562_vm0, %v1208_v39  ;;  %3395 = vmatprep.subr.bf16.mxu1 %v1210_v38 }
 0x25e   : >> { %v1163_v47 = vpop.f32.mrb[17].mxu0 }
 0x25f   : >> { %v3358_v49 = vpop.f32.mrb[18].mxu0 }
 0x260   : >> { %v4507_v44 = vpack.c.bf16 %v3358_v49, %v3357_v43  ;;  %v1166_v63 = vpop.f32.mrb[19].mxu0 }
 0x261   : >> { %v4509_v14 = vpack.c.bf16 %v1166_v63, %v1163_v47 }
 0x263   : >> { %3372 = vmatmul.mubr.msk.bf16.vlgmr.msra.gmra.mrb[24].mxu1 %vm562_vm0, %v1195_v15 }
 0x264   : >> { %3375 = vmatprep.mubr.msk.bf16.mxu1 %vm562_vm0, %v1196_v42  ;;  %3384 = vmatpush3.bf16.xpose.msra.mxu0 %v1326_v60 }
 0x265   : >> { %v3361_v48 = vpop.f32.mrb[20].mxu0  ;;  %3396 = vmatpush3.bf16.msra.mxu1 %v1210_v38  ;;  %3526 = vmatprep.subr.msk.bf16.mxu0 %vm562_vm0, %v1209_v31 }
 0x266   : >> { %v1179_v51 = vpop.f32.mrb[21].mxu0  ;;  %3397 = vmatprep.subr.bf16.mxu1 %v1211_v56 }
 0x267   : >> { %v3362_v54 = vpop.f32.mrb[22].mxu0 }
 0x268   : >> { %v4518_v57 = vpack.c.bf16 %v3362_v54, %v3361_v48  ;;  %v1182_v25 = vpop.f32.mrb[23].mxu0 }
 0x269   : >> { %v4520_v59 = vpack.c.bf16 %v1182_v25, %v1179_v51  ;;  %3398 = vmatpush3.bf16.msra.mxu1 %v1211_v56 }
 0x26a   : >> { %3399 = vmatprep.subr.bf16.mxu1 %v1212_v33 }
 0x26b   : >> { %3376 = vmatmul.mubr.msk.bf16.gmra.mrb[28].mxu1 %vm562_vm0, %v1197_v41 }
 0x26c   : >> { %3386 = vmatpush3.bf16.xpose.msra.mxu0 %v1329_v34 }
 0x26d   : >> { %3400 = vmatpush3.bf16.msra.mxu1 %v1212_v33 }
 0x26e   : >> { %3401 = vmatprep.subr.bf16.mxu1 %v1213_v29 }
 0x271   : >> { %3402 = vmatpush3.bf16.msra.mxu1 %v1213_v29 }
 0x272   : >> { %3411 = vmatprep.subr.bf16.mxu1 %v4509_v14 }
 0x273   : >> { %3388 = vmatmul.mubr.msk.bf16.vlgmr.msra.gmra.mrb[24].mxu0 %vm562_vm0, %v1199_v61 }
 0x274   : >> { %3391 = vmatprep.mubr.msk.bf16.mxu0 %vm562_vm0, %v1200_v7 }
 0x27b   : >> { %3392 = vmatmul.mubr.msk.bf16.gmra.mrb[28].mxu0 %vm562_vm0, %v1201_v45 }
 0x336   : >> { %v3373_v35 = vpop.f32.mrb[24].mxu1 }
 0x337   : >> { %v1276_v15 = vpop.f32.mrb[25].mxu1  ;;  %v1403_v61 = vsel %vm1396_vm1, %v3373_v35, -inf }
 0x338   : >> { %v3374_v32 = vpop.f32.mrb[26].mxu1  ;;  %v1397_v40 = vsel %vm1396_vm1, %v1276_v15, -inf }
 0x339   : >> { %1398 = vmax.xlane.f32.xlu0 %v1397_v40  ;;  %v1279_v37 = vpop.f32.mrb[27].mxu1  ;;  %v1406_v53 = vsel %vm1396_vm1, %v3374_v32, -inf }
 0x33a   : >> { %v1400_v55 = vsel %vm1396_vm1, %v1279_v37, -inf }
 0x33b   : >> { %1401 = vmax.xlane.f32.xlu1 %v1400_v55 }
 0x33d   : >> { %1404 = vmax.xlane.f32.xlu0 %v1403_v61 }
 0x33e   : >> { %v4543_v50 = vpop.f32.mrb[28].mxu1 }
 0x33f   : >> { %1407 = vmax.xlane.f32.xlu1 %v1406_v53  ;;  %v1292_v52 = vpop.f32.mrb[29].mxu1  ;;  %v1415_v42 = vsel %vm1396_vm1, %v4543_v50, -inf }
 0x340   : >> { %v4546_v45 = vpop.f32.mrb[30].mxu1  ;;  %v1409_v2 = vsel %vm1396_vm1, %v1292_v52, -inf }
 0x341   : >> { %1410 = vmax.xlane.f32.xlu0 %v1409_v2  ;;  %v1295_v7 = vpop.f32.mrb[31].mxu1  ;;  %v1418_v38 = vsel %vm1396_vm1, %v4546_v45, -inf }
 0x342   : >> { %v1412_v41 = vsel %vm1396_vm1, %v1295_v7, -inf }
 0x343   : >> { %1413 = vmax.xlane.f32.xlu1 %v1412_v41 }
 0x345   : >> { %1416 = vmax.xlane.f32.xlu0 %v1415_v42 }
 0x346   : >> { %v4552_v56 = vpop.f32.mrb[24].mxu0 }
 0x347   : >> { %1419 = vmax.xlane.f32.xlu1 %v1418_v38  ;;  %v4556_v0 = vpop.f32.mrb[25].mxu0  ;;  %v1427_v27 = vsel %vm1396_vm1, %v4552_v56, -inf }
 0x348   : >> { %v4558_v1 = vpop.f32.mrb[26].mxu0  ;;  %v1421_v26 = vsel %vm1396_vm1, %v4556_v0, -inf }
 0x349   : >> { %1422 = vmax.xlane.f32.xlu0 %v1421_v26  ;;  %v4562_v8 = vpop.f32.mrb[27].mxu0  ;;  %v1430_v62 = vsel %vm1396_vm1, %v4558_v1, -inf }
 0x34a   : >> { %v1424_v9 = vsel %vm1396_vm1, %v4562_v8, -inf }
 0x34b   : >> { %1425 = vmax.xlane.f32.xlu1 %v1424_v9 }
 0x34d   : >> { %1428 = vmax.xlane.f32.xlu0 %v1427_v27 }
 0x34e   : >> { %v4568_v28 = vpop.f32.mrb[28].mxu0 }
 0x34f   : >> { %1431 = vmax.xlane.f32.xlu1 %v1430_v62  ;;  %v4572_v46 = vpop.f32.mrb[29].mxu0  ;;  %v1439_v33 = vsel %vm1396_vm1, %v4568_v28, -inf }
 0x350   : >> { %v4574_v29 = vpop.f32.mrb[30].mxu0  ;;  %v1433_v30 = vsel %vm1396_vm1, %v4572_v46, -inf }
 0x351   : >> { %1434 = vmax.xlane.f32.xlu0 %v1433_v30  ;;  %v4578_v31 = vpop.f32.mrb[31].mxu0  ;;  %v1442_v39 = vsel %vm1396_vm1, %v4574_v29, -inf }
 0x352   : >> { %v1436_v36 = vsel %vm1396_vm1, %v4578_v31, -inf }
 0x353   : >> { %1437 = vmax.xlane.f32.xlu1 %v1436_v36 }
 0x355   : >> { %1440 = vmax.xlane.f32.xlu0 %v1439_v33 }
 0x357   : >> { %1443 = vmax.xlane.f32.xlu1 %v1442_v39 }
 0x3c6   : >> { %v1399_v24 = vpop.xlane.xlu0 %1398 }
 0x3c7   : >> { %v1445_v58 = vsub.f32 %v1276_v15, %v1399_v24 }
 0x3c8   : >> { %v1402_v43 = vpop.xlane.xlu1 %1401 }
 0x3c9   : >> { %v1461_v47 = vmul.f32 1.442695, %v1445_v58  ;;  %v1446_v49 = vsub.f32 %v1279_v37, %v1402_v43 }
 0x3ca   : >> { %v1405_v63 = vpop.xlane.xlu0 %1404 }
 0x3cb   : >> { %3717 = vpow2.f32 %v1461_v47  ;;  %v1463_v60 = vmul.f32 1.442695, %v1446_v49  ;;  %v1447_v48 = vsub.f32 %v3373_v35, %v1405_v63 }
 0x3cc   : >> { %v1408_v51 = vpop.xlane.xlu1 %1407 }
 0x3cd   : >> { %3719 = vpow2.f32 %v1463_v60  ;;  %v1465_v54 = vmul.f32 1.442695, %v1447_v48  ;;  %v1448_v25 = vsub.f32 %v3374_v32, %v1408_v51 }
 0x3ce   : >> { %v1411_v34 = vpop.xlane.xlu0 %1410 }
 0x3cf   : >> { %3721 = vpow2.f32 %v1465_v54  ;;  %v1467_v40 = vmul.f32 1.442695, %v1448_v25  ;;  %v1449_v55 = vsub.f32 %v1292_v52, %v1411_v34 }
 0x3d0   : >> { %v1414_v61 = vpop.xlane.xlu1 %1413 }
 0x3d1   : >> { %3723 = vpow2.f32 %v1467_v40  ;;  %v1469_v53 = vmul.f32 1.442695, %v1449_v55  ;;  %v1450_v2 = vsub.f32 %v1295_v7, %v1414_v61 }
 0x3d2   : >> { %v1417_v15 = vpop.xlane.xlu0 %1416 }
 0x3d3   : >> { %3725 = vpow2.f32 %v1469_v53  ;;  %v1471_v41 = vmul.f32 1.442695, %v1450_v2  ;;  %v1451_v37 = vsub.f32 %v4543_v50, %v1417_v15 }
 0x3d4   : >> { %v1420_v42 = vpop.xlane.xlu1 %1419 }
 0x3d5   : >> { %v4587_v38 = vpop.eup %3717  ;;  %3727 = vpow2.f32 %v1471_v41  ;;  %v1473_v35 = vmul.f32 1.442695, %v1451_v37  ;;  %v1452_v32 = vsub.f32 %v4546_v45, %v1420_v42 }
 0x3d6   : >> { %v1423_v26 = vpop.xlane.xlu0 %1422  ;;  %v1493_v52 = vsel %vm1396_vm1, %v4587_v38, 0.0 }
 0x3d7   : >> { %v4592_v9 = vpop.eup %3719  ;;  %3729 = vpow2.f32 %v1473_v35  ;;  %v1475_v7 = vmul.f32 1.442695, %v1452_v32  ;;  %v1453_v27 = vsub.f32 %v4556_v0, %v1423_v26  ;;  %1494 = vadd.xlane.f32.xlu0 %v1493_v52 }
 0x3d8   : >> { %v1426_v62 = vpop.xlane.xlu1 %1425  ;;  %v1496_v50 = vsel %vm1396_vm1, %v4592_v9, 0.0 }
 0x3d9   : >> { %v4597_v30 = vpop.eup %3721  ;;  %3731 = vpow2.f32 %v1475_v7  ;;  %v1477_v36 = vmul.f32 1.442695, %v1453_v27  ;;  %v1454_v45 = vsub.f32 %v4562_v8, %v1426_v62  ;;  %1497 = vadd.xlane.f32.xlu1 %v1496_v50 }
 0x3da   : >> { %v1429_v33 = vpop.xlane.xlu0 %1428  ;;  %v1499_v39 = vsel %vm1396_vm1, %v4597_v30, 0.0 }
 0x3db   : >> { %v4602_v24 = vpop.eup %3723  ;;  %3733 = vpow2.f32 %v1477_v36  ;;  %v1479_v0 = vmul.f32 1.442695, %v1454_v45  ;;  %v1455_v58 = vsub.f32 %v4552_v56, %v1429_v33  ;;  %1500 = vadd.xlane.f32.xlu0 %v1499_v39 }
 0x3dc   : >> { %v1432_v43 = vpop.xlane.xlu1 %1431  ;;  %v1502_v47 = vsel %vm1396_vm1, %v4602_v24, 0.0 }
 0x3dd   : >> { %v4607_v49 = vpop.eup %3725  ;;  %3735 = vpow2.f32 %v1479_v0  ;;  %v1481_v8 = vmul.f32 1.442695, %v1455_v58  ;;  %v1456_v63 = vsub.f32 %v4558_v1, %v1432_v43  ;;  %1503 = vadd.xlane.f32.xlu1 %v1502_v47  ;;  %v3677_v47 = vld [vmem:[%s1744_s22] sm:$0xff]  }
 0x3de   : >> { %v1435_v60 = vpop.xlane.xlu0 %1434  ;;  %v1505_v48 = vsel %vm1396_vm1, %v4607_v49, 0.0  ;;  %3427 = vmatprep.subr.bf16.mxu0 %v3677_v47 }
 0x3df   : >> { %v4612_v51 = vpop.eup %3727  ;;  %3737 = vpow2.f32 %v1481_v8  ;;  %v1483_v56 = vmul.f32 1.442695, %v1456_v63  ;;  %v1457_v54 = vsub.f32 %v4572_v46, %v1435_v60  ;;  %1506 = vadd.xlane.f32.xlu0 %v1505_v48  ;;  %v3678_v8 = vld [vmem:[%s1744_s22 + $0x8] sm:$0xff]   ;;  %3428 = vmatpush3.bf16.msra.mxu0 %v3677_v47 }
 0x3e0   : >> { %v1438_v25 = vpop.xlane.xlu1 %1437  ;;  %v1508_v34 = vsel %vm1396_vm1, %v4612_v51, 0.0  ;;  %3429 = vmatprep.subr.bf16.mxu0 %v3678_v8 }
 0x3e1   : >> { %v4617_v40 = vpop.eup %3729  ;;  %3739 = vpow2.f32 %v1483_v56  ;;  %v1485_v1 = vmul.f32 1.442695, %v1457_v54  ;;  %v1458_v55 = vsub.f32 %v4578_v31, %v1438_v25  ;;  %1509 = vadd.xlane.f32.xlu1 %v1508_v34 }
 0x3e2   : >> { %v1441_v61 = vpop.xlane.xlu0 %1440  ;;  %v1511_v53 = vsel %vm1396_vm1, %v4617_v40, 0.0 }
 0x3e3   : >> { %v4622_v2 = vpop.eup %3731  ;;  %3741 = vpow2.f32 %v1485_v1  ;;  %v1487_v46 = vmul.f32 1.442695, %v1458_v55  ;;  %v1459_v15 = vsub.f32 %v4568_v28, %v1441_v61  ;;  %1512 = vadd.xlane.f32.xlu0 %v1511_v53  ;;  %3430 = vmatpush3.bf16.msra.mxu0 %v3678_v8 }
 0x3e4   : >> { %v1444_v41 = vpop.xlane.xlu1 %1443  ;;  %v1514_v37 = vsel %vm1396_vm1, %v4622_v2, 0.0 }
 0x3e5   : >> { %v4627_v42 = vpop.eup %3733  ;;  %3743 = vpow2.f32 %v1487_v46  ;;  %v1489_v31 = vmul.f32 1.442695, %v1459_v15  ;;  %v1460_v35 = vsub.f32 %v4574_v29, %v1444_v41  ;;  %1515 = vadd.xlane.f32.xlu1 %v1514_v37 }
 0x3e6   : >> { %v1517_v32 = vsel %vm1396_vm1, %v4627_v42, 0.0 }
 0x3e7   : >> { %v4632_v26 = vpop.eup %3735  ;;  %3745 = vpow2.f32 %v1489_v31  ;;  %v1491_v52 = vmul.f32 1.442695, %v1460_v35  ;;  %1518 = vadd.xlane.f32.xlu0 %v1517_v32 }
 0x3e8   : >> { %v1520_v28 = vsel %vm1396_vm1, %v4632_v26, 0.0 }
 0x3e9   : >> { %v4636_v7 = vpop.eup %3737  ;;  %3747 = vpow2.f32 %v1491_v52  ;;  %1521 = vadd.xlane.f32.xlu1 %v1520_v28 }
 0x3ea   : >> { %v1523_v27 = vsel %vm1396_vm1, %v4636_v7, 0.0 }
 0x3eb   : >> { %v4640_v29 = vpop.eup %3739  ;;  %1524 = vadd.xlane.f32.xlu0 %v1523_v27 }
 0x3ec   : >> { %v1526_v62 = vsel %vm1396_vm1, %v4640_v29, 0.0 }
 0x3ed   : >> { %v4644_v50 = vpop.eup %3741  ;;  %1527 = vadd.xlane.f32.xlu1 %v1526_v62 }
 0x3ee   : >> { %v1529_v36 = vsel %vm1396_vm1, %v4644_v50, 0.0 }
 0x3ef   : >> { %v4648_v45 = vpop.eup %3743  ;;  %1530 = vadd.xlane.f32.xlu0 %v1529_v36 }
 0x3f0   : >> { %v1532_v33 = vsel %vm1396_vm1, %v4648_v45, 0.0 }
 0x3f1   : >> { %v4652_v39 = vpop.eup %3745  ;;  %1533 = vadd.xlane.f32.xlu1 %v1532_v33 }
 0x3f2   : >> { %v1535_v0 = vsel %vm1396_vm1, %v4652_v39, 0.0 }
 0x3f3   : >> { %v4656_v58 = vpop.eup %3747  ;;  %1536 = vadd.xlane.f32.xlu0 %v1535_v0 }
 0x3f4   : >> { %v1538_v43 = vsel %vm1396_vm1, %v4656_v58, 0.0 }
 0x3f5   : >> { %1539 = vadd.xlane.f32.xlu1 %v1538_v43 }
 0x464   : >> { %v1495_v63 = vpop.xlane.xlu0 %1494 }
 0x465   : >> { %3749 = vrcp.f32 %v1495_v63 }
 0x466   : >> { %v1498_v60 = vpop.xlane.xlu1 %1497 }
 0x467   : >> { %3751 = vrcp.f32 %v1498_v60 }
 0x468   : >> { %v1501_v48 = vpop.xlane.xlu0 %1500 }
 0x469   : >> { %3753 = vrcp.f32 %v1501_v48 }
 0x46a   : >> { %v1504_v56 = vpop.xlane.xlu1 %1503 }
 0x46b   : >> { %3755 = vrcp.f32 %v1504_v56 }
 0x46c   : >> { %v1507_v54 = vpop.xlane.xlu0 %1506 }
 0x46d   : >> { %3757 = vrcp.f32 %v1507_v54 }
 0x46e   : >> { %v1510_v25 = vpop.xlane.xlu1 %1509 }
 0x46f   : >> { %v3750_v34 = vpop.eup %3749  ;;  %3759 = vrcp.f32 %v1510_v25 }
 0x470   : >> { %v1513_v1 = vpop.xlane.xlu0 %1512  ;;  %v1557_v53 = vmul.f32 %v3750_v34, %v4587_v38 }
 0x471   : >> { %v3752_v55 = vpop.eup %3751  ;;  %3761 = vrcp.f32 %v1513_v1 }
 0x472   : >> { %v1516_v61 = vpop.xlane.xlu1 %1515  ;;  %v1558_v46 = vmul.f32 %v3752_v55, %v4592_v9 }
 0x473   : >> { %v3754_v15 = vpop.eup %3753  ;;  %3763 = vrcp.f32 %v1516_v61 }
 0x474   : >> { %v1519_v41 = vpop.xlane.xlu0 %1518  ;;  %v1573_v37 = vpack.c.bf16 %v1558_v46, %v1557_v53  ;;  %v1559_v35 = vmul.f32 %v3754_v15, %v4597_v30 }
 0x475   : >> { %v3756_v31 = vpop.eup %3755  ;;  %3765 = vrcp.f32 %v1519_v41 }
 0x476   : >> { %v1560_v32 = vmul.f32 %v3756_v31, %v4602_v24  ;;  %3403 = vmatprep.mubr.msk.bf16.mxu1 %vm1396_vm1, %v1573_v37  ;;  %v1522_v52 = vpop.xlane.xlu1 %1521 }
 0x477   : >> { %v3758_v28 = vpop.eup %3757  ;;  %3767 = vrcp.f32 %v1522_v52 }
 0x478   : >> { %v1574_v27 = vpack.c.bf16 %v1560_v32, %v1559_v35  ;;  %v1525_v62 = vpop.xlane.xlu0 %1524  ;;  %v1561_v36 = vmul.f32 %v3758_v28, %v4607_v49 }
 0x479   : >> { %v3760_v38 = vpop.eup %3759  ;;  %3769 = vrcp.f32 %v1525_v62 }
 0x47a   : >> { %3404 = vmatmul.mubr.msk.bf16.vlgmr.msra.gmra.mrb[32].mxu1 %vm1396_vm1, %v1574_v27  ;;  %v1528_v9 = vpop.xlane.xlu1 %1527  ;;  %v1562_v33 = vmul.f32 %v3760_v38, %v4612_v51 }
 0x47b   : >> { %v3762_v0 = vpop.eup %3761  ;;  %3412 = vmatpush3.bf16.msra.mxu1 %v4509_v14  ;;  %3771 = vrcp.f32 %v1528_v9 }
 0x47c   : >> { %3413 = vmatprep.subr.bf16.mxu1 %v4507_v44  ;;  %v1531_v30 = vpop.xlane.xlu0 %1530  ;;  %v1575_v24 = vpack.c.bf16 %v1562_v33, %v1561_v36  ;;  %v1563_v8 = vmul.f32 %v3762_v0, %v4617_v40 }
 0x47d   : >> { %v3764_v43 = vpop.eup %3763  ;;  %3773 = vrcp.f32 %v1531_v30 }
 0x47e   : >> { %3407 = vmatprep.mubr.msk.bf16.mxu1 %vm1396_vm1, %v1575_v24  ;;  %v1534_v47 = vpop.xlane.xlu1 %1533  ;;  %v1564_v63 = vmul.f32 %v3764_v43, %v4622_v2 }
 0x47f   : >> { %v3766_v49 = vpop.eup %3765  ;;  %3414 = vmatpush3.bf16.msra.mxu1 %v4507_v44  ;;  %3775 = vrcp.f32 %v1534_v47 }
 0x480   : >> { %3415 = vmatprep.subr.bf16.mxu1 %v4520_v59  ;;  %v1537_v14 = vpop.xlane.xlu0 %1536  ;;  %v1576_v51 = vpack.c.bf16 %v1564_v63, %v1563_v8  ;;  %v1565_v56 = vmul.f32 %v3766_v49, %v4627_v42 }
 0x481   : >> { %v3768_v60 = vpop.eup %3767  ;;  %3777 = vrcp.f32 %v1537_v14 }
 0x482   : >> { %3408 = vmatmul.mubr.msk.bf16.gmra.mrb[36].mxu1 %vm1396_vm1, %v1576_v51  ;;  %v1540_v48 = vpop.xlane.xlu1 %1539  ;;  %v1566_v54 = vmul.f32 %v3768_v60, %v4632_v26 }
 0x483   : >> { %v3770_v40 = vpop.eup %3769  ;;  %3779 = vrcp.f32 %v1540_v48  ;;  %3416 = vmatpush3.bf16.msra.mxu1 %v4520_v59 }
 0x484   : >> { %3417 = vmatprep.subr.bf16.mxu1 %v4518_v57  ;;  %v1577_v44 = vpack.c.bf16 %v1566_v54, %v1565_v56  ;;  %v1567_v25 = vmul.f32 %v3770_v40, %v4636_v7 }
 0x485   : >> { %v3772_v2 = vpop.eup %3771 }
 0x486   : >> { %v1568_v34 = vmul.f32 %v3772_v2, %v4640_v29  ;;  %3419 = vmatprep.mubr.msk.bf16.mxu1 %vm1396_vm1, %v1577_v44 }
 0x487   : >> { %v3774_v1 = vpop.eup %3773  ;;  %3418 = vmatpush3.bf16.msra.mxu1 %v4518_v57 }
 0x488   : >> { %v1578_v42 = vpack.c.bf16 %v1568_v34, %v1567_v25  ;;  %v1569_v26 = vmul.f32 %v3774_v1, %v4644_v50 }
 0x489   : >> { %v3776_v55 = vpop.eup %3775 }
 0x48a   : >> { %3420 = vmatmul.mubr.msk.bf16.vlgmr.msra.gmra.mrb[40].mxu1 %vm1396_vm1, %v1578_v42  ;;  %v1570_v59 = vmul.f32 %v3776_v55, %v4648_v45 }
 0x48b   : >> { %v3778_v61 = vpop.eup %3777 }
 0x48c   : >> { %v1579_v53 = vpack.c.bf16 %v1570_v59, %v1569_v26  ;;  %v1571_v7 = vmul.f32 %v3778_v61, %v4652_v39 }
 0x48d   : >> { %v3780_v46 = vpop.eup %3779 }
 0x48e   : >> { %3423 = vmatprep.mubr.msk.bf16.mxu1 %vm1396_vm1, %v1579_v53  ;;  %v1572_v29 = vmul.f32 %v3780_v46, %v4656_v58 }
 0x490   : >> { %v1580_v15 = vpack.c.bf16 %v1572_v29, %v1571_v7 }
 0x492   : >> { %3424 = vmatmul.mubr.msk.bf16.gmra.mrb[44].mxu1 %vm1396_vm1, %v1580_v15 }
 0x54d   : >> { %v3405_v57 = vpop.f32.mrb[32].mxu1 }
 0x54e   : >> { %v1627_v41 = vpop.f32.mrb[33].mxu1 }
 0x54f   : >> { %v3406_v37 = vpop.f32.mrb[34].mxu1 }
 0x550   : >> { %v1736_v31 = vpack.c.bf16 %v3406_v37, %v3405_v57  ;;  %v1630_v35 = vpop.f32.mrb[35].mxu1 }
 0x551   : >> { %v1735_v50 = vpack.c.bf16 %v1630_v35, %v1627_v41 }
 0x553   : >> { %3431 = vmatprep.mubr.msk.bf16.mxu0 %vm562_vm0, %v1735_v50 }
 0x554   : >> { %3432 = vmatmul.mubr.msk.bf16.vlgmr.msra.gmra.mrb[32].mxu0 %vm562_vm0, %v1736_v31 }
 0x555   : >> { %v3409_v45 = vpop.f32.mrb[36].mxu1 }
 0x556   : >> { %v1643_v32 = vpop.f32.mrb[37].mxu1 }
 0x557   : >> { %v3410_v52 = vpop.f32.mrb[38].mxu1 }
 0x558   : >> { %v1738_v28 = vpack.c.bf16 %v3410_v52, %v3409_v45  ;;  %v1646_v39 = vpop.f32.mrb[39].mxu1 }
 0x559   : >> { %v1737_v27 = vpack.c.bf16 %v1646_v39, %v1643_v32 }
 0x55b   : >> { %3435 = vmatprep.mubr.msk.bf16.mxu0 %vm562_vm0, %v1737_v27 }
 0x55c   : >> { %3436 = vmatmul.mubr.msk.bf16.gmra.mrb[36].mxu0 %vm562_vm0, %v1738_v28 }
 0x55d   : >> { %v3421_v58 = vpop.f32.mrb[40].mxu1 }
 0x55e   : >> { %v1704_v62 = vpop.f32.mrb[41].mxu1 }
 0x55f   : >> { %v3422_v38 = vpop.f32.mrb[42].mxu1 }
 0x560   : >> { %v1740_v9 = vpack.c.bf16 %v3422_v38, %v3421_v58  ;;  %v1707_v36 = vpop.f32.mrb[43].mxu1 }
 0x561   : >> { %v1739_v33 = vpack.c.bf16 %v1707_v36, %v1704_v62 }
 0x563   : >> { %3439 = vmatprep.mubr.msk.bf16.mxu0 %vm562_vm0, %v1739_v33 }
 0x564   : >> { %3440 = vmatmul.mubr.msk.bf16.gmra.mrb[40].mxu0 %vm562_vm0, %v1740_v9 }
 0x565   : >> { %v3425_v0 = vpop.f32.mrb[44].mxu1 }
 0x566   : >> { %v1720_v30 = vpop.f32.mrb[45].mxu1 }
 0x567   : >> { %v3426_v24 = vpop.f32.mrb[46].mxu1 }
 0x568   : >> { %v1742_v43 = vpack.c.bf16 %v3426_v24, %v3425_v0  ;;  %v1723_v47 = vpop.f32.mrb[47].mxu1 }
 0x569   : >> { %v1741_v8 = vpack.c.bf16 %v1723_v47, %v1720_v30 }
 0x56b   : >> { %3443 = vmatprep.mubr.msk.bf16.mxu0 %vm562_vm0, %v1741_v8 }
 0x56c   : >> { %3444 = vmatmul.mubr.msk.bf16.gmra.mrb[44].mxu0 %vm562_vm0, %v1742_v43 }
 0x627   : >> { %v3433_v63 = vpop.f32.mrb[32].mxu0 }
 0x628   : >> { %v1819_v49 = vpop.f32.mrb[33].mxu0  ;;  %v4707_v48 = vadd.f32 %v4009_v5, %v3433_v63 }
 0x629   : >> { %v4704_v14 = vadd.f32 %v4017_v3, %v1819_v49  ;;  %v3434_v51 = vpop.f32.mrb[34].mxu0 }
 0x62a   : >> { %v1822_v60 = vpop.f32.mrb[35].mxu0  ;;  %v4715_v40 = vadd.f32 %v4005_v6, %v3434_v51  ;;  %v1908_v2 = vsel %vm562_vm0, %v4707_v48, 0.0 }
 0x62b   : >> { %v4710_v56 = vadd.f32 %v4013_v4, %v1822_v60  ;;  %v1902_v54 = vsel %vm562_vm0, %v4704_v14, 0.0 }
 0x62c   : >> { %1903 = vadd.xlane.f32.xlu0 %v1902_v54  ;;  %v1911_v34 = vsel %vm562_vm0, %v4715_v40, 0.0 }
 0x62d   : >> { %v1905_v44 = vsel %vm562_vm0, %v4710_v56, 0.0 }
 0x62e   : >> { %1906 = vadd.xlane.f32.xlu1 %v1905_v44 }
 0x62f   : >> { %v3437_v3 = vpop.f32.mrb[36].mxu0 }
 0x630   : >> { %1909 = vadd.xlane.f32.xlu0 %v1908_v2  ;;  %v1835_v5 = vpop.f32.mrb[37].mxu0  ;;  %v4727_v1 = vadd.f32 %v3993_v12, %v3437_v3 }
 0x631   : >> { %v4722_v4 = vadd.f32 %v4001_v10, %v1835_v5  ;;  %v3438_v25 = vpop.f32.mrb[38].mxu0 }
 0x632   : >> { %1912 = vadd.xlane.f32.xlu1 %v1911_v34  ;;  %v1838_v6 = vpop.f32.mrb[39].mxu0  ;;  %v4735_v26 = vadd.f32 %v3989_v13, %v3438_v25  ;;  %v1920_v61 = vsel %vm562_vm0, %v4727_v1, 0.0 }
 0x633   : >> { %v4730_v42 = vadd.f32 %v3997_v11, %v1838_v6  ;;  %v1914_v55 = vsel %vm562_vm0, %v4722_v4, 0.0 }
 0x634   : >> { %1915 = vadd.xlane.f32.xlu0 %v1914_v55  ;;  %v1923_v46 = vsel %vm562_vm0, %v4735_v26, 0.0 }
 0x635   : >> { %v1917_v10 = vsel %vm562_vm0, %v4730_v42, 0.0 }
 0x636   : >> { %1918 = vadd.xlane.f32.xlu1 %v1917_v10 }
 0x637   : >> { %v3441_v59 = vpop.f32.mrb[40].mxu0 }
 0x638   : >> { %1921 = vadd.xlane.f32.xlu0 %v1920_v61  ;;  %v1851_v12 = vpop.f32.mrb[41].mxu0  ;;  %v4747_v7 = vadd.f32 %v3977_v18, %v3441_v59 }
 0x639   : >> { %v4742_v11 = vadd.f32 %v3985_v16, %v1851_v12  ;;  %v3442_v53 = vpop.f32.mrb[42].mxu0 }
 0x63a   : >> { %1924 = vadd.xlane.f32.xlu1 %v1923_v46  ;;  %v1854_v13 = vpop.f32.mrb[43].mxu0  ;;  %v4755_v57 = vadd.f32 %v3973_v19, %v3442_v53  ;;  %v1932_v37 = vsel %vm562_vm0, %v4747_v7, 0.0 }
 0x63b   : >> { %v4750_v29 = vadd.f32 %v3981_v17, %v1854_v13  ;;  %v1926_v15 = vsel %vm562_vm0, %v4742_v11, 0.0 }
 0x63c   : >> { %1927 = vadd.xlane.f32.xlu0 %v1926_v15  ;;  %v1935_v35 = vsel %vm562_vm0, %v4755_v57, 0.0 }
 0x63d   : >> { %v1929_v16 = vsel %vm562_vm0, %v4750_v29, 0.0 }
 0x63e   : >> { %1930 = vadd.xlane.f32.xlu1 %v1929_v16 }
 0x63f   : >> { %v3445_v41 = vpop.f32.mrb[44].mxu0 }
 0x640   : >> { %1933 = vadd.xlane.f32.xlu0 %v1932_v37  ;;  %v1867_v18 = vpop.f32.mrb[45].mxu0  ;;  %v4767_v50 = vadd.f32 %v3961_v22, %v3445_v41 }
 0x641   : >> { %v4762_v17 = vadd.f32 %v3969_v20, %v1867_v18  ;;  %v3446_v31 = vpop.f32.mrb[46].mxu0 }
 0x642   : >> { %1936 = vadd.xlane.f32.xlu1 %v1935_v35  ;;  %v1870_v19 = vpop.f32.mrb[47].mxu0  ;;  %v4775_v52 = vadd.f32 %v3957_v23, %v3446_v31  ;;  %v1944_v28 = vsel %vm562_vm0, %v4767_v50, 0.0 }
 0x643   : >> { %v4770_v45 = vadd.f32 %v3965_v21, %v1870_v19  ;;  %v1938_v32 = vsel %vm562_vm0, %v4762_v17, 0.0 }
 0x644   : >> { %1939 = vadd.xlane.f32.xlu0 %v1938_v32  ;;  %v1947_v22 = vsel %vm562_vm0, %v4775_v52, 0.0 }
 0x645   : >> { %v1941_v20 = vsel %vm562_vm0, %v4770_v45, 0.0 }
 0x646   : >> { %1942 = vadd.xlane.f32.xlu1 %v1941_v20 }
 0x648   : >> { %1945 = vadd.xlane.f32.xlu0 %v1944_v28 }
 0x64a   : >> { %1948 = vadd.xlane.f32.xlu1 %v1947_v22 }
 0x6b9   : >> { %v1904_v21 = vpop.xlane.xlu0 %1903 }
 0x6ba   : >> { %v1950_v39 = vmul.f32 0.03125, %v1904_v21 }
 0x6bb   : >> { %v1907_v27 = vpop.xlane.xlu1 %1906 }
 0x6bc   : >> { %v4784_v58 = vsub.f32 %v4704_v14, %v1950_v39  ;;  %v1951_v23 = vmul.f32 0.03125, %v1907_v27 }
 0x6bd   : >> { %v1910_v62 = vpop.xlane.xlu0 %1909 }
 0x6be   : >> { %v4787_v38 = vsub.f32 %v4710_v56, %v1951_v23  ;;  %v1952_v9 = vmul.f32 0.03125, %v1910_v62  ;;  %v1982_v36 = vmul.f32 %v4784_v58, %v4784_v58 }
 0x6bf   : >> { %v1913_v33 = vpop.xlane.xlu1 %1912 }
 0x6c0   : >> { %v4792_v0 = vsub.f32 %v4707_v48, %v1952_v9  ;;  %v1953_v30 = vmul.f32 0.03125, %v1913_v33  ;;  %v1998_v24 = vsel %vm562_vm0, %v1982_v36, 0.0  ;;  %v1983_v43 = vmul.f32 %v4787_v38, %v4787_v38 }
 0x6c1   : >> { %v1916_v47 = vpop.xlane.xlu0 %1915  ;;  %1999 = vadd.xlane.f32.xlu0 %v1998_v24 }
 0x6c2   : >> { %v4798_v8 = vsub.f32 %v4715_v40, %v1953_v30  ;;  %v1954_v63 = vmul.f32 0.03125, %v1916_v47  ;;  %v2001_v49 = vsel %vm562_vm0, %v1983_v43, 0.0  ;;  %v1984_v51 = vmul.f32 %v4792_v0, %v4792_v0 }
 0x6c3   : >> { %v1919_v60 = vpop.xlane.xlu1 %1918  ;;  %2002 = vadd.xlane.f32.xlu1 %v2001_v49 }
 0x6c4   : >> { %v4804_v54 = vsub.f32 %v4722_v4, %v1954_v63  ;;  %v1955_v44 = vmul.f32 0.03125, %v1919_v60  ;;  %v2004_v3 = vsel %vm562_vm0, %v1984_v51, 0.0  ;;  %v1985_v2 = vmul.f32 %v4798_v8, %v4798_v8 }
 0x6c5   : >> { %v1922_v5 = vpop.xlane.xlu0 %1921  ;;  %2005 = vadd.xlane.f32.xlu0 %v2004_v3 }
 0x6c6   : >> { %v4810_v25 = vsub.f32 %v4730_v42, %v1955_v44  ;;  %v1956_v34 = vmul.f32 0.03125, %v1922_v5  ;;  %v2007_v6 = vsel %vm562_vm0, %v1985_v2, 0.0  ;;  %v1986_v55 = vmul.f32 %v4804_v54, %v4804_v54 }
 0x6c7   : >> { %v1925_v10 = vpop.xlane.xlu1 %1924  ;;  %2008 = vadd.xlane.f32.xlu1 %v2007_v6 }
 0x6c8   : >> { %v4816_v59 = vsub.f32 %v4727_v1, %v1956_v34  ;;  %v1957_v61 = vmul.f32 0.03125, %v1925_v10  ;;  %v2010_v12 = vsel %vm562_vm0, %v1986_v55, 0.0  ;;  %v1987_v53 = vmul.f32 %v4810_v25, %v4810_v25 }
 0x6c9   : >> { %v1928_v46 = vpop.xlane.xlu0 %1927  ;;  %2011 = vadd.xlane.f32.xlu0 %v2010_v12 }
 0x6ca   : >> { %v4822_v13 = vsub.f32 %v4735_v26, %v1957_v61  ;;  %v1958_v15 = vmul.f32 0.03125, %v1928_v46  ;;  %v2013_v16 = vsel %vm562_vm0, %v1987_v53, 0.0  ;;  %v1988_v41 = vmul.f32 %v4816_v59, %v4816_v59 }
 0x6cb   : >> { %v1931_v37 = vpop.xlane.xlu1 %1930  ;;  %2014 = vadd.xlane.f32.xlu1 %v2013_v16 }
 0x6cc   : >> { %v4828_v18 = vsub.f32 %v4742_v11, %v1958_v15  ;;  %v1959_v31 = vmul.f32 0.03125, %v1931_v37  ;;  %v2016_v35 = vsel %vm562_vm0, %v1988_v41, 0.0  ;;  %v1989_v19 = vmul.f32 %v4822_v13, %v4822_v13 }
 0x6cd   : >> { %v1934_v32 = vpop.xlane.xlu0 %1933  ;;  %2017 = vadd.xlane.f32.xlu0 %v2016_v35  ;;  %v3680_v35 = vld [vmem:[%s2163_s25 + $0x8] sm:$0xff]  }
 0x6ce   : >> { %v4834_v20 = vsub.f32 %v4750_v29, %v1959_v31  ;;  %v1960_v28 = vmul.f32 0.03125, %v1934_v32  ;;  %v2019_v22 = vsel %vm562_vm0, %v1989_v19, 0.0  ;;  %v1990_v21 = vmul.f32 %v4828_v18, %v4828_v18  ;;  %v3679_v31 = vld [vmem:[%s2163_s25] sm:$0xff]  }
 0x6cf   : >> { %v1937_v39 = vpop.xlane.xlu1 %1936  ;;  %2020 = vadd.xlane.f32.xlu1 %v2019_v22  ;;  %3447 = vmatprep.subr.bf16.mxu1 %v3679_v31 }
 0x6d0   : >> { %v4840_v27 = vsub.f32 %v4747_v7, %v1960_v28  ;;  %v1961_v23 = vmul.f32 0.03125, %v1937_v39  ;;  %v2022_v62 = vsel %vm562_vm0, %v1990_v21, 0.0  ;;  %v1991_v9 = vmul.f32 %v4834_v20, %v4834_v20  ;;  %3448 = vmatpush3.bf16.msra.mxu1 %v3679_v31 }
 0x6d1   : >> { %2023 = vadd.xlane.f32.xlu0 %v2022_v62  ;;  %v1940_v36 = vpop.xlane.xlu0 %1939  ;;  %3449 = vmatprep.subr.bf16.mxu1 %v3680_v35 }
 0x6d2   : >> { %v4846_v33 = vsub.f32 %v4755_v57, %v1961_v23  ;;  %v1962_v30 = vmul.f32 0.03125, %v1940_v36  ;;  %v2025_v24 = vsel %vm562_vm0, %v1991_v9, 0.0  ;;  %v1992_v43 = vmul.f32 %v4840_v27, %v4840_v27 }
 0x6d3   : >> { %2026 = vadd.xlane.f32.xlu1 %v2025_v24  ;;  %v1943_v47 = vpop.xlane.xlu1 %1942 }
 0x6d4   : >> { %v4852_v63 = vsub.f32 %v4762_v17, %v1962_v30  ;;  %v1963_v49 = vmul.f32 0.03125, %v1943_v47  ;;  %v2028_v51 = vsel %vm562_vm0, %v1992_v43, 0.0  ;;  %v1993_v60 = vmul.f32 %v4846_v33, %v4846_v33  ;;  %3450 = vmatpush3.bf16.msra.mxu1 %v3680_v35 }
 0x6d5   : >> { %2029 = vadd.xlane.f32.xlu0 %v2028_v51  ;;  %v1946_v44 = vpop.xlane.xlu0 %1945 }
 0x6d6   : >> { %v4858_v3 = vsub.f32 %v4770_v45, %v1963_v49  ;;  %v1964_v2 = vmul.f32 0.03125, %v1946_v44  ;;  %v2031_v5 = vsel %vm562_vm0, %v1993_v60, 0.0  ;;  %v1994_v34 = vmul.f32 %v4852_v63, %v4852_v63 }
 0x6d7   : >> { %2032 = vadd.xlane.f32.xlu1 %v2031_v5  ;;  %v1949_v6 = vpop.xlane.xlu1 %1948 }
 0x6d8   : >> { %v4864_v55 = vsub.f32 %v4767_v50, %v1964_v2  ;;  %v1965_v10 = vmul.f32 0.03125, %v1949_v6  ;;  %v2034_v61 = vsel %vm562_vm0, %v1994_v34, 0.0  ;;  %v1995_v12 = vmul.f32 %v4858_v3, %v4858_v3 }
 0x6d9   : >> { %2035 = vadd.xlane.f32.xlu0 %v2034_v61 }
 0x6da   : >> { %v4870_v53 = vsub.f32 %v4775_v52, %v1965_v10  ;;  %v2037_v46 = vsel %vm562_vm0, %v1995_v12, 0.0  ;;  %v1996_v15 = vmul.f32 %v4864_v55, %v4864_v55  ;;  %v4887_v10 = vld [vmem:[%s1898_s30] ss:$0 sm:$0xff] }
 0x6db   : >> { %2038 = vadd.xlane.f32.xlu1 %v2037_v46 }
 0x6dc   : >> { %v2040_v16 = vsel %vm562_vm0, %v1996_v15, 0.0  ;;  %v1997_v41 = vmul.f32 %v4870_v53, %v4870_v53 }
 0x6dd   : >> { %2041 = vadd.xlane.f32.xlu0 %v2040_v16 }
 0x6de   : >> { %v2043_v37 = vsel %vm562_vm0, %v1997_v41, 0.0 }
 0x6df   : >> { %2044 = vadd.xlane.f32.xlu1 %v2043_v37 }
 0x74e   : >> { %v2000_v19 = vpop.xlane.xlu0 %1999 }
 0x74f   : >> { %v2046_v32 = vmul.f32 0.03125, %v2000_v19 }
 0x750   : >> { %v2003_v28 = vpop.xlane.xlu1 %2002 }
 0x751   : >> { %v2062_v22 = vadd.f32 1e-05, %v2046_v32  ;;  %v2047_v21 = vmul.f32 0.03125, %v2003_v28  ;;  %v4896_v28 = vld [vmem:[%s1900_s19] ss:$0 sm:$0xff] }
 0x752   : >> { %v2006_v39 = vpop.xlane.xlu0 %2005 }
 0x753   : >> { %3781 = vrsqrt.f32 %v2062_v22  ;;  %v2063_v23 = vadd.f32 1e-05, %v2047_v21  ;;  %v2048_v62 = vmul.f32 0.03125, %v2006_v39 }
 0x754   : >> { %v2009_v9 = vpop.xlane.xlu1 %2008 }
 0x755   : >> { %3783 = vrsqrt.f32 %v2063_v23  ;;  %v2064_v36 = vadd.f32 1e-05, %v2048_v62  ;;  %v2049_v30 = vmul.f32 0.03125, %v2009_v9 }
 0x756   : >> { %v2012_v24 = vpop.xlane.xlu0 %2011 }
 0x757   : >> { %3785 = vrsqrt.f32 %v2064_v36  ;;  %v2065_v43 = vadd.f32 1e-05, %v2049_v30  ;;  %v2050_v47 = vmul.f32 0.03125, %v2012_v24 }
 0x758   : >> { %v2015_v49 = vpop.xlane.xlu1 %2014 }
 0x759   : >> { %3787 = vrsqrt.f32 %v2065_v43  ;;  %v2066_v51 = vadd.f32 1e-05, %v2050_v47  ;;  %v2051_v60 = vmul.f32 0.03125, %v2015_v49 }
 0x75a   : >> { %v2018_v44 = vpop.xlane.xlu0 %2017 }
 0x75b   : >> { %3789 = vrsqrt.f32 %v2066_v51  ;;  %v2067_v2 = vadd.f32 1e-05, %v2051_v60  ;;  %v2052_v5 = vmul.f32 0.03125, %v2018_v44 }
 0x75c   : >> { %v2021_v34 = vpop.xlane.xlu1 %2020 }
 0x75d   : >> { %v3782_v6 = vpop.eup %3781  ;;  %3791 = vrsqrt.f32 %v2067_v2  ;;  %v2068_v61 = vadd.f32 1e-05, %v2052_v5  ;;  %v2053_v12 = vmul.f32 0.03125, %v2021_v34 }
 0x75e   : >> { %v2094_v46 = vmul.f32 %v3782_v6, %v4784_v58  ;;  %v2024_v15 = vpop.xlane.xlu0 %2023 }
 0x75f   : >> { %v3784_v16 = vpop.eup %3783  ;;  %3793 = vrsqrt.f32 %v2068_v61  ;;  %v2069_v41 = vadd.f32 1e-05, %v2053_v12  ;;  %v2054_v37 = vmul.f32 0.03125, %v2024_v15 }
 0x760   : >> { %v2095_v31 = vmul.f32 %v3784_v16, %v4787_v38  ;;  %v2027_v35 = vpop.xlane.xlu1 %2026  ;;  %v2116_v19 = vmul.f32 %v4887_v10, %v2094_v46 }
 0x761   : >> { %v3786_v32 = vpop.eup %3785  ;;  %3795 = vrsqrt.f32 %v2069_v41  ;;  %v2070_v22 = vadd.f32 1e-05, %v2054_v37  ;;  %v2055_v21 = vmul.f32 0.03125, %v2027_v35 }
 0x762   : >> { %v2096_v39 = vmul.f32 %v3786_v32, %v4792_v0  ;;  %v2030_v23 = vpop.xlane.xlu0 %2029  ;;  %v2117_v58 = vmul.f32 %v4887_v10, %v2095_v31  ;;  %v2138_v43 = vadd.f32 %v4896_v28, %v2116_v19 }
 0x763   : >> { %v3788_v62 = vpop.eup %3787  ;;  %3797 = vrsqrt.f32 %v2070_v22  ;;  %v2071_v9 = vadd.f32 1e-05, %v2055_v21  ;;  %v2056_v36 = vmul.f32 0.03125, %v2030_v23 }
 0x764   : >> { %v2118_v38 = vmul.f32 %v4887_v10, %v2096_v39  ;;  %v2097_v30 = vmul.f32 %v3788_v62, %v4798_v8  ;;  %v2033_v24 = vpop.xlane.xlu1 %2032  ;;  %v2139_v47 = vadd.f32 %v4896_v28, %v2117_v58 }
 0x765   : >> { %v3790_v49 = vpop.eup %3789  ;;  %3799 = vrsqrt.f32 %v2071_v9  ;;  %v2072_v51 = vadd.f32 1e-05, %v2056_v36  ;;  %v2057_v0 = vmul.f32 0.03125, %v2033_v24 }
 0x766   : >> { %v2119_v60 = vmul.f32 %v4887_v10, %v2097_v30  ;;  %v2098_v44 = vmul.f32 %v3790_v49, %v4804_v54  ;;  %v2036_v2 = vpop.xlane.xlu0 %2035  ;;  %v2154_v5 = vpack.c.bf16 %v2139_v47, %v2138_v43  ;;  %v2140_v8 = vadd.f32 %v4896_v28, %v2118_v38 }
 0x767   : >> { %v3792_v34 = vpop.eup %3791  ;;  %3801 = vrsqrt.f32 %v2072_v51  ;;  %v2073_v6 = vadd.f32 1e-05, %v2057_v0  ;;  %v2058_v61 = vmul.f32 0.03125, %v2036_v2 }
 0x768   : >> { %v2141_v12 = vadd.f32 %v4896_v28, %v2119_v60  ;;  %v2099_v46 = vmul.f32 %v3792_v34, %v4810_v25  ;;  %3451 = vmatprep.mubr.msk.bf16.mxu1 %vm562_vm0, %v2154_v5  ;;  %v2039_v15 = vpop.xlane.xlu1 %2038  ;;  %v2120_v16 = vmul.f32 %v4887_v10, %v2098_v44 }
 0x769   : >> { %v3794_v41 = vpop.eup %3793  ;;  %3803 = vrsqrt.f32 %v2073_v6  ;;  %v2074_v54 = vadd.f32 1e-05, %v2058_v61  ;;  %v2059_v37 = vmul.f32 0.03125, %v2039_v15 }
 0x76a   : >> { %v2100_v31 = vmul.f32 %v3794_v41, %v4816_v59  ;;  %v2042_v35 = vpop.xlane.xlu0 %2041  ;;  %v2155_v19 = vpack.c.bf16 %v2141_v12, %v2140_v8  ;;  %v2121_v32 = vmul.f32 %v4887_v10, %v2099_v46  ;;  %v2142_v58 = vadd.f32 %v4896_v28, %v2120_v16 }
 0x76b   : >> { %v3796_v22 = vpop.eup %3795  ;;  %3805 = vrsqrt.f32 %v2074_v54  ;;  %v2075_v21 = vadd.f32 1e-05, %v2059_v37  ;;  %v2060_v39 = vmul.f32 0.03125, %v2042_v35 }
 0x76c   : >> { %v2101_v25 = vmul.f32 %v3796_v22, %v4822_v13  ;;  %3452 = vmatmul.mubr.msk.bf16.vlgmr.msra.gmra.mrb[48].mxu1 %vm562_vm0, %v2155_v19  ;;  %v2045_v23 = vpop.xlane.xlu1 %2044  ;;  %v2143_v62 = vadd.f32 %v4896_v28, %v2121_v32  ;;  %v2122_v9 = vmul.f32 %v4887_v10, %v2100_v31 }
 0x76d   : >> { %v3798_v59 = vpop.eup %3797  ;;  %3807 = vrsqrt.f32 %v2075_v21  ;;  %v2076_v36 = vadd.f32 1e-05, %v2060_v39  ;;  %v2061_v38 = vmul.f32 0.03125, %v2045_v23 }
 0x76e   : >> { %v2102_v30 = vmul.f32 %v3798_v59, %v4828_v18  ;;  %v2156_v24 = vpack.c.bf16 %v2143_v62, %v2142_v58  ;;  %v2123_v43 = vmul.f32 %v4887_v10, %v2101_v25  ;;  %v2144_v51 = vadd.f32 %v4896_v28, %v2122_v9  ;;  %v3682_v9 = vld [vmem:[%s2431_s23 + $0x8] sm:$0xff]   ;;  %v3684_v59 = vld [vmem:[%s2431_s23 + $0x18] sm:$0xff]  }
 0x76f   : >> { %v3800_v47 = vpop.eup %3799  ;;  %3809 = vrsqrt.f32 %v2076_v36  ;;  %v2077_v13 = vadd.f32 1e-05, %v2061_v38 }
 0x770   : >> { %v2103_v49 = vmul.f32 %v3800_v47, %v4834_v20  ;;  %3455 = vmatprep.mubr.msk.bf16.mxu1 %vm562_vm0, %v2156_v24  ;;  %v2145_v0 = vadd.f32 %v4896_v28, %v2123_v43  ;;  %v2124_v60 = vmul.f32 %v4887_v10, %v2102_v30 }
 0x771   : >> { %v3802_v44 = vpop.eup %3801  ;;  %3811 = vrsqrt.f32 %v2077_v13 }
 0x772   : >> { %v2104_v18 = vmul.f32 %v3802_v44, %v4840_v27  ;;  %v2157_v2 = vpack.c.bf16 %v2145_v0, %v2144_v51  ;;  %v2125_v5 = vmul.f32 %v4887_v10, %v2103_v49  ;;  %v2146_v20 = vadd.f32 %v4896_v28, %v2124_v60 }
 0x773   : >> { %v3804_v34 = vpop.eup %3803 }
 0x774   : >> { %v2105_v6 = vmul.f32 %v3804_v34, %v4846_v33  ;;  %3456 = vmatmul.mubr.msk.bf16.gmra.mrb[52].mxu1 %vm562_vm0, %v2157_v2  ;;  %v2147_v61 = vadd.f32 %v4896_v28, %v2125_v5  ;;  %v2126_v8 = vmul.f32 %v4887_v10, %v2104_v18 }
 0x775   : >> { %v3806_v12 = vpop.eup %3805 }
 0x776   : >> { %v2106_v46 = vmul.f32 %v3806_v12, %v4852_v63  ;;  %v2158_v15 = vpack.c.bf16 %v2147_v61, %v2146_v20  ;;  %v2127_v27 = vmul.f32 %v4887_v10, %v2105_v6  ;;  %v2148_v33 = vadd.f32 %v4896_v28, %v2126_v8 }
 0x777   : >> { %v3808_v16 = vpop.eup %3807 }
 0x778   : >> { %v2107_v41 = vmul.f32 %v3808_v16, %v4858_v3  ;;  %3459 = vmatprep.mubr.msk.bf16.mxu1 %vm562_vm0, %v2158_v15  ;;  %v2149_v54 = vadd.f32 %v4896_v28, %v2127_v27  ;;  %v2128_v37 = vmul.f32 %v4887_v10, %v2106_v46 }
 0x779   : >> { %v3810_v31 = vpop.eup %3809 }
 0x77a   : >> { %v2108_v35 = vmul.f32 %v3810_v31, %v4864_v55  ;;  %v2159_v19 = vpack.c.bf16 %v2149_v54, %v2148_v33  ;;  %v2129_v63 = vmul.f32 %v4887_v10, %v2107_v41  ;;  %v2150_v3 = vadd.f32 %v4896_v28, %v2128_v37 }
 0x77b   : >> { %v3812_v32 = vpop.eup %3811 }
 0x77c   : >> { %v2109_v22 = vmul.f32 %v3812_v32, %v4870_v53  ;;  %3460 = vmatmul.mubr.msk.bf16.gmra.mrb[56].mxu1 %vm562_vm0, %v2159_v19  ;;  %v2151_v21 = vadd.f32 %v4896_v28, %v2129_v63  ;;  %v2130_v39 = vmul.f32 %v4887_v10, %v2108_v35  ;;  %v3681_v53 = vld [vmem:[%s2431_s23] sm:$0xff]  }
 0x77d   : >> { %3467 = vmatprep.subr.bf16.mxu0 %v3681_v53 }
 0x77e   : >> { %v2160_v25 = vpack.c.bf16 %v2151_v21, %v2150_v3  ;;  %v2131_v23 = vmul.f32 %v4887_v10, %v2109_v22  ;;  %v2152_v55 = vadd.f32 %v4896_v28, %v2130_v39  ;;  %3468 = vmatpush3.bf16.msra.mxu0 %v3681_v53  ;;  %v3683_v10 = vld [vmem:[%s2431_s23 + $0x10] sm:$0xff]  }
 0x77f   : >> { %3469 = vmatprep.subr.bf16.mxu0 %v3682_v9 }
 0x780   : >> { %3463 = vmatprep.mubr.msk.bf16.mxu1 %vm562_vm0, %v2160_v25  ;;  %v2153_v58 = vadd.f32 %v4896_v28, %v2131_v23  ;;  %v4959_v28 = vld [vmem:[%s2168_s29] ss:$0 sm:$0xff] }
 0x782   : >> { %v2161_v62 = vpack.c.bf16 %v2153_v58, %v2152_v55  ;;  %3470 = vmatpush3.bf16.msra.mxu0 %v3682_v9 }
 0x783   : >> { %3471 = vmatprep.subr.bf16.mxu0 %v3683_v10 }
 0x784   : >> { %3464 = vmatmul.mubr.msk.bf16.gmra.mrb[60].mxu1 %vm562_vm0, %v2161_v62 }
 0x786   : >> { %3472 = vmatpush3.bf16.msra.mxu0 %v3683_v10 }
 0x787   : >> { %3473 = vmatprep.subr.bf16.mxu0 %v3684_v59 }
 0x78a   : >> { %3474 = vmatpush3.bf16.msra.mxu0 %v3684_v59 }
 0x83f   : >> { %v3453_v36 = vpop.f32.mrb[48].mxu1 }
 0x840   : >> { %v4962_v38 = vadd.f32 %v3453_v36, %v4959_v28  ;;  %v2246_v30 = vpop.f32.mrb[49].mxu1 }
 0x841   : >> { %v4965_v24 = vadd.f32 %v4959_v28, %v2246_v30  ;;  %v3454_v43 = vpop.f32.mrb[50].mxu1 }
 0x842   : >> { %v3078_v47 = vmul.f32 -1.442695, %v4962_v38  ;;  %v4969_v13 = vadd.f32 %v3454_v43, %v4959_v28  ;;  %v2249_v49 = vpop.f32.mrb[51].mxu1 }
 0x843   : >> { %v3076_v51 = vmul.f32 -1.442695, %v4965_v24  ;;  %v4973_v0 = vadd.f32 %v4959_v28, %v2249_v49 }
 0x844   : >> { %3813 = vpow2.f32 %v3078_v47  ;;  %v3079_v60 = vmul.f32 -1.442695, %v4969_v13 }
 0x845   : >> { %3815 = vpow2.f32 %v3076_v51  ;;  %v3077_v44 = vmul.f32 -1.442695, %v4973_v0 }
 0x846   : >> { %3817 = vpow2.f32 %v3079_v60 }
 0x847   : >> { %3819 = vpow2.f32 %v3077_v44  ;;  %v3457_v18 = vpop.f32.mrb[52].mxu1 }
 0x848   : >> { %v4978_v2 = vadd.f32 %v3457_v18, %v4959_v28  ;;  %v2262_v5 = vpop.f32.mrb[53].mxu1 }
 0x849   : >> { %v4981_v34 = vadd.f32 %v4959_v28, %v2262_v5  ;;  %v3458_v6 = vpop.f32.mrb[54].mxu1 }
 0x84a   : >> { %v3082_v20 = vmul.f32 -1.442695, %v4978_v2  ;;  %v4985_v61 = vadd.f32 %v3458_v6, %v4959_v28  ;;  %v2265_v8 = vpop.f32.mrb[55].mxu1 }
 0x84b   : >> { %v3080_v12 = vmul.f32 -1.442695, %v4981_v34  ;;  %v4989_v46 = vadd.f32 %v4959_v28, %v2265_v8 }
 0x84c   : >> { %3821 = vpow2.f32 %v3082_v20  ;;  %v3083_v15 = vmul.f32 -1.442695, %v4985_v61 }
 0x84d   : >> { %3823 = vpow2.f32 %v3080_v12  ;;  %v3081_v27 = vmul.f32 -1.442695, %v4989_v46 }
 0x84e   : >> { %v3814_v16 = vpop.eup %3813  ;;  %3825 = vpow2.f32 %v3083_v15 }
 0x84f   : >> { %v3816_v41 = vpop.eup %3815  ;;  %v2359_v33 = vadd.f32 1.0, %v3814_v16  ;;  %3827 = vpow2.f32 %v3081_v27  ;;  %v3461_v54 = vpop.f32.mrb[56].mxu1 }
 0x850   : >> { %v3818_v37 = vpop.eup %3817  ;;  %v2357_v31 = vadd.f32 1.0, %v3816_v41  ;;  %v4994_v35 = vadd.f32 %v3461_v54, %v4959_v28  ;;  %v2278_v19 = vpop.f32.mrb[57].mxu1 }
 0x851   : >> { %v3820_v63 = vpop.eup %3819  ;;  %3829 = vrcp.f32 %v2359_v33  ;;  %v2360_v32 = vadd.f32 1.0, %v3818_v37  ;;  %v4997_v22 = vadd.f32 %v4959_v28, %v2278_v19  ;;  %v3462_v3 = vpop.f32.mrb[58].mxu1 }
 0x852   : >> { %3831 = vrcp.f32 %v2357_v31  ;;  %v2358_v21 = vadd.f32 1.0, %v3820_v63  ;;  %v3086_v39 = vmul.f32 -1.442695, %v4994_v35  ;;  %v5001_v25 = vadd.f32 %v3462_v3, %v4959_v28  ;;  %v2281_v23 = vpop.f32.mrb[59].mxu1 }
 0x853   : >> { %3833 = vrcp.f32 %v2360_v32  ;;  %v3084_v55 = vmul.f32 -1.442695, %v4997_v22  ;;  %v5005_v58 = vadd.f32 %v4959_v28, %v2281_v23 }
 0x854   : >> { %3835 = vrcp.f32 %v2358_v21  ;;  %v3087_v62 = vmul.f32 -1.442695, %v5001_v25 }
 0x855   : >> { %3837 = vpow2.f32 %v3086_v39  ;;  %v3085_v53 = vmul.f32 -1.442695, %v5005_v58 }
 0x856   : >> { %v3822_v9 = vpop.eup %3821  ;;  %3839 = vpow2.f32 %v3084_v55 }
 0x857   : >> { %v3824_v10 = vpop.eup %3823  ;;  %v2363_v59 = vadd.f32 1.0, %v3822_v9  ;;  %3841 = vpow2.f32 %v3087_v62  ;;  %v3465_v36 = vpop.f32.mrb[60].mxu1 }
 0x858   : >> { %v3826_v30 = vpop.eup %3825  ;;  %v2361_v43 = vadd.f32 1.0, %v3824_v10  ;;  %3843 = vpow2.f32 %v3085_v53  ;;  %v5010_v47 = vadd.f32 %v3465_v36, %v4959_v28  ;;  %v2294_v49 = vpop.f32.mrb[61].mxu1 }
 0x859   : >> { %v3828_v51 = vpop.eup %3827  ;;  %3845 = vrcp.f32 %v2363_v59  ;;  %v2364_v60 = vadd.f32 1.0, %v3826_v30  ;;  %v5013_v44 = vadd.f32 %v4959_v28, %v2294_v49  ;;  %v3466_v18 = vpop.f32.mrb[62].mxu1 }
 0x85a   : >> { %3847 = vrcp.f32 %v2361_v43  ;;  %v2362_v5 = vadd.f32 1.0, %v3828_v51  ;;  %v3090_v6 = vmul.f32 -1.442695, %v5010_v47  ;;  %v5017_v20 = vadd.f32 %v3466_v18, %v4959_v28  ;;  %v2297_v8 = vpop.f32.mrb[63].mxu1 }
 0x85b   : >> { %v3830_v12 = vpop.eup %3829  ;;  %3849 = vrcp.f32 %v2364_v60  ;;  %v3088_v15 = vmul.f32 -1.442695, %v5013_v44  ;;  %v5021_v27 = vadd.f32 %v4959_v28, %v2297_v8 }
 0x85c   : >> { %v3832_v16 = vpop.eup %3831  ;;  %3851 = vrcp.f32 %v2362_v5  ;;  %v3091_v41 = vmul.f32 -1.442695, %v5017_v20  ;;  %v2407_v31 = vmul.f32 %v3830_v12, %v4962_v38 }
 0x85d   : >> { %v3834_v33 = vpop.eup %3833  ;;  %3853 = vpow2.f32 %v3090_v6  ;;  %v3089_v54 = vmul.f32 -1.442695, %v5021_v27  ;;  %v2405_v32 = vmul.f32 %v3832_v16, %v4965_v24 }
 0x85e   : >> { %v3836_v37 = vpop.eup %3835  ;;  %v2408_v19 = vmul.f32 %v3834_v33, %v4969_v13  ;;  %3855 = vpow2.f32 %v3088_v15 }
 0x85f   : >> { %v3838_v63 = vpop.eup %3837  ;;  %v2406_v28 = vmul.f32 %v3836_v37, %v4973_v0  ;;  %3857 = vpow2.f32 %v3091_v41 }
 0x860   : >> { %v3840_v3 = vpop.eup %3839  ;;  %v2422_v21 = vpack.c.bf16 %v2408_v19, %v2407_v31  ;;  %v2367_v39 = vadd.f32 1.0, %v3838_v63  ;;  %3859 = vpow2.f32 %v3089_v54 }
 0x861   : >> { %v3842_v23 = vpop.eup %3841  ;;  %v2421_v55 = vpack.c.bf16 %v2406_v28, %v2405_v32  ;;  %v2365_v62 = vadd.f32 1.0, %v3840_v3 }
 0x862   : >> { %v3844_v53 = vpop.eup %3843  ;;  %3861 = vrcp.f32 %v2367_v39  ;;  %v2368_v9 = vadd.f32 1.0, %v3842_v23  ;;  %v3106_v23 = vld [vmem:[%s2601_s16] ss:$0 sm:$0xff] }
 0x863   : >> { %v3846_v38 = vpop.eup %3845  ;;  %3863 = vrcp.f32 %v2365_v62  ;;  %v2366_v13 = vadd.f32 1.0, %v3844_v53  ;;  %3475 = vmatprep.mubr.msk.bf16.mxu0 %vm1396_vm1, %v2421_v55 }
 0x864   : >> { %v3848_v10 = vpop.eup %3847  ;;  %3865 = vrcp.f32 %v2368_v9  ;;  %3476 = vmatmul.mubr.msk.bf16.vlgmr.msra.gmra.mrb[48].mxu0 %vm1396_vm1, %v2422_v21  ;;  %v2411_v59 = vmul.f32 %v3846_v38, %v4978_v2 }
 0x865   : >> { %v3850_v24 = vpop.eup %3849  ;;  %3867 = vrcp.f32 %v2366_v13  ;;  %v2409_v43 = vmul.f32 %v3848_v10, %v4981_v34 }
 0x866   : >> { %v3852_v0 = vpop.eup %3851  ;;  %v2412_v36 = vmul.f32 %v3850_v24, %v4985_v61 }
 0x867   : >> { %v3854_v30 = vpop.eup %3853  ;;  %v2410_v49 = vmul.f32 %v3852_v0, %v4989_v46 }
 0x868   : >> { %v3856_v51 = vpop.eup %3855  ;;  %v2424_v60 = vpack.c.bf16 %v2412_v36, %v2411_v59  ;;  %v2371_v18 = vadd.f32 1.0, %v3854_v30 }
 0x869   : >> { %v3858_v5 = vpop.eup %3857  ;;  %v2423_v6 = vpack.c.bf16 %v2410_v49, %v2409_v43  ;;  %v2369_v8 = vadd.f32 1.0, %v3856_v51 }
 0x86a   : >> { %v3860_v12 = vpop.eup %3859  ;;  %3869 = vrcp.f32 %v2371_v18  ;;  %v2372_v15 = vadd.f32 1.0, %v3858_v5 }
 0x86b   : >> { %3871 = vrcp.f32 %v2369_v8  ;;  %v2370_v16 = vadd.f32 1.0, %v3860_v12  ;;  %3479 = vmatprep.mubr.msk.bf16.mxu0 %vm1396_vm1, %v2423_v6 }
 0x86c   : >> { %v3862_v2 = vpop.eup %3861  ;;  %3873 = vrcp.f32 %v2372_v15  ;;  %3480 = vmatmul.mubr.msk.bf16.gmra.mrb[52].mxu0 %vm1396_vm1, %v2424_v60 }
 0x86d   : >> { %v3864_v34 = vpop.eup %3863  ;;  %3875 = vrcp.f32 %v2370_v16  ;;  %v2415_v41 = vmul.f32 %v3862_v2, %v4994_v35 }
 0x86e   : >> { %v3866_v61 = vpop.eup %3865  ;;  %v2413_v54 = vmul.f32 %v3864_v34, %v4997_v22 }
 0x86f   : >> { %v3868_v46 = vpop.eup %3867  ;;  %v2416_v33 = vmul.f32 %v3866_v61, %v5001_v25 }
 0x870   : >> { %v2414_v37 = vmul.f32 %v3868_v46, %v5005_v58 }
 0x871   : >> { %v2426_v31 = vpack.c.bf16 %v2416_v33, %v2415_v41 }
 0x872   : >> { %v2425_v19 = vpack.c.bf16 %v2414_v37, %v2413_v54 }
 0x874   : >> { %v3870_v63 = vpop.eup %3869  ;;  %3483 = vmatprep.mubr.msk.bf16.mxu0 %vm1396_vm1, %v2425_v19 }
 0x875   : >> { %v3872_v32 = vpop.eup %3871  ;;  %3484 = vmatmul.mubr.msk.bf16.gmra.mrb[56].mxu0 %vm1396_vm1, %v2426_v31  ;;  %v2419_v21 = vmul.f32 %v3870_v63, %v5010_v47 }
 0x876   : >> { %v3874_v28 = vpop.eup %3873  ;;  %v2417_v25 = vmul.f32 %v3872_v32, %v5013_v44 }
 0x877   : >> { %v3876_v3 = vpop.eup %3875  ;;  %v2420_v35 = vmul.f32 %v3874_v28, %v5017_v20 }
 0x878   : >> { %v2418_v22 = vmul.f32 %v3876_v3, %v5021_v27 }
 0x879   : >> { %v2428_v58 = vpack.c.bf16 %v2420_v35, %v2419_v21 }
 0x87a   : >> { %v2427_v39 = vpack.c.bf16 %v2418_v22, %v2417_v25 }
 0x87c   : >> { %3487 = vmatprep.mubr.msk.bf16.mxu0 %vm1396_vm1, %v2427_v39 }
 0x87d   : >> { %3488 = vmatmul.mubr.msk.bf16.gmra.mrb[60].mxu0 %vm1396_vm1, %v2428_v58 }
 0x937   : >> { %v3477_v55 = vpop.f32.mrb[48].mxu0 }
 0x938   : >> { %v2587_v47 = vadd.f32 %v3477_v55, %v4707_v48  ;;  %v2522_v62 = vpop.f32.mrb[49].mxu0 }
 0x939   : >> { %v2585_v20 = vadd.f32 %v2522_v62, %v4704_v14  ;;  %v3478_v44 = vpop.f32.mrb[50].mxu0 }
 0x93a   : >> { %v5055_v5 = vadd.f32 %v3106_v23, %v2587_v47   ;;  %v2588_v53 = vadd.f32 %v3478_v44, %v4715_v40  ;;  %v2525_v9 = vpop.f32.mrb[51].mxu0 }
 0x93b   : >> { %v5058_v3 = vadd.f32 %v3106_v23, %v2585_v20   ;;  %v2586_v13 = vadd.f32 %v2525_v9, %v4710_v56 }
 0x93c   : >> { %v5210_v27 = vmov %v5055_v5  ;;  %v5061_v6 = vadd.f32 %v3106_v23, %v2588_v53  }
 0x93d   : >> { %v5211_v38 = vmov %v5058_v3  ;;  %v5063_v10 = vadd.f32 %v3106_v23, %v2586_v13  }
 0x93e   : >> { %v5212_v24 = vmov %v5061_v6  ;;  %v5234_v3 = vmov %v5211_v38 }
 0x93f   : >> { %v5213_v0 = vmov %v5063_v10  ;;  %v3481_v59 = vpop.f32.mrb[52].mxu0 }
 0x940   : >> { %v2591_v48 = vadd.f32 %v3481_v59, %v4727_v1  ;;  %v2538_v36 = vpop.f32.mrb[53].mxu0 }
 0x941   : >> { %v2589_v14 = vadd.f32 %v2538_v36, %v4722_v4  ;;  %v3482_v30 = vpop.f32.mrb[54].mxu0 }
 0x942   : >> { %v5067_v12 = vadd.f32 %v3106_v23, %v2591_v48   ;;  %v2592_v40 = vadd.f32 %v3482_v30, %v4735_v26  ;;  %v2541_v49 = vpop.f32.mrb[55].mxu0 }
 0x943   : >> { %v5070_v10 = vadd.f32 %v3106_v23, %v2589_v14   ;;  %v2590_v56 = vadd.f32 %v2541_v49, %v4730_v42 }
 0x944   : >> { %v5214_v43 = vmov %v5067_v12  ;;  %v5073_v13 = vadd.f32 %v3106_v23, %v2592_v40  }
 0x945   : >> { %v5215_v51 = vmov %v5070_v10  ;;  %v5075_v18 = vadd.f32 %v3106_v23, %v2590_v56  }
 0x946   : >> { %v5216_v60 = vmov %v5073_v13  ;;  %v5230_v10 = vmov %v5215_v51 }
 0x947   : >> { %v5217_v8 = vmov %v5075_v18  ;;  %v5227_v13 = vmov %v5216_v60  ;;  %v2628_v35 = vpack.c.bf16 (%p5086_p4), %v5216_v60, %v5214_v43 }
 0x948   : >> { %v3485_v5 = vpop.f32.mrb[56].mxu0  ;;  %v2627_v3 = vpack.c.bf16 (%p5086_p4), %v5217_v8, %v5215_v51 }
 0x949   : >> { %v2595_v1 = vadd.f32 %v3485_v5, %v4747_v7  ;;  %v2554_v6 = vpop.f32.mrb[57].mxu0  ;;  %v5232_v5 = vmov %v5210_v27 }
 0x94a   : >> { %v2593_v4 = vadd.f32 %v2554_v6, %v4742_v11  ;;  %v3486_v15 = vpop.f32.mrb[58].mxu0  ;;  %v5231_v6 = vmov %v5212_v24 }
 0x94b   : >> { %v2619_v2 = vadd.f32 %v3106_v23, %v2595_v1   ;;  %v2596_v12 = vadd.f32 %v3486_v15, %v4755_v57  ;;  %v2557_v26 = vpop.f32.mrb[59].mxu0 }
 0x94c   : >> { %v2617_v34 = vadd.f32 %v3106_v23, %v2593_v4   ;;  %v2594_v16 = vadd.f32 %v2557_v26, %v4750_v29  ;;  %v5233_v4 = vmov %v5213_v0  ;;  %v3877_v29 = vld [vmem:[%s5207_s13] sm:$0xff] (%p5086_p4)  }
 0x94d   : >> { %v2620_v61 = vadd.f32 %v3106_v23, %v2596_v12   ;;  %v5224_v18 = vmov %v2619_v2  ;;  %v5228_v12 = vmov %v5214_v43  ;;  %3491 = vmatprep.subr.bf16.mxu0 (%p5086_p4), %v3877_v29  ;;  %3515 = vmatprep.subr.bf16.mxu1 (%p5086_p4), %v3877_v29 }
 0x94e   : >> { %v2618_v42 = vadd.f32 %v3106_v23, %v2594_v16   ;;  %v5226_v16 = vmov %v2617_v34  ;;  %3492 = vmatpush3.bf16.msra.mxu0 (%p5086_p4), %v3877_v29  ;;  %3517 = vmatpush3.bf16.msra.mxu1 (%p5086_p4), %v3877_v29 }
 0x94f   : >> { %v5223_v19 = vmov %v2620_v61 }
 0x950   : >> { %v3489_v46 = vpop.f32.mrb[60].mxu0  ;;  %v2630_v19 = vpack.c.bf16 (%p5086_p4), %v2620_v61, %v2619_v2 }
 0x951   : >> { %v2599_v41 = vadd.f32 %v3489_v46, %v4767_v50  ;;  %v2570_v33 = vpop.f32.mrb[61].mxu0  ;;  %v3878_v50 = vld [vmem:[%s5207_s13 + $0x8] sm:$0xff] (%p5086_p4)  }
 0x952   : >> { %v2597_v54 = vadd.f32 %v2570_v33, %v4762_v17  ;;  %v3490_v7 = vpop.f32.mrb[62].mxu0  ;;  %v5225_v17 = vmov %v2618_v42  ;;  %540 = sbr.rel (!%p5086_p4) target bundleno = 21 (0x15), region = 129  ;;  %3493 = vmatprep.subr.bf16.mxu0 (%p5086_p4), %v3878_v50  ;;  %3516 = vmatprep.subr.bf16.mxu1 (%p5086_p4), %v3878_v50 }
 0x953   : >> { %v2623_v37 = vadd.f32 %v3106_v23, %v2599_v41   ;;  %v2600_v11 = vadd.f32 %v3490_v7, %v4775_v52  ;;  %v2573_v31 = vpop.f32.mrb[63].mxu0  ;;  %v2629_v52 = vpack.c.bf16 (%p5086_p4), %v2618_v42, %v2617_v34  ;;  %v2626_v17 = vpack.c.bf16 (%p5086_p4), %v5212_v24, %v5210_v27  ;;  %3494 = vmatpush3.bf16.msra.mxu0 (%p5086_p4), %v3878_v50 }
 0x954   : >> { %v2621_v63 = vadd.f32 %v3106_v23, %v2597_v54   ;;  %v2598_v57 = vadd.f32 %v2573_v31, %v4770_v45  ;;  %v2625_v45 = vpack.c.bf16 (%p5086_p4), %v5213_v0, %v5211_v38  ;;  %3518 = vmatpush3.bf16.msra.mxu1 (%p5086_p4), %v3878_v50 }
 0x955   : >> { %v2624_v32 = vadd.f32 %v3106_v23, %v2600_v11   ;;  %v5220_v22 = vmov %v2623_v37  ;;  %v5229_v11 = vmov %v5217_v8  ;;  %3503 = vmatprep.mubr.msk.bf16.mxu1 (%p5086_p4), %vm562_vm0, %v2629_v52 }
 0x956   : >> { %v2622_v28 = vadd.f32 %v3106_v23, %v2598_v57   ;;  %v5222_v20 = vmov %v2621_v63  ;;  %3495 = vmatprep.mubr.msk.bf16.mxu0 (%p5086_p4), %vm562_vm0, %v2625_v45  ;;  %v3107_v22 = vld [vmem:[%s5208_s14] ss:$0 sm:$0xff] (%p5086_p4) }
 0x957   : >> { %v5219_v23 = vmov %v2624_v32  ;;  %3496 = vmatmul.mubr.msk.bf16.vlgmr.msra.gmra.mrb[0].mxu0 (%p5086_p4), %vm562_vm0, %v2626_v17  ;;  %3504 = vmatmul.mubr.msk.bf16.vlgmr.msra.gmra.mrb[0].mxu1 (%p5086_p4), %vm562_vm0, %v2630_v19  ;;  %v2632_v25 = vpack.c.bf16 (%p5086_p4), %v2624_v32, %v2623_v37 }
 0x958   : >> { %v5221_v21 = vmov %v2622_v28  ;;  %3499 = vmatprep.mubr.msk.bf16.mxu0 (%p5086_p4), %vm562_vm0, %v2627_v3 }
 0x959   : > { %v2631_v21 = vpack.c.bf16 %v2622_v28, %v2621_v63 }
 0x95b   : > { %3507 = vmatprep.mubr.msk.bf16.mxu1 %vm562_vm0, %v2631_v21 }
 0x95f   : > { %3500 = vmatmul.mubr.msk.bf16.gmra.mrb[4].mxu0 %vm562_vm0, %v2628_v35  ;;  %3508 = vmatmul.mubr.msk.bf16.gmra.mrb[4].mxu1 %vm562_vm0, %v2632_v25 }
 0xa2a   : > { %v3497_v58 = vpop.f32.mrb[0].mxu0  ;;  %v3505_v39 = vpop.f32.mrb[0].mxu1 }
 0xa2b   : > { %v2724_v23 = vadd.f32 %v3497_v58, %v3107_v22  ;;  %v2756_v55 = vadd.f32 %v3505_v39, %v3107_v22  ;;  %v2715_v47 = vpop.f32.mrb[1].mxu0  ;;  %v2747_v62 = vpop.f32.mrb[1].mxu1 }
 0xa2c   : > { %v2716_v20 = vadd.f32 %v3107_v22, %v2715_v47  ;;  %v2748_v44 = vadd.f32 %v3107_v22, %v2747_v62  ;;  %v3498_v27 = vpop.f32.mrb[2].mxu0  ;;  %v3506_v53 = vpop.f32.mrb[2].mxu1 }
 0xa2d   : > { %v3146_v9 = vpack.c.bf16 %v2724_v23, %v2724_v23  ;;  %v3154_v38 = vpack.c.bf16 %v2756_v55, %v2756_v55  ;;  %v2727_v13 = vadd.f32 %v3498_v27, %v3107_v22  ;;  %v2759_v24 = vadd.f32 %v3506_v53, %v3107_v22  ;;  %v2718_v10 = vpop.f32.mrb[3].mxu0  ;;  %v2750_v0 = vpop.f32.mrb[3].mxu1 }
 0xa2e   : > { %v3144_v59 = vpack.c.bf16 %v2716_v20, %v2716_v20  ;;  %v3152_v48 = vpack.c.bf16 %v2748_v44, %v2748_v44  ;;  %v2719_v36 = vadd.f32 %v3107_v22, %v2718_v10  ;;  %v2751_v14 = vadd.f32 %v3107_v22, %v2750_v0 }
 0xa2f   : > { %2845 = vst.msk [vmem:[%s4117_s27 + $0x8] sm:$0xf] %vm2842_vm2, %v3146_v9  ;;  %v3147_v30 = vpack.c.bf16 %v2727_v13, %v2727_v13  ;;  %v3155_v43 = vpack.c.bf16 %v2759_v24, %v2759_v24  ;;  %2853 = vst.msk [vmem:[%s4117_s27 + $0x28] sm:$0xf] %vm2842_vm2, %v3154_v38 }
 0xa30   : > { %2843 = vst.msk [vmem:[%s4117_s27] sm:$0xf] %vm2842_vm2, %v3144_v59  ;;  %v3145_v40 = vpack.c.bf16 %v2719_v36, %v2719_v36  ;;  %v3153_v49 = vpack.c.bf16 %v2751_v14, %v2751_v14  ;;  %2851 = vst.msk [vmem:[%s4117_s27 + $0x20] sm:$0xf] %vm2842_vm2, %v3152_v48 }
 0xa31   : > { %2846 = vst.msk [vmem:[%s4117_s27 + $0xc] sm:$0xf] %vm2842_vm2, %v3147_v30  ;;  %2854 = vst.msk [vmem:[%s4117_s27 + $0x2c] sm:$0xf] %vm2842_vm2, %v3155_v43 }
 0xa32   : > { %2844 = vst.msk [vmem:[%s4117_s27 + $0x4] sm:$0xf] %vm2842_vm2, %v3145_v40  ;;  %v3501_v51 = vpop.f32.mrb[4].mxu0  ;;  %v3509_v56 = vpop.f32.mrb[4].mxu1  ;;  %2852 = vst.msk [vmem:[%s4117_s27 + $0x24] sm:$0xf] %vm2842_vm2, %v3153_v49 }
 0xa33   : > { %v2740_v60 = vadd.f32 %v3501_v51, %v3107_v22  ;;  %v2772_v18 = vadd.f32 %v3509_v56, %v3107_v22  ;;  %v2731_v8 = vpop.f32.mrb[5].mxu0  ;;  %v2763_v5 = vpop.f32.mrb[5].mxu1 }
 0xa34   : > { %v2732_v1 = vadd.f32 %v3107_v22, %v2731_v8  ;;  %v2764_v6 = vadd.f32 %v3107_v22, %v2763_v5  ;;  %v3502_v4 = vpop.f32.mrb[6].mxu0  ;;  %v3510_v15 = vpop.f32.mrb[6].mxu1 }
 0xa35   : > { %v3150_v2 = vpack.c.bf16 %v2740_v60, %v2740_v60  ;;  %v3158_v12 = vpack.c.bf16 %v2772_v18, %v2772_v18  ;;  %v2743_v26 = vadd.f32 %v3502_v4, %v3107_v22  ;;  %v2775_v34 = vadd.f32 %v3510_v15, %v3107_v22  ;;  %v2734_v16 = vpop.f32.mrb[7].mxu0  ;;  %v2766_v61 = vpop.f32.mrb[7].mxu1 }
 0xa36   : > { %v3148_v42 = vpack.c.bf16 %v2732_v1, %v2732_v1  ;;  %v3156_v46 = vpack.c.bf16 %v2764_v6, %v2764_v6  ;;  %v2735_v41 = vadd.f32 %v3107_v22, %v2734_v16  ;;  %v2767_v33 = vadd.f32 %v3107_v22, %v2766_v61 }
 0xa37   : > { %2849 = vst.msk [vmem:[%s4117_s27 + $0x18] sm:$0xf] %vm2842_vm2, %v3150_v2  ;;  %v3151_v54 = vpack.c.bf16 %v2743_v26, %v2743_v26  ;;  %v3159_v7 = vpack.c.bf16 %v2775_v34, %v2775_v34  ;;  %2857 = vst.msk [vmem:[%s4117_s27 + $0x38] sm:$0xf] %vm2842_vm2, %v3158_v12 }
 0xa38   : > { %2847 = vst.msk [vmem:[%s4117_s27 + $0x10] sm:$0xf] %vm2842_vm2, %v3148_v42  ;;  %v3149_v37 = vpack.c.bf16 %v2735_v41, %v2735_v41  ;;  %v3157_v11 = vpack.c.bf16 %v2767_v33, %v2767_v33  ;;  %2855 = vst.msk [vmem:[%s4117_s27 + $0x30] sm:$0xf] %vm2842_vm2, %v3156_v46 }
 0xa39   : > { %2850 = vst.msk [vmem:[%s4117_s27 + $0x1c] sm:$0xf] %vm2842_vm2, %v3151_v54  ;;  %2858 = vst.msk [vmem:[%s4117_s27 + $0x3c] sm:$0xf] %vm2842_vm2, %v3159_v7 }
 0xa3a   : > { %2848 = vst.msk [vmem:[%s4117_s27 + $0x14] sm:$0xf] %vm2842_vm2, %v3149_v37  ;;  %2856 = vst.msk [vmem:[%s4117_s27 + $0x34] sm:$0xf] %vm2842_vm2, %v3157_v11 }
 0xa3b PF: > { %s25_s18 = sadd.s32 1, %s3953_s18  }
 0xa3c   : > { %p22_p5 = scmp.ge.s32.totalorder %s25_s18, 6  }
 0xa3e   :  { %24 = sbr.rel (!%p22_p5) target bundleno = 1 (0x1), region = 140 }

// kernel: mobilevit_block.5
= control target key start
LH: loop header
LB: loop body
LE: loop exit
PB: predicated region body
PF: predicated region fallthrough
CT: control target
= control target key end

     0   :  { %s1774_s21 = smov 0   ;;  %s2063_s0 = inlined_call_operand.vmem [shape: bf16[4,4,162], index: 0, kind: input, shape index: {}]   ;;  %s2064_s1 = inlined_call_operand.vmem [shape: bf16[4,4,162], index: 1, kind: input, shape index: {}]   ;;  %s2065_s2 = inlined_call_operand.vmem [shape: bf16[2,128], index: 2, kind: input, shape index: {}]   ;;  %s2066_s3 = inlined_call_operand.vmem [shape: bf16[9,8,4], index: 3, kind: input, shape index: {}]   ;;  %s2067_s4 = inlined_call_operand.vmem [shape: bf16[9,8,4], index: 4, kind: input, shape index: {}]   ;;  %s2068_s5 = inlined_call_operand.vmem [shape: f32[8,1], index: 5, kind: input, shape index: {}]   ;;  %s2069_s6 = inlined_call_operand.vmem [shape: f32[8,512], index: 6, kind: output, shape index: {}]  }
   0x1 LB: > { %s1495_s22 = sadd.s32 4294967295, %s1720_s21   ;;  %p1499_p0 = scmp.ge.s32.totalorder %s1720_s21, 1  ;;  %s1720_s21 = sphi %s1774_s21, %s16_s21  }
   0x2   : > { %p222_p1 = scmp.lt.s32.totalorder %s1720_s21, 5 }
   0x4   : > { %p223_p2 = pnand %p1499_p0, %p222_p1 }
   0x5   : > { %v271_v0 = vld [vmem:[%s2065_s2] sm:$0x1] (!%p223_p2)  ;;  %v277_v1 = vlaneseq (!%p223_p2)  ;;  %v1722_v2 = vmov (!%p223_p2), 1983009808   ;;  %p256_p3 = scmp.lt.s32.totalorder (!%p223_p2), %s1495_s22, 3  ;;  %s1723_s29 = smov (!%p223_p2), 2  }
   0x6   : > { %226 = sbr.rel (%p223_p2) target bundleno = 536 (0x218), region = 44  ;;  %v287_v3 = vunpack.c.l.s4 (!%p223_p2), %v1722_v2  ;;  %v274_v4 = vshrl.u32 (!%p223_p2), %v271_v0, 16  ;;  %v394_v6 = vpack.i.b16 (!%p223_p2), %v271_v0, %v271_v0  ;;  %s1724_s30 = smov (!%p223_p2), 18   ;;  %v1729_v18 = vmov (!%p223_p2), 0.0   ;;  %v282_v21 = vld [vmem:[%s2066_s3] sm:$0xf] (!%p223_p2) }
   0x7   : > { %v278_v5 = vshrl.u32 (!%p223_p2), %v277_v1, 7  ;;  %s1725_s7 = smov (!%p223_p2), 16   ;;  %s1726_s8 = smov (!%p223_p2), 32   ;;  %1579 = vmatprep.subr.bf16.mxu0 (!%p223_p2), %v1729_v18  ;;  %vm1730_vm0 = vmmov (!%p223_p2), 0   ;;  %1585 = vmatprep.subr.bf16.mxu1 (!%p223_p2), %v1729_v18  ;;  %vm304_vm1 = vcmask (!%p223_p2), 1041408   ;;  %vm300_vm2 = vcmask (!%p223_p2), 31744  }
   0x8   : > { %v288_v7 = vunpack.c.0.s8 (!%p223_p2), %v287_v3  ;;  %v275_v8 = vpack.i.b16 (!%p223_p2), %v274_v4, %v274_v4  ;;  %s1727_s9 = smov (!%p223_p2), 34   ;;  %s1728_s10 = smov (!%p223_p2), 127   ;;  %1581 = vmatprep.mubr.msk.bf16.mxu0 (!%p223_p2), %vm1730_vm0, %v1729_v18  ;;  %1587 = vmatprep.mubr.msk.bf16.mxu1 (!%p223_p2), %vm1730_vm0, %v1729_v18  ;;  %vm411_vm3 = vcmask (!%p223_p2), 15360   ;;  %vm490_vm4 = vcmask (!%p223_p2), 130048   ;;  %v1505_v47 = vld [vmem:[%s2066_s3 + $0x4] sm:$0xf] (!%p223_p2) }
   0x9   : > { %v279_v9 = vsub.s32 (!%p223_p2), 0, %v278_v5  ;;  %vm616_vm5 = vcmask (!%p223_p2), 146432   ;;  %s1731_s13 = smov (!%p223_p2), 126   ;;  %vm687_vm6 = vcmask (!%p223_p2), 261120   ;;  %vm298_vm7 = vcmask (!%p223_p2), 1039360   ;;  %s1732_s14 = smov (!%p223_p2), 112  }
   0xa   : > { %v1787_v10 = vsub.s32 (!%p223_p2), %v288_v7, %v278_v5  ;;  %s1733_s17 = smov (!%p223_p2), 111   ;;  %vm813_vm8 = vcmask (!%p223_p2), 277504   ;;  %s1734_s18 = smov (!%p223_p2), 110   ;;  %vm430_vm9 = vcmask (!%p223_p2), 1031168   ;;  %vm509_vm10 = vcmask (!%p223_p2), 916480  }
   0xb   : > { %v399_v11 = vrot.slane (!%p223_p2), %v394_v6, %v279_v9  ;;  %v1789_v12 = vrot.slane (!%p223_p2), %v275_v8, %v279_v9  ;;  %s1735_s19 = smov (!%p223_p2), 96   ;;  %s1736_s26 = smov (!%p223_p2), 95   ;;  %vm564_vm11 = vcmask (!%p223_p2), 908288   ;;  %vm635_vm12 = vcmask (!%p223_p2), 900096  }
   0xc   : > { %vm706_vm13 = vcmask (!%p223_p2), 785408   ;;  %vm761_vm14 = vcmask (!%p223_p2), 777216   ;;  %vm832_vm15 = vcmask (!%p223_p2), 769024  }
   0xd   : > { %s2071_s22 = smov (!%p256_p3, %s1495_s22), 3  ;;  %v407_v13 = vrot.slane %v399_v11, %v1787_v10  ;;  %v486_v14 = vrot.slane %v1789_v12, %v1787_v10  ;;  %v1738_v11 = vmov 0  }
   0xe   : > { %s1541_s25 = sshll.u32 %s2071_s22, 2  ;;  %1712 = vset.pattern.permute.xlu1 %v1738_v11  ;;  %1713 = vset.pattern.permute.xlu0 %v1738_v11  ;;  %s1504_s15 = sshll.u32 %s2071_s22, 3 }
   0xf   : > { %s260_s28 = scalar_lea.vmem %s2063_s0, %s1541_s25  ;;  %408 = vrot.lane.b32.xlu0 %v407_v13, %s1723_s29  ;;  %613 = vrot.lane.b32.xlu1 %v407_v13, %s1724_s30  ;;  %s265_s24 = scalar_lea.vmem %s2064_s1, %s1541_s25 }
  0x10   : > { %v1800_v15 = vld [vmem:[%s260_s28] sm:$0xf]  ;;  %s1737_s25 = smov 94  }
  0x11   : > { %v1804_v16 = vrot.slane %v1800_v15, %v1787_v10  ;;  %v281_v19 = vmul.bf16 %v1789_v12, %v1800_v15  ;;  %v1877_v56 = vld [vmem:[%s265_s24] sm:$0xf] }
  0x12   : > { %v940_v58 = vrot.slane %v1877_v56, %v1787_v10 }
  0x13   : > { %487 = vrot.lane.b32.xlu0 %v486_v14, %s1725_s7  ;;  %684 = vrot.lane.b32.xlu1 %v486_v14, %s1726_s8  ;;  %v1810_v17 = vcombine.high %v1804_v16, %v1804_v16  ;;  %v352_v20 = vsel %vm304_vm1, %v281_v19, 0  ;;  %v1422_v14 = vld [vmem:[%s2068_s5] sm:$0xff] }
  0x14   : > { %1586 = vmatpush3.bf16.msra.mxu1 %v352_v20  ;;  %v941_v60 = vcombine.high %v940_v58, %v940_v58  ;;  %v1508_v20 = vld [vmem:[%s2066_s3 + $0x8] sm:$0xf] }
  0x15   : > { %1597 = vmatprep.subr.bf16.mxu1 %v1729_v18 }
  0x17   : > { %810 = vrot.lane.b32.xlu0 %v407_v13, %s1727_s9  ;;  %294 = vrot.lane.b32.xlu1 %v1804_v16, %s1728_s10 }
  0x18   : > { %1588 = vmatmul.mubr.msk.bf16.vlgmr.msra.gmra.mrb[0].mxu1 %vm300_vm2, %v282_v21 }
  0x19   : > { %1599 = vmatprep.mubr.msk.bf16.mxu1 %vm1730_vm0, %v1729_v18 }
  0x1b   : > { %296 = vrot.lane.b32.xlu0 %v1810_v17, %s1728_s10 }
  0x81   : > { %v409_v22 = vpop.permute.xlu0 %408  ;;  %v614_v23 = vpop.permute.xlu1 %613 }
  0x82   : > { %v410_v24 = vrot.slane %v409_v22, 6  ;;  %v615_v29 = vrot.slane %v614_v23, 6 }
  0x84   : > { %v1830_v25 = vsel %vm411_vm3, %v410_v24, %v409_v22  ;;  %v1840_v36 = vsel %vm616_vm5, %v615_v29, %v614_v23 }
  0x85   : > { %v414_v26 = vmul.bf16 %v1830_v25, %v1800_v15  ;;  %v488_v27 = vpop.permute.xlu0 %487  ;;  %v685_v31 = vpop.permute.xlu1 %684  ;;  %v619_v40 = vmul.bf16 %v1840_v36, %v1800_v15  ;;  %v994_v59 = vmul.bf16 %v1877_v56, %v1830_v25  ;;  %v1176_v1 = vmul.bf16 %v1877_v56, %v1840_v36  ;;  %v1510_v25 = vld [vmem:[%s2066_s3 + $0xc] sm:$0xf] }
  0x86   : > { %v489_v28 = vrot.slane %v488_v27, 6  ;;  %v686_v37 = vrot.slane %v685_v31, 6 }
  0x87   : > { %v424_v30 = vrot.slane %v414_v26, %v1787_v10  ;;  %v629_v49 = vrot.slane %v619_v40, %v1787_v10  ;;  %v1004_v62 = vrot.slane %v994_v59, %v1787_v10  ;;  %v1186_v4 = vrot.slane %v1176_v1, %v1787_v10  ;;  %v1516_v40 = vld [vmem:[%s2066_s3 + $0x18] sm:$0xf] }
  0x88   : > { %v1835_v32 = vsel %vm490_vm4, %v489_v28, %v488_v27  ;;  %v688_v43 = vsel %vm687_vm6, %v686_v37, %v685_v31 }
  0x89   : > { %v493_v33 = vmul.bf16 %v1835_v32, %v1800_v15  ;;  %426 = vrot.lane.b32.xlu1 %v424_v30, %s1731_s13  ;;  %v425_v34 = vcombine.high %v424_v30, %v424_v30  ;;  %v811_v35 = vpop.permute.xlu0 %810  ;;  %v295_v39 = vpop.permute.xlu1 %294  ;;  %v690_v48 = vmul.bf16 %v688_v43, %v1800_v15  ;;  %v630_v51 = vcombine.high %v629_v49, %v629_v49  ;;  %v1512_v30 = vld [vmem:[%s2066_s3 + $0x10] sm:$0xf] }
  0x8a   : > { %v812_v46 = vrot.slane %v811_v35, 6  ;;  %v1058_v61 = vmul.bf16 %v1877_v56, %v1835_v32  ;;  %v1005_v63 = vcombine.high %v1004_v62, %v1004_v62  ;;  %v1240_v3 = vmul.bf16 %v1877_v56, %v688_v43 }
  0x8b   : > { %428 = vrot.lane.b32.xlu0 %v425_v34, %s1731_s13  ;;  %v503_v38 = vrot.slane %v493_v33, %v1787_v10  ;;  %v700_v52 = vrot.slane %v690_v48, %v1787_v10  ;;  %v1187_v5 = vcombine.high %v1186_v4, %v1186_v4 }
  0x8c   : > { %v814_v50 = vsel %vm813_vm8, %v812_v46, %v811_v35  ;;  %v1068_v0 = vrot.slane %v1058_v61, %v1787_v10  ;;  %v1250_v6 = vrot.slane %v1240_v3, %v1787_v10  ;;  %v1514_v35 = vld [vmem:[%s2066_s3 + $0x14] sm:$0xf]  ;;  %v1518_v46 = vld [vmem:[%s2066_s3 + $0x1c] sm:$0xf]  ;;  %v1523_v61 = vld [vmem:[%s2067_s4 + $0x4] sm:$0xf] }
  0x8d   : > { %505 = vrot.lane.b32.xlu1 %v503_v38, %s1732_s14  ;;  %v504_v41 = vcombine.high %v503_v38, %v503_v38  ;;  %v297_v42 = vpop.permute.xlu0 %296  ;;  %v816_v53 = vmul.bf16 %v814_v50, %v1800_v15  ;;  %v701_v54 = vcombine.high %v700_v52, %v700_v52  ;;  %v1358_v7 = vmul.bf16 %v1877_v56, %v814_v50 }
  0x8e   : > { %v299_v44 = vsel %vm298_vm7, %v295_v39, %v297_v42  ;;  %v1069_v2 = vcombine.high %v1068_v0, %v1068_v0  ;;  %v1251_v8 = vcombine.high %v1250_v6, %v1250_v6  ;;  %v882_v42 = vmul.bf16 %v1877_v56, %v1789_v12  ;;  %v883_v56 = vld [vmem:[%s2067_s4] sm:$0xf] }
  0x8f   : > { %507 = vrot.lane.b32.xlu0 %v504_v41, %s1732_s14  ;;  %v306_v45 = vsel %vm304_vm1, %v299_v44, 0  ;;  %v826_v55 = vrot.slane %v816_v53, %v1787_v10  ;;  %v1368_v9 = vrot.slane %v1358_v7, %v1787_v10  ;;  %v1527_v7 = vld [vmem:[%s2067_s4 + $0xc] sm:$0xf] }
  0x90   : > { %1580 = vmatpush3.bf16.msra.mxu0 %v306_v45  ;;  %v888_v12 = vsel %vm304_vm1, %v882_v42, 0 }
  0x91   : > { %560 = vrot.lane.b32.xlu1 %v1804_v16, %s1733_s17  ;;  %1591 = vmatprep.subr.bf16.mxu0 %v1729_v18  ;;  %v827_v57 = vcombine.high %v826_v55, %v826_v55  ;;  %v1369_v13 = vcombine.high %v1368_v9, %v1368_v9 }
  0x93   : > { %562 = vrot.lane.b32.xlu0 %v1810_v17, %s1733_s17  ;;  %1582 = vmatmul.mubr.msk.bf16.vlgmr.msra.gmra.mrb[0].mxu0 %vm300_vm2, %v1505_v47 }
  0x94   : > { %1593 = vmatprep.mubr.msk.bf16.mxu0 %vm1730_vm0, %v1729_v18 }
  0x95   : > { %631 = vrot.lane.b32.xlu1 %v629_v49, %s1734_s18 }
  0x97   : > { %633 = vrot.lane.b32.xlu0 %v630_v51, %s1734_s18  ;;  %v1520_v51 = vld [vmem:[%s2066_s3 + $0x20] sm:$0xf] }
  0x99   : > { %702 = vrot.lane.b32.xlu1 %v700_v52, %s1735_s19 }
  0x9b   : > { %704 = vrot.lane.b32.xlu0 %v701_v54, %s1735_s19 }
  0x9d   : > { %757 = vrot.lane.b32.xlu1 %v1804_v16, %s1736_s26 }
  0x9f   : > { %759 = vrot.lane.b32.xlu0 %v1810_v17, %s1736_s26 }
  0xa1   : > { %828 = vrot.lane.b32.xlu1 %v826_v55, %s1737_s25 }
  0xa3   : > { %830 = vrot.lane.b32.xlu0 %v827_v57, %s1737_s25 }
  0xa5   : > { %942 = vrot.lane.b32.xlu1 %v940_v58, %s1728_s10 }
  0xa7   : > { %944 = vrot.lane.b32.xlu0 %v941_v60, %s1728_s10 }
  0xa9   : > { %1006 = vrot.lane.b32.xlu1 %v1004_v62, %s1731_s13 }
  0xab   : > { %1008 = vrot.lane.b32.xlu0 %v1005_v63, %s1731_s13 }
  0xad   : > { %1070 = vrot.lane.b32.xlu1 %v1068_v0, %s1732_s14 }
  0xaf   : > { %1072 = vrot.lane.b32.xlu0 %v1069_v2, %s1732_s14  ;;  %v1525_v2 = vld [vmem:[%s2067_s4 + $0x8] sm:$0xf] }
  0xb1   : > { %1124 = vrot.lane.b32.xlu1 %v940_v58, %s1733_s17 }
  0xb3   : > { %1126 = vrot.lane.b32.xlu0 %v941_v60, %s1733_s17 }
  0xb5   : > { %1188 = vrot.lane.b32.xlu1 %v1186_v4, %s1734_s18 }
  0xb7   : > { %1190 = vrot.lane.b32.xlu0 %v1187_v5, %s1734_s18  ;;  %s269_s18 = scalar_lea.vmem %s2069_s6, %s1504_s15 }
  0xb9   : > { %1252 = vrot.lane.b32.xlu1 %v1250_v6, %s1735_s19 }
  0xbb   : > { %1254 = vrot.lane.b32.xlu0 %v1251_v8, %s1735_s19 }
  0xbd   : > { %1306 = vrot.lane.b32.xlu1 %v940_v58, %s1736_s26 }
  0xbf   : > { %1308 = vrot.lane.b32.xlu0 %v941_v60, %s1736_s26 }
  0xc1   : > { %1370 = vrot.lane.b32.xlu1 %v1368_v9, %s1737_s25 }
  0xc3   : > { %1372 = vrot.lane.b32.xlu0 %v1369_v13, %s1737_s25 }
  0xc5   : > { %1425 = vperm.xlu1 %1712, %v1422_v14   ;;  %v1529_v14 = vld [vmem:[%s2067_s4 + $0x10] sm:$0xf] }
  0xfb   : > { %v427_v15 = vpop.permute.xlu1 %426 }
  0xfd   : > { %v429_v16 = vpop.permute.xlu0 %428 }
  0xfe   : > { %v431_v10 = vsel %vm430_vm9, %v427_v15, %v429_v16 }
  0xff   : > { %v436_v17 = vsel %vm304_vm1, %v431_v10, 0  ;;  %v506_v19 = vpop.permute.xlu1 %505 }
 0x100   : > { %1592 = vmatpush3.bf16.msra.mxu0 %v436_v17 }
 0x101   : > { %v508_v21 = vpop.permute.xlu0 %507  ;;  %1603 = vmatprep.subr.bf16.mxu0 %v1729_v18 }
 0x102   : > { %v510_v22 = vsel %vm509_vm10, %v506_v19, %v508_v21  ;;  %v1531_v19 = vld [vmem:[%s2067_s4 + $0x14] sm:$0xf] }
 0x103   : > { %v515_v23 = vsel %vm304_vm1, %v510_v22, 0  ;;  %v561_v24 = vpop.permute.xlu1 %560  ;;  %1594 = vmatmul.mubr.msk.bf16.vlgmr.msra.gmra.mrb[4].mxu0 %vm300_vm2, %v1508_v20 }
 0x104   : > { %1598 = vmatpush3.bf16.msra.mxu1 %v515_v23  ;;  %1605 = vmatprep.mubr.msk.bf16.mxu0 %vm1730_vm0, %v1729_v18  ;;  %v1533_v23 = vld [vmem:[%s2067_s4 + $0x18] sm:$0xf] }
 0x105   : > { %v563_v26 = vpop.permute.xlu0 %562  ;;  %1609 = vmatprep.subr.bf16.mxu1 %v1729_v18 }
 0x106   : > { %v565_v27 = vsel %vm564_vm11, %v561_v24, %v563_v26 }
 0x107   : > { %v570_v28 = vsel %vm304_vm1, %v565_v27, 0  ;;  %v632_v29 = vpop.permute.xlu1 %631  ;;  %1600 = vmatmul.mubr.msk.bf16.vlgmr.msra.gmra.mrb[4].mxu1 %vm300_vm2, %v1510_v25 }
 0x108   : > { %1604 = vmatpush3.bf16.msra.mxu0 %v570_v28  ;;  %1611 = vmatprep.mubr.msk.bf16.mxu1 %vm1730_vm0, %v1729_v18  ;;  %v1535_v28 = vld [vmem:[%s2067_s4 + $0x1c] sm:$0xf] }
 0x109   : > { %v634_v31 = vpop.permute.xlu0 %633  ;;  %1615 = vmatprep.subr.bf16.mxu0 %v1729_v18 }
 0x10a   : > { %v636_v32 = vsel %vm635_vm12, %v632_v29, %v634_v31  ;;  %v1537_v29 = vld [vmem:[%s2067_s4 + $0x20] sm:$0xf] }
 0x10b   : > { %v641_v33 = vsel %vm304_vm1, %v636_v32, 0  ;;  %v703_v34 = vpop.permute.xlu1 %702  ;;  %1606 = vmatmul.mubr.msk.bf16.vlgmr.msra.gmra.mrb[8].mxu0 %vm300_vm2, %v1512_v30  ;;  %v388_v30 = vpop.f32.mrb[0].mxu1 }
 0x10c   : > { %1610 = vmatpush3.bf16.msra.mxu1 %v641_v33  ;;  %1617 = vmatprep.mubr.msk.bf16.mxu0 %vm1730_vm0, %v1729_v18  ;;  %v1589_v31 = vpop.f32.mrb[1].mxu1 }
 0x10d   : > { %v705_v36 = vpop.permute.xlu0 %704  ;;  %1621 = vmatprep.subr.bf16.mxu1 %v1729_v18  ;;  %v391_v32 = vpop.f32.mrb[2].mxu1 }
 0x10e   : > { %v707_v37 = vsel %vm706_vm13, %v703_v34, %v705_v36  ;;  %v1590_v33 = vpop.f32.mrb[3].mxu1 }
 0x10f   : > { %v712_v38 = vsel %vm304_vm1, %v707_v37, 0  ;;  %v758_v39 = vpop.permute.xlu1 %757  ;;  %1612 = vmatmul.mubr.msk.bf16.vlgmr.msra.gmra.mrb[8].mxu1 %vm300_vm2, %v1514_v35 }
 0x110   : > { %1616 = vmatpush3.bf16.msra.mxu0 %v712_v38  ;;  %1623 = vmatprep.mubr.msk.bf16.mxu1 %vm1730_vm0, %v1729_v18 }
 0x111   : > { %v760_v41 = vpop.permute.xlu0 %759  ;;  %1627 = vmatprep.subr.bf16.mxu0 %v1729_v18 }
 0x112   : > { %v762_v43 = vsel %vm761_vm14, %v758_v39, %v760_v41 }
 0x113   : > { %v767_v44 = vsel %vm304_vm1, %v762_v43, 0  ;;  %v829_v45 = vpop.permute.xlu1 %828  ;;  %1618 = vmatmul.mubr.msk.bf16.vlgmr.msra.gmra.mrb[12].mxu0 %vm300_vm2, %v1516_v40 }
 0x114   : > { %1622 = vmatpush3.bf16.msra.mxu1 %v767_v44  ;;  %1629 = vmatprep.mubr.msk.bf16.mxu0 %vm1730_vm0, %v1729_v18 }
 0x115   : > { %v831_v47 = vpop.permute.xlu0 %830  ;;  %1633 = vmatprep.subr.bf16.mxu1 %v1729_v18 }
 0x116   : > { %v833_v48 = vsel %vm832_vm15, %v829_v45, %v831_v47 }
 0x117   : > { %v838_v49 = vsel %vm304_vm1, %v833_v48, 0  ;;  %v943_v50 = vpop.permute.xlu1 %942  ;;  %1624 = vmatmul.mubr.msk.bf16.vlgmr.msra.gmra.mrb[12].mxu1 %vm300_vm2, %v1518_v46 }
 0x118   : > { %1628 = vmatpush3.bf16.msra.mxu0 %v838_v49  ;;  %1634 = vmatpush3.bf16.msra.mxu1 %v888_v12 }
 0x119   : > { %v945_v52 = vpop.permute.xlu0 %944  ;;  %1635 = vmatprep.mubr.msk.bf16.mxu1 %vm1730_vm0, %v1729_v18  ;;  %1639 = vmatprep.subr.bf16.mxu0 %v1729_v18 }
 0x11a   : > { %v946_v53 = vsel %vm298_vm7, %v943_v50, %v945_v52  ;;  %1645 = vmatprep.subr.bf16.mxu1 %v1729_v18 }
 0x11b   : > { %v951_v54 = vsel %vm304_vm1, %v946_v53, 0  ;;  %v1007_v55 = vpop.permute.xlu1 %1006  ;;  %1630 = vmatmul.mubr.msk.bf16.vlgmr.msra.gmra.mrb[16].mxu0 %vm300_vm2, %v1520_v51 }
 0x11c   : > { %1640 = vmatpush3.bf16.msra.mxu0 %v951_v54  ;;  %1641 = vmatprep.mubr.msk.bf16.mxu0 %vm1730_vm0, %v1729_v18 }
 0x11d   : > { %v1009_v57 = vpop.permute.xlu0 %1008  ;;  %1651 = vmatprep.subr.bf16.mxu0 %v1729_v18 }
 0x11e   : > { %v1010_v58 = vsel %vm430_vm9, %v1007_v55, %v1009_v57 }
 0x11f   : > { %v1015_v59 = vsel %vm304_vm1, %v1010_v58, 0  ;;  %v1071_v60 = vpop.permute.xlu1 %1070  ;;  %1636 = vmatmul.mubr.msk.bf16.vlgmr.msra.gmra.mrb[16].mxu1 %vm300_vm2, %v883_v56 }
 0x120   : > { %1646 = vmatpush3.bf16.msra.mxu1 %v1015_v59  ;;  %1647 = vmatprep.mubr.msk.bf16.mxu1 %vm1730_vm0, %v1729_v18 }
 0x121   : > { %v1073_v62 = vpop.permute.xlu0 %1072  ;;  %1657 = vmatprep.subr.bf16.mxu1 %v1729_v18 }
 0x122   : > { %v1074_v63 = vsel %vm509_vm10, %v1071_v60, %v1073_v62 }
 0x123   : > { %v1079_v0 = vsel %vm304_vm1, %v1074_v63, 0  ;;  %v1125_v1 = vpop.permute.xlu1 %1124  ;;  %1642 = vmatmul.mubr.msk.bf16.vlgmr.msra.gmra.mrb[20].mxu0 %vm300_vm2, %v1523_v61 }
 0x124   : > { %1652 = vmatpush3.bf16.msra.mxu0 %v1079_v0  ;;  %1653 = vmatprep.mubr.msk.bf16.mxu0 %vm1730_vm0, %v1729_v18 }
 0x125   : > { %v1127_v3 = vpop.permute.xlu0 %1126  ;;  %1663 = vmatprep.subr.bf16.mxu0 %v1729_v18 }
 0x126   : > { %v1128_v4 = vsel %vm564_vm11, %v1125_v1, %v1127_v3 }
 0x127   : > { %v1133_v5 = vsel %vm304_vm1, %v1128_v4, 0  ;;  %v1189_v6 = vpop.permute.xlu1 %1188  ;;  %1648 = vmatmul.mubr.msk.bf16.vlgmr.msra.gmra.mrb[20].mxu1 %vm300_vm2, %v1525_v2 }
 0x128   : > { %1658 = vmatpush3.bf16.msra.mxu1 %v1133_v5  ;;  %1659 = vmatprep.mubr.msk.bf16.mxu1 %vm1730_vm0, %v1729_v18 }
 0x129   : > { %v1191_v8 = vpop.permute.xlu0 %1190  ;;  %1669 = vmatprep.subr.bf16.mxu1 %v1729_v18 }
 0x12a   : > { %v1192_v9 = vsel %vm635_vm12, %v1189_v6, %v1191_v8 }
 0x12b   : > { %v1197_v11 = vsel %vm304_vm1, %v1192_v9, 0  ;;  %v1253_v13 = vpop.permute.xlu1 %1252  ;;  %1654 = vmatmul.mubr.msk.bf16.vlgmr.msra.gmra.mrb[24].mxu0 %vm300_vm2, %v1527_v7 }
 0x12c   : > { %1664 = vmatpush3.bf16.msra.mxu0 %v1197_v11  ;;  %1665 = vmatprep.mubr.msk.bf16.mxu0 %vm1730_vm0, %v1729_v18 }
 0x12d   : > { %v1255_v15 = vpop.permute.xlu0 %1254  ;;  %1675 = vmatprep.subr.bf16.mxu0 %v1729_v18 }
 0x12e   : > { %v1256_v16 = vsel %vm706_vm13, %v1253_v13, %v1255_v15 }
 0x12f   : > { %v1261_v10 = vsel %vm304_vm1, %v1256_v16, 0  ;;  %v1307_v17 = vpop.permute.xlu1 %1306  ;;  %1660 = vmatmul.mubr.msk.bf16.vlgmr.msra.gmra.mrb[24].mxu1 %vm300_vm2, %v1529_v14 }
 0x130   : > { %1670 = vmatpush3.bf16.msra.mxu1 %v1261_v10  ;;  %1671 = vmatprep.mubr.msk.bf16.mxu1 %vm1730_vm0, %v1729_v18 }
 0x131   : > { %v1309_v20 = vpop.permute.xlu0 %1308  ;;  %1681 = vmatprep.subr.bf16.mxu1 %v1729_v18 }
 0x132   : > { %v1310_v21 = vsel %vm761_vm14, %v1307_v17, %v1309_v20 }
 0x133   : > { %v1315_v22 = vsel %vm304_vm1, %v1310_v21, 0  ;;  %1666 = vmatmul.mubr.msk.bf16.vlgmr.msra.gmra.mrb[28].mxu0 %vm300_vm2, %v1531_v19  ;;  %v1371_v24 = vpop.permute.xlu1 %1370 }
 0x134   : > { %1676 = vmatpush3.bf16.msra.mxu0 %v1315_v22  ;;  %1677 = vmatprep.mubr.msk.bf16.mxu0 %vm1730_vm0, %v1729_v18 }
 0x135   : > { %v1373_v25 = vpop.permute.xlu0 %1372 }
 0x136   : > { %v1374_v26 = vsel %vm832_vm15, %v1371_v24, %v1373_v25 }
 0x137   : > { %v1379_v27 = vsel %vm304_vm1, %v1374_v26, 0  ;;  %1672 = vmatmul.mubr.msk.bf16.vlgmr.msra.gmra.mrb[28].mxu1 %vm300_vm2, %v1533_v23 }
 0x138   : > { %1682 = vmatpush3.bf16.msra.mxu1 %v1379_v27  ;;  %1683 = vmatprep.mubr.msk.bf16.mxu1 %vm1730_vm0, %v1729_v18 }
 0x13b   : > { %1678 = vmatmul.mubr.msk.bf16.vlgmr.msra.gmra.mrb[32].mxu0 %vm300_vm2, %v1535_v28 }
 0x13f   : > { %1684 = vmatmul.mubr.msk.bf16.vlgmr.msra.gmra.mrb[32].mxu1 %vm300_vm2, %v1537_v29 }
 0x166   : > { %v342_v34 = vpop.f32.mrb[0].mxu0 }
 0x167   : > { %v1583_v35 = vpop.f32.mrb[1].mxu0  ;;  %v389_v36 = vadd.f32 %v388_v30, %v342_v34 }
 0x168   : > { %v345_v37 = vpop.f32.mrb[2].mxu0 }
 0x169   : > { %v1584_v38 = vpop.f32.mrb[3].mxu0 }
 0x1d6   : > { %v472_v39 = vpop.f32.mrb[4].mxu0 }
 0x1d7   : > { %v478_v40 = vadd.f32 %v472_v39, %v389_v36  ;;  %v1595_v18 = vpop.f32.mrb[5].mxu0 }
 0x1d8   : > { %v475_v41 = vpop.f32.mrb[6].mxu0 }
 0x1d9   : > { %v1596_v42 = vpop.f32.mrb[7].mxu0 }
 0x1da   : > { %v551_v43 = vpop.f32.mrb[4].mxu1 }
 0x1db   : > { %v557_v44 = vadd.f32 %v551_v43, %v478_v40  ;;  %v1601_v45 = vpop.f32.mrb[5].mxu1 }
 0x1dc   : > { %v554_v46 = vpop.f32.mrb[6].mxu1 }
 0x1dd   : > { %v1602_v47 = vpop.f32.mrb[7].mxu1 }
 0x1de   : > { %v606_v12 = vpop.f32.mrb[8].mxu0 }
 0x1df   : > { %v612_v48 = vadd.f32 %v606_v12, %v557_v44  ;;  %v1607_v49 = vpop.f32.mrb[9].mxu0 }
 0x1e0   : > { %v609_v50 = vpop.f32.mrb[10].mxu0  ;;  %v1426_v49 = vpop.permute.xlu1 %1425 }
 0x1e1   : > { %v1608_v51 = vpop.f32.mrb[11].mxu0 }
 0x1e2   : > { %v677_v52 = vpop.f32.mrb[8].mxu1 }
 0x1e3   : > { %v683_v53 = vadd.f32 %v677_v52, %v612_v48  ;;  %v1613_v54 = vpop.f32.mrb[9].mxu1 }
 0x1e4   : > { %v680_v55 = vpop.f32.mrb[10].mxu1 }
 0x1e5   : > { %v1614_v56 = vpop.f32.mrb[11].mxu1 }
 0x1e6   : > { %v748_v57 = vpop.f32.mrb[12].mxu0 }
 0x1e7   : > { %v754_v58 = vadd.f32 %v748_v57, %v683_v53  ;;  %v1619_v59 = vpop.f32.mrb[13].mxu0 }
 0x1e8   : > { %v751_v60 = vpop.f32.mrb[14].mxu0 }
 0x1e9   : > { %v1620_v61 = vpop.f32.mrb[15].mxu0 }
 0x1ea   : > { %v803_v62 = vpop.f32.mrb[12].mxu1 }
 0x1eb   : > { %v809_v63 = vadd.f32 %v803_v62, %v754_v58  ;;  %v1625_v0 = vpop.f32.mrb[13].mxu1 }
 0x1ec   : > { %v806_v1 = vpop.f32.mrb[14].mxu1 }
 0x1ed   : > { %v1626_v2 = vpop.f32.mrb[15].mxu1 }
 0x1ee   : > { %v874_v3 = vpop.f32.mrb[16].mxu0 }
 0x1ef   : > { %v880_v4 = vadd.f32 %v874_v3, %v809_v63  ;;  %v1631_v5 = vpop.f32.mrb[17].mxu0 }
 0x1f0   : > { %v877_v6 = vpop.f32.mrb[18].mxu0 }
 0x1f1   : > { %v1632_v7 = vpop.f32.mrb[19].mxu0 }
 0x1f2   : > { %v924_v8 = vpop.f32.mrb[16].mxu1 }
 0x1f3   : > { %v930_v9 = vadd.f32 %v924_v8, %v880_v4  ;;  %v1637_v11 = vpop.f32.mrb[17].mxu1 }
 0x1f4   : > { %v927_v13 = vpop.f32.mrb[18].mxu1 }
 0x1f5   : > { %v1638_v14 = vpop.f32.mrb[19].mxu1 }
 0x1f6   : > { %v987_v15 = vpop.f32.mrb[20].mxu0 }
 0x1f7   : > { %v993_v16 = vadd.f32 %v987_v15, %v930_v9  ;;  %v1643_v10 = vpop.f32.mrb[21].mxu0 }
 0x1f8   : > { %v990_v17 = vpop.f32.mrb[22].mxu0 }
 0x1f9   : > { %v1644_v19 = vpop.f32.mrb[23].mxu0 }
 0x1fa   : > { %v1051_v20 = vpop.f32.mrb[20].mxu1 }
 0x1fb   : > { %v1057_v21 = vadd.f32 %v1051_v20, %v993_v16  ;;  %v1649_v22 = vpop.f32.mrb[21].mxu1 }
 0x1fc   : > { %v1054_v23 = vpop.f32.mrb[22].mxu1 }
 0x1fd   : > { %v1650_v24 = vpop.f32.mrb[23].mxu1 }
 0x1fe   : > { %v1115_v25 = vpop.f32.mrb[24].mxu0 }
 0x1ff   : > { %v1121_v26 = vadd.f32 %v1115_v25, %v1057_v21  ;;  %v1655_v27 = vpop.f32.mrb[25].mxu0 }
 0x200   : > { %v1118_v28 = vpop.f32.mrb[26].mxu0 }
 0x201   : > { %v1656_v29 = vpop.f32.mrb[27].mxu0 }
 0x202   : > { %v1169_v30 = vpop.f32.mrb[24].mxu1 }
 0x203   : > { %v1175_v31 = vadd.f32 %v1169_v30, %v1121_v26  ;;  %v1661_v32 = vpop.f32.mrb[25].mxu1 }
 0x204   : > { %v1172_v33 = vpop.f32.mrb[26].mxu1 }
 0x205   : > { %v1662_v34 = vpop.f32.mrb[27].mxu1 }
 0x206   : > { %v1233_v35 = vpop.f32.mrb[28].mxu0 }
 0x207   : > { %v1239_v36 = vadd.f32 %v1233_v35, %v1175_v31  ;;  %v1667_v37 = vpop.f32.mrb[29].mxu0 }
 0x208   : > { %v1236_v38 = vpop.f32.mrb[30].mxu0 }
 0x209   : > { %v1668_v39 = vpop.f32.mrb[31].mxu0 }
 0x20a   : > { %v1297_v40 = vpop.f32.mrb[28].mxu1 }
 0x20b   : > { %v1303_v18 = vadd.f32 %v1297_v40, %v1239_v36  ;;  %v1673_v41 = vpop.f32.mrb[29].mxu1 }
 0x20c   : > { %v1300_v42 = vpop.f32.mrb[30].mxu1 }
 0x20d   : > { %v1674_v43 = vpop.f32.mrb[31].mxu1 }
 0x20e   : > { %v1351_v44 = vpop.f32.mrb[32].mxu0 }
 0x20f   : > { %v1357_v45 = vadd.f32 %v1351_v44, %v1303_v18  ;;  %v1679_v46 = vpop.f32.mrb[33].mxu0 }
 0x210   : > { %v1354_v47 = vpop.f32.mrb[34].mxu0 }
 0x211   : > { %v1680_v12 = vpop.f32.mrb[35].mxu0 }
 0x212   : > { %v1415_v48 = vpop.f32.mrb[32].mxu1 }
 0x213   : > { %v1421_v50 = vadd.f32 %v1415_v48, %v1357_v45  ;;  %v1685_v51 = vpop.f32.mrb[33].mxu1 }
 0x214   : > { %v1418_v52 = vpop.f32.mrb[34].mxu1 }
 0x215   : > { %v1428_v53 = vadd.f32 %v1426_v49, %v1421_v50  ;;  %v1686_v54 = vpop.f32.mrb[35].mxu1 }
 0x217   : > { %1429 = vst [vmem:[%s269_s18] sm:$0xff] %v1428_v53 }
 0x218 PF: > { %s16_s21 = sadd.s32 1, %s1720_s21  }
 0x219   : > { %p13_p4 = scmp.ge.s32.totalorder %s16_s21, 6  }
 0x21b   :  { %15 = sbr.rel (!%p13_p4) target bundleno = 1 (0x1), region = 93 }

</bundles_post_ra>
